<compile_context>
chip_gen: v5e
topology: v5e:2x2
jax: 0.10.0
libtpu: 0.0.40
codegen_flags: <defaults>
</compile_context>

<pallas_src>
import functools
from typing import NamedTuple

import jax
import jax.numpy as jnp
from jax.experimental import pallas as pl
from jax.experimental.pallas import tpu as pltpu

KSIZE = 8
# (C_out, stride, pad) of the four SepConv1d blocks; kernel size is 8 for all of them.
_CONV_SPECS = ((32, 2, 3), (64, 4, 2), (128, 4, 2), (256, 4, 2))


class _LayerCfg(NamedTuple):
    stride: int
    pad: int
    c_in: int
    c_out: int
    l_in: int
    l_pad: int
    l_out: int


def _build_cfg(raw_ni, raw_size):
    cfg, c_in, l_in = [], raw_ni, raw_size
    for c_out, stride, pad in _CONV_SPECS:
        l_pad = l_in + 2 * pad
        assert l_pad >= KSIZE and (l_pad - KSIZE) % stride == 0, (
            "stride chain must divide the length exactly (use raw_size % 128 == 0)")
        l_out = (l_pad - KSIZE) // stride + 1
        cfg.append(_LayerCfg(stride, pad, c_in, c_out, l_in, l_pad, l_out))
        c_in, l_in = c_out, l_out
    return cfg


# --------------------------- parameter folding (offline) ---------------------------
def fold_sepconv(w_dw, b_dw, w_pw, b_pw):
    """PyTorch-layout depthwise + pointwise Conv1d -> single effective matmul.

    w_dw: (C_in, 1, K)  b_dw: (C_in,)  w_pw: (C_out, C_in, 1)  b_pw: (C_out,)
    returns W_eff (K*C_in, C_out) with row index k*C_in + c, and b_eff (1, C_out).
    """
    c_in, _, k = w_dw.shape
    c_out = w_pw.shape[0]
    wdw = jnp.transpose(w_dw[:, 0, :])            # (K, C_in)
    wpw = jnp.transpose(w_pw[:, :, 0])            # (C_in, C_out)
    w_eff = (wdw[:, :, None] * wpw[None, :, :]).reshape(k * c_in, c_out)
    b_eff = b_dw[None, :] @ wpw + b_pw[None, :]   # (1, C_out)
    return w_eff.astype(jnp.float32), b_eff.astype(jnp.float32)


def fold_head(w1, b1, w2, b2, w3, b3, c4, l4):
    """PyTorch Linear weights (out, in) -> kernel layout.

    The channel-major Flatten (flat index = c*L4 + l) is folded into a row permutation of
    W1, so the kernel consumes the conv activations in their natural (l, c) order.
    """
    w1hat = jnp.transpose(w1).reshape(c4, l4, w1.shape[0])      # (C4, L4, 64)
    w1hat = jnp.transpose(w1hat, (1, 0, 2))                     # (L4, C4, 64)
    return (w1hat.astype(jnp.float32), b1[None, :].astype(jnp.float32),
            jnp.transpose(w2).astype(jnp.float32), b2[None, :].astype(jnp.float32),
            jnp.transpose(w3).astype(jnp.float32), b3[None, :].astype(jnp.float32))


# --------------------------------- fused kernel ------------------------------------
def _fused_kernel(cfg, batch_block, l4,
                  x_ref,
                  we0, be0, we1, be1, we2, be2, we3, be3,
                  w1_ref, b1_ref, w2_ref, b2_ref, w3_ref, b3_ref,
                  o_ref,
                  pad1_ref, pad2_ref, pad3_ref):
    we_refs = (we0, we1, we2, we3)
    be_refs = (be0, be1, be2, be3)
    pad_refs = (x_ref, pad1_ref, pad2_ref, pad3_ref)   # x_ref is already zero-padded

    # Zero the padded activation scratch so the conv halo rows read as zeros.
    pad1_ref[...] = jnp.zeros_like(pad1_ref)
    pad2_ref[...] = jnp.zeros_like(pad2_ref)
    pad3_ref[...] = jnp.zeros_like(pad3_ref)

    y = None
    for i, lc in enumerate(cfg):
        src = pad_refs[i]
        # In-kernel im2col: K strided sublane reads per batch element, concatenated on the
        # lane axis -> (batch_block * L_out, K * C_in); batch folded into the matmul M dim.
        rows = []
        for n in range(batch_block):
            base = n * lc.l_pad
            taps = [src[pl.ds(base + k, lc.l_out, stride=lc.stride), :]
                    for k in range(KSIZE)]
            rows.append(jnp.concatenate(taps, axis=1))
        x_unf = rows[0] if batch_block == 1 else jnp.concatenate(rows, axis=0)
        # Folded depthwise+pointwise conv as one MXU matmul, then bias + ReLU.
        y = jnp.dot(x_unf, we_refs[i][...], preferred_element_type=jnp.float32)
        y = jnp.maximum(y + be_refs[i][...], 0.0)
        # Dropout (eval mode) is identity -> omitted.
        if i + 1 < len(cfg):
            nxt = cfg[i + 1]
            dst = pad_refs[i + 1]
            for n in range(batch_block):
                dst[pl.ds(n * nxt.l_pad + nxt.pad, lc.l_out), :] = (
                    y[n * lc.l_out:(n + 1) * lc.l_out, :])

    # MLP head. The channel-major Flatten order lives in w1_ref's row permutation, so the
    # first Linear is an accumulation over the L4 surviving length positions.
    acc = None
    for l in range(l4):
        if l4 == 1:
            y_l = y                                            # (batch_block, 256)
        else:
            y_l = jnp.concatenate(
                [y[n * l4 + l:n * l4 + l + 1, :] for n in range(batch_block)], axis=0)
        part = jnp.dot(y_l, w1_ref[l], preferred_element_type=jnp.float32)
        acc = part if acc is None else acc + part
    h = jnp.maximum(acc + b1_ref[...], 0.0)
    h = jnp.maximum(
        jnp.dot(h, w2_ref[...], preferred_element_type=jnp.float32) + b2_ref[...], 0.0)
    o_ref[...] = jnp.dot(h, w3_ref[...], preferred_element_type=jnp.float32) + b3_ref[...]


# ----------------------------------- wrapper ---------------------------------------
def classifier_1dconv_forward(params, t_raw, *, batch_block=None):
    """Forward pass of Classifier_1dconv (batch_norm=None, eval mode).

    t_raw: (N, raw_ni, raw_size), PyTorch NCL convention.
    """
    n, raw_ni, raw_size = t_raw.shape
    cfg = _build_cfg(raw_ni, raw_size)
    l4, c4 = cfg[-1].l_out, cfg[-1].c_out

    convs, head = params["convs"], params["head"]
    for lc, (w_eff, _) in zip(cfg, convs):
        assert w_eff.shape == (KSIZE * lc.c_in, lc.c_out)
    assert head[0].shape[:2] == (l4, c4), "head weight does not match conv output size"
    no = head[4].shape[1]

    if batch_block is None:
        batch_block = n
    assert n % batch_block == 0
    grid_b = n // batch_block
    if grid_b > 1:
        # Partial blocks must respect the (8, 128) rule on their second-minor dim.
        assert (batch_block * cfg[0].l_pad) % 8 == 0 and batch_block % 8 == 0

    # NCL -> NLC (channels on lanes), zero-pad the length for conv 0, fold batch into rows.
    x = jnp.transpose(t_raw, (0, 2, 1))
    x = jnp.pad(x, ((0, 0), (cfg[0].pad, cfg[0].pad), (0, 0)))
    x = x.reshape(n * cfg[0].l_pad, raw_ni).astype(jnp.float32)

    weight_args = [a for blk in convs for a in blk] + list(head)

    def _const_spec(arr):
        nd = arr.ndim
        return pl.BlockSpec(arr.shape, lambda b, _nd=nd: (0,) * _nd)

    in_specs = [pl.BlockSpec((batch_block * cfg[0].l_pad, raw_ni), lambda b: (b, 0))]
    in_specs += [_const_spec(a) for a in weight_args]

    kernel = functools.partial(_fused_kernel, tuple(cfg), batch_block, l4)

    return pl.pallas_call(
        kernel,
        out_shape=jax.ShapeDtypeStruct((n, no), jnp.float32),
        grid=(grid_b,),
        in_specs=in_specs,
        out_specs=pl.BlockSpec((batch_block, no), lambda b: (b, 0)),
        scratch_shapes=[pltpu.VMEM((batch_block * lc.l_pad, lc.c_in), jnp.float32)
                        for lc in cfg[1:]],
        compiler_params=pltpu.CompilerParams(dimension_semantics=("parallel",)),
    )(x, *weight_args)


# ------------------------------- parameter setup ------------------------------------
def _uniform(key, shape, bound):
    return jax.random.uniform(key, shape, jnp.float32, -bound, bound)


def init_params(key, raw_ni, no, raw_size):
    """Initialise PyTorch-layout parameters, then fold them into the kernel layout.

    A checkpoint loader would call fold_sepconv / fold_head on the torch tensors the same way.
    """
    cfg = _build_cfg(raw_ni, raw_size)
    l4, c4 = cfg[-1].l_out, cfg[-1].c_out
    flat_in = 256 * int(raw_size / (2 * 4 * 4 * 4))
    assert flat_in == c4 * l4, "flat_in formula requires raw_size to divide the stride chain"

    convs = []
    for lc in cfg:
        key, k1, k2, k3, k4 = jax.random.split(key, 5)
        b_dw = 1.0 / KSIZE ** 0.5              # depthwise fan_in = (ni/groups) * K = K
        b_pw = 1.0 / lc.c_in ** 0.5            # pointwise fan_in = C_in * 1
        w_dw = _uniform(k1, (lc.c_in, 1, KSIZE), b_dw)     # torch Conv1d weight layout
        bias_dw = _uniform(k2, (lc.c_in,), b_dw)
        w_pw = _uniform(k3, (lc.c_out, lc.c_in, 1), b_pw)
        bias_pw = _uniform(k4, (lc.c_out,), b_pw)
        convs.append(fold_sepconv(w_dw, bias_dw, w_pw, bias_pw))

    key, k1, k2, k3, k4, k5, k6 = jax.random.split(key, 7)
    w1 = _uniform(k1, (64, flat_in), 1.0 / flat_in ** 0.5)   # torch Linear (out, in) layout
    b1 = _uniform(k2, (64,), 1.0 / flat_in ** 0.5)
    w2 = _uniform(k3, (64, 64), 1.0 / 8.0)
    b2 = _uniform(k4, (64,), 1.0 / 8.0)
    w3 = _uniform(k5, (no, 64), 1.0 / 8.0)
    b3 = _uniform(k6, (no,), 1.0 / 8.0)
    head = fold_head(w1, b1, w2, b2, w3, b3, c4, l4)
    return {"convs": convs, "head": head}


if __name__ == "__main__":
    N, raw_ni, raw_size, n_classes = 2, 4, 128, 5            # raw_size multiple of 128
    key = jax.random.PRNGKey(0)
    kp, kx = jax.random.split(key)
    params = init_params(kp, raw_ni, n_classes, raw_size)
    t_raw = jax.random.normal(kx, (N, raw_ni, raw_size), jnp.float32)

    fwd = jax.jit(functools.partial(classifier_1dconv_forward, params))
    out = fwd(t_raw)
    jax.block_until_ready(out)
    assert out.shape == (N, n_classes), out.shape
    assert bool(jnp.all(jnp.isfinite(out)))
    print("KERNEL_OK")
</pallas_src>

<mosaic_0001>
module attributes {stable_mosaic.version = 11 : i64} {
  func.func @_fused_kernel(%arg0: i32, %arg1: memref<268x4xf32, #tpu.memory_space<vmem>>, %arg2: memref<32x32xf32, #tpu.memory_space<vmem>>, %arg3: memref<1x32xf32, #tpu.memory_space<vmem>>, %arg4: memref<256x64xf32, #tpu.memory_space<vmem>>, %arg5: memref<1x64xf32, #tpu.memory_space<vmem>>, %arg6: memref<512x128xf32, #tpu.memory_space<vmem>>, %arg7: memref<1x128xf32, #tpu.memory_space<vmem>>, %arg8: memref<1024x256xf32, #tpu.memory_space<vmem>>, %arg9: memref<1x256xf32, #tpu.memory_space<vmem>>, %arg10: memref<1x256x64xf32, #tpu.memory_space<vmem>>, %arg11: memref<1x64xf32, #tpu.memory_space<vmem>>, %arg12: memref<64x64xf32, #tpu.memory_space<vmem>>, %arg13: memref<1x64xf32, #tpu.memory_space<vmem>>, %arg14: memref<64x5xf32, #tpu.memory_space<vmem>>, %arg15: memref<1x5xf32, #tpu.memory_space<vmem>>, %arg16: memref<2x5xf32, #tpu.memory_space<vmem>>, %arg17: memref<136x32xf32, #tpu.memory_space<vmem>>, %arg18: memref<40x64xf32, #tpu.memory_space<vmem>>, %arg19: memref<16x128xf32, #tpu.memory_space<vmem>>) attributes {dimension_semantics = [#tpu.dimension_semantics<parallel>], iteration_bounds = array<i64: 1>, scalar_prefetch = 0 : i64, scratch_operands = 3 : i64, tpu.core_type = #tpu.core_type<tc>, window_params = [{transform_indices = @transform_0, window_bounds = array<i64: 268, 4>}, {pipeline_mode = #tpu.pipeline_mode<synchronous>, transform_indices = @transform_1, window_bounds = array<i64: 32, 32>}, {pipeline_mode = #tpu.pipeline_mode<synchronous>, transform_indices = @transform_2, window_bounds = array<i64: 1, 32>}, {pipeline_mode = #tpu.pipeline_mode<synchronous>, transform_indices = @transform_3, window_bounds = array<i64: 256, 64>}, {pipeline_mode = #tpu.pipeline_mode<synchronous>, transform_indices = @transform_4, window_bounds = array<i64: 1, 64>}, {pipeline_mode = #tpu.pipeline_mode<synchronous>, transform_indices = @transform_5, window_bounds = array<i64: 512, 128>}, {pipeline_mode = #tpu.pipeline_mode<synchronous>, transform_indices = @transform_6, window_bounds = array<i64: 1, 128>}, {pipeline_mode = #tpu.pipeline_mode<synchronous>, transform_indices = @transform_7, window_bounds = array<i64: 1024, 256>}, {pipeline_mode = #tpu.pipeline_mode<synchronous>, transform_indices = @transform_8, window_bounds = array<i64: 1, 256>}, {pipeline_mode = #tpu.pipeline_mode<synchronous>, transform_indices = @transform_9, window_bounds = array<i64: 1, 256, 64>}, {pipeline_mode = #tpu.pipeline_mode<synchronous>, transform_indices = @transform_10, window_bounds = array<i64: 1, 64>}, {pipeline_mode = #tpu.pipeline_mode<synchronous>, transform_indices = @transform_11, window_bounds = array<i64: 64, 64>}, {pipeline_mode = #tpu.pipeline_mode<synchronous>, transform_indices = @transform_12, window_bounds = array<i64: 1, 64>}, {pipeline_mode = #tpu.pipeline_mode<synchronous>, transform_indices = @transform_13, window_bounds = array<i64: 64, 5>}, {pipeline_mode = #tpu.pipeline_mode<synchronous>, transform_indices = @transform_14, window_bounds = array<i64: 1, 5>}, {transform_indices = @transform_15, window_bounds = array<i64: 2, 5>}]} {
    %cst = arith.constant 0.000000e+00 : f32
    %0 = vector.broadcast %cst : f32 to vector<136x32xf32>
    %c0 = arith.constant 0 : index
    %c0_0 = arith.constant 0 : index
    %1 = vector.load %arg17[%c0, %c0_0] : memref<136x32xf32, #tpu.memory_space<vmem>>, vector<136x32xf32>
    tpu.vector_store %arg17[%c0, %c0_0], %0 {strides = array<i32>} : memref<136x32xf32, #tpu.memory_space<vmem>>, vector<136x32xf32>,
    %cst_1 = arith.constant 0.000000e+00 : f32
    %2 = vector.broadcast %cst_1 : f32 to vector<40x64xf32>
    %c0_2 = arith.constant 0 : index
    %c0_3 = arith.constant 0 : index
    %3 = vector.load %arg18[%c0_2, %c0_3] : memref<40x64xf32, #tpu.memory_space<vmem>>, vector<40x64xf32>
    tpu.vector_store %arg18[%c0_2, %c0_3], %2 {strides = array<i32>} : memref<40x64xf32, #tpu.memory_space<vmem>>, vector<40x64xf32>,
    %cst_4 = arith.constant 0.000000e+00 : f32
    %4 = vector.broadcast %cst_4 : f32 to vector<16x128xf32>
    %c0_5 = arith.constant 0 : index
    %c0_6 = arith.constant 0 : index
    %5 = vector.load %arg19[%c0_5, %c0_6] : memref<16x128xf32, #tpu.memory_space<vmem>>, vector<16x128xf32>
    tpu.vector_store %arg19[%c0_5, %c0_6], %4 {strides = array<i32>} : memref<16x128xf32, #tpu.memory_space<vmem>>, vector<16x128xf32>,
    %c0_7 = arith.constant 0 : index
    %c0_8 = arith.constant 0 : index
    %6 = tpu.strided_load %arg1[%c0_7, %c0_8] {strides = array<i32: 2, 1>} : memref<268x4xf32, #tpu.memory_space<vmem>>, vector<64x4xf32>
    %c1 = arith.constant 1 : index
    %c0_9 = arith.constant 0 : index
    %7 = tpu.strided_load %arg1[%c1, %c0_9] {strides = array<i32: 2, 1>} : memref<268x4xf32, #tpu.memory_space<vmem>>, vector<64x4xf32>
    %c2 = arith.constant 2 : index
    %c0_10 = arith.constant 0 : index
    %8 = tpu.strided_load %arg1[%c2, %c0_10] {strides = array<i32: 2, 1>} : memref<268x4xf32, #tpu.memory_space<vmem>>, vector<64x4xf32>
    %c3 = arith.constant 3 : index
    %c0_11 = arith.constant 0 : index
    %9 = tpu.strided_load %arg1[%c3, %c0_11] {strides = array<i32: 2, 1>} : memref<268x4xf32, #tpu.memory_space<vmem>>, vector<64x4xf32>
    %c4 = arith.constant 4 : index
    %c0_12 = arith.constant 0 : index
    %10 = tpu.strided_load %arg1[%c4, %c0_12] {strides = array<i32: 2, 1>} : memref<268x4xf32, #tpu.memory_space<vmem>>, vector<64x4xf32>
    %c5 = arith.constant 5 : index
    %c0_13 = arith.constant 0 : index
    %11 = tpu.strided_load %arg1[%c5, %c0_13] {strides = array<i32: 2, 1>} : memref<268x4xf32, #tpu.memory_space<vmem>>, vector<64x4xf32>
    %c6 = arith.constant 6 : index
    %c0_14 = arith.constant 0 : index
    %12 = tpu.strided_load %arg1[%c6, %c0_14] {strides = array<i32: 2, 1>} : memref<268x4xf32, #tpu.memory_space<vmem>>, vector<64x4xf32>
    %c7 = arith.constant 7 : index
    %c0_15 = arith.constant 0 : index
    %13 = tpu.strided_load %arg1[%c7, %c0_15] {strides = array<i32: 2, 1>} : memref<268x4xf32, #tpu.memory_space<vmem>>, vector<64x4xf32>
    %14 = tpu.concatenate %6, %7, %8, %9, %10, %11, %12, %13 in 1 : vector<64x4xf32>, vector<64x4xf32>, vector<64x4xf32>, vector<64x4xf32>, vector<64x4xf32>, vector<64x4xf32>, vector<64x4xf32>, vector<64x4xf32> -> vector<64x32xf32>
    %c134 = arith.constant 134 : index
    %c0_16 = arith.constant 0 : index
    %15 = tpu.strided_load %arg1[%c134, %c0_16] {strides = array<i32: 2, 1>} : memref<268x4xf32, #tpu.memory_space<vmem>>, vector<64x4xf32>
    %c135 = arith.constant 135 : index
    %c0_17 = arith.constant 0 : index
    %16 = tpu.strided_load %arg1[%c135, %c0_17] {strides = array<i32: 2, 1>} : memref<268x4xf32, #tpu.memory_space<vmem>>, vector<64x4xf32>
    %c136 = arith.constant 136 : index
    %c0_18 = arith.constant 0 : index
    %17 = tpu.strided_load %arg1[%c136, %c0_18] {strides = array<i32: 2, 1>} : memref<268x4xf32, #tpu.memory_space<vmem>>, vector<64x4xf32>
    %c137 = arith.constant 137 : index
    %c0_19 = arith.constant 0 : index
    %18 = tpu.strided_load %arg1[%c137, %c0_19] {strides = array<i32: 2, 1>} : memref<268x4xf32, #tpu.memory_space<vmem>>, vector<64x4xf32>
    %c138 = arith.constant 138 : index
    %c0_20 = arith.constant 0 : index
    %19 = tpu.strided_load %arg1[%c138, %c0_20] {strides = array<i32: 2, 1>} : memref<268x4xf32, #tpu.memory_space<vmem>>, vector<64x4xf32>
    %c139 = arith.constant 139 : index
    %c0_21 = arith.constant 0 : index
    %20 = tpu.strided_load %arg1[%c139, %c0_21] {strides = array<i32: 2, 1>} : memref<268x4xf32, #tpu.memory_space<vmem>>, vector<64x4xf32>
    %c140 = arith.constant 140 : index
    %c0_22 = arith.constant 0 : index
    %21 = tpu.strided_load %arg1[%c140, %c0_22] {strides = array<i32: 2, 1>} : memref<268x4xf32, #tpu.memory_space<vmem>>, vector<64x4xf32>
    %c141 = arith.constant 141 : index
    %c0_23 = arith.constant 0 : index
    %22 = tpu.strided_load %arg1[%c141, %c0_23] {strides = array<i32: 2, 1>} : memref<268x4xf32, #tpu.memory_space<vmem>>, vector<64x4xf32>
    %23 = tpu.concatenate %15, %16, %17, %18, %19, %20, %21, %22 in 1 : vector<64x4xf32>, vector<64x4xf32>, vector<64x4xf32>, vector<64x4xf32>, vector<64x4xf32>, vector<64x4xf32>, vector<64x4xf32>, vector<64x4xf32> -> vector<64x32xf32>
    %24 = tpu.concatenate %14, %23 in 0 : vector<64x32xf32>, vector<64x32xf32> -> vector<128x32xf32>
    %c0_24 = arith.constant 0 : index
    %c0_25 = arith.constant 0 : index
    %25 = vector.load %arg2[%c0_24, %c0_25] : memref<32x32xf32, #tpu.memory_space<vmem>>, vector<32x32xf32>
    %cst_26 = arith.constant dense<0.000000e+00> : vector<128x32xf32>
    %26 = tpu.matmul %24, %25, %cst_26 {dimension_numbers = #tpu.dot_dimension_numbers<[1], [0], [0], [1], [0, 0, 1, 1], [], []>} : vector<128x32xf32>, vector<32x32xf32>, vector<128x32xf32> -> vector<128x32xf32>
    %c0_27 = arith.constant 0 : index
    %c0_28 = arith.constant 0 : index
    %27 = vector.load %arg3[%c0_27, %c0_28] : memref<1x32xf32, #tpu.memory_space<vmem>>, vector<1x32xf32>
    %28 = vector.broadcast %27 : vector<1x32xf32> to vector<128x32xf32>
    %29 = arith.addf %26, %28 : vector<128x32xf32>
    %cst_29 = arith.constant 0.000000e+00 : f32
    %30 = vector.broadcast %cst_29 : f32 to vector<128x32xf32>
    %31 = arith.maximumf %29, %30 : vector<128x32xf32>
    %32 = vector.extract_strided_slice %31 {offsets = [0, 0], sizes = [64, 32], strides = [1, 1]} : vector<128x32xf32> to vector<64x32xf32>
    %c2_30 = arith.constant 2 : index
    %c0_31 = arith.constant 0 : index
    %33 = vector.load %arg17[%c2_30, %c0_31] : memref<136x32xf32, #tpu.memory_space<vmem>>, vector<64x32xf32>
    tpu.vector_store %arg17[%c2_30, %c0_31], %32 {strides = array<i32>} : memref<136x32xf32, #tpu.memory_space<vmem>>, vector<64x32xf32>,
    %34 = vector.extract_strided_slice %31 {offsets = [64, 0], sizes = [64, 32], strides = [1, 1]} : vector<128x32xf32> to vector<64x32xf32>
    %c70 = arith.constant 70 : index
    %c0_32 = arith.constant 0 : index
    %35 = vector.load %arg17[%c70, %c0_32] : memref<136x32xf32, #tpu.memory_space<vmem>>, vector<64x32xf32>
    tpu.vector_store %arg17[%c70, %c0_32], %34 {strides = array<i32>} : memref<136x32xf32, #tpu.memory_space<vmem>>, vector<64x32xf32>,
    %c0_33 = arith.constant 0 : index
    %c0_34 = arith.constant 0 : index
    %36 = tpu.strided_load %arg17[%c0_33, %c0_34] {strides = array<i32: 4, 1>} : memref<136x32xf32, #tpu.memory_space<vmem>>, vector<16x32xf32>
    %c1_35 = arith.constant 1 : index
    %c0_36 = arith.constant 0 : index
    %37 = tpu.strided_load %arg17[%c1_35, %c0_36] {strides = array<i32: 4, 1>} : memref<136x32xf32, #tpu.memory_space<vmem>>, vector<16x32xf32>
    %c2_37 = arith.constant 2 : index
    %c0_38 = arith.constant 0 : index
    %38 = tpu.strided_load %arg17[%c2_37, %c0_38] {strides = array<i32: 4, 1>} : memref<136x32xf32, #tpu.memory_space<vmem>>, vector<16x32xf32>
    %c3_39 = arith.constant 3 : index
    %c0_40 = arith.constant 0 : index
    %39 = tpu.strided_load %arg17[%c3_39, %c0_40] {strides = array<i32: 4, 1>} : memref<136x32xf32, #tpu.memory_space<vmem>>, vector<16x32xf32>
    %c4_41 = arith.constant 4 : index
    %c0_42 = arith.constant 0 : index
    %40 = tpu.strided_load %arg17[%c4_41, %c0_42] {strides = array<i32: 4, 1>} : memref<136x32xf32, #tpu.memory_space<vmem>>, vector<16x32xf32>
    %c5_43 = arith.constant 5 : index
    %c0_44 = arith.constant 0 : index
    %41 = tpu.strided_load %arg17[%c5_43, %c0_44] {strides = array<i32: 4, 1>} : memref<136x32xf32, #tpu.memory_space<vmem>>, vector<16x32xf32>
    %c6_45 = arith.constant 6 : index
    %c0_46 = arith.constant 0 : index
    %42 = tpu.strided_load %arg17[%c6_45, %c0_46] {strides = array<i32: 4, 1>} : memref<136x32xf32, #tpu.memory_space<vmem>>, vector<16x32xf32>
    %c7_47 = arith.constant 7 : index
    %c0_48 = arith.constant 0 : index
    %43 = tpu.strided_load %arg17[%c7_47, %c0_48] {strides = array<i32: 4, 1>} : memref<136x32xf32, #tpu.memory_space<vmem>>, vector<16x32xf32>
    %44 = tpu.concatenate %36, %37, %38, %39, %40, %41, %42, %43 in 1 : vector<16x32xf32>, vector<16x32xf32>, vector<16x32xf32>, vector<16x32xf32>, vector<16x32xf32>, vector<16x32xf32>, vector<16x32xf32>, vector<16x32xf32> -> vector<16x256xf32>
    %c68 = arith.constant 68 : index
    %c0_49 = arith.constant 0 : index
    %45 = tpu.strided_load %arg17[%c68, %c0_49] {strides = array<i32: 4, 1>} : memref<136x32xf32, #tpu.memory_space<vmem>>, vector<16x32xf32>
    %c69 = arith.constant 69 : index
    %c0_50 = arith.constant 0 : index
    %46 = tpu.strided_load %arg17[%c69, %c0_50] {strides = array<i32: 4, 1>} : memref<136x32xf32, #tpu.memory_space<vmem>>, vector<16x32xf32>
    %c70_51 = arith.constant 70 : index
    %c0_52 = arith.constant 0 : index
    %47 = tpu.strided_load %arg17[%c70_51, %c0_52] {strides = array<i32: 4, 1>} : memref<136x32xf32, #tpu.memory_space<vmem>>, vector<16x32xf32>
    %c71 = arith.constant 71 : index
    %c0_53 = arith.constant 0 : index
    %48 = tpu.strided_load %arg17[%c71, %c0_53] {strides = array<i32: 4, 1>} : memref<136x32xf32, #tpu.memory_space<vmem>>, vector<16x32xf32>
    %c72 = arith.constant 72 : index
    %c0_54 = arith.constant 0 : index
    %49 = tpu.strided_load %arg17[%c72, %c0_54] {strides = array<i32: 4, 1>} : memref<136x32xf32, #tpu.memory_space<vmem>>, vector<16x32xf32>
    %c73 = arith.constant 73 : index
    %c0_55 = arith.constant 0 : index
    %50 = tpu.strided_load %arg17[%c73, %c0_55] {strides = array<i32: 4, 1>} : memref<136x32xf32, #tpu.memory_space<vmem>>, vector<16x32xf32>
    %c74 = arith.constant 74 : index
    %c0_56 = arith.constant 0 : index
    %51 = tpu.strided_load %arg17[%c74, %c0_56] {strides = array<i32: 4, 1>} : memref<136x32xf32, #tpu.memory_space<vmem>>, vector<16x32xf32>
    %c75 = arith.constant 75 : index
    %c0_57 = arith.constant 0 : index
    %52 = tpu.strided_load %arg17[%c75, %c0_57] {strides = array<i32: 4, 1>} : memref<136x32xf32, #tpu.memory_space<vmem>>, vector<16x32xf32>
    %53 = tpu.concatenate %45, %46, %47, %48, %49, %50, %51, %52 in 1 : vector<16x32xf32>, vector<16x32xf32>, vector<16x32xf32>, vector<16x32xf32>, vector<16x32xf32>, vector<16x32xf32>, vector<16x32xf32>, vector<16x32xf32> -> vector<16x256xf32>
    %54 = tpu.concatenate %44, %53 in 0 : vector<16x256xf32>, vector<16x256xf32> -> vector<32x256xf32>
    %c0_58 = arith.constant 0 : index
    %c0_59 = arith.constant 0 : index
    %55 = vector.load %arg4[%c0_58, %c0_59] : memref<256x64xf32, #tpu.memory_space<vmem>>, vector<256x64xf32>
    %cst_60 = arith.constant dense<0.000000e+00> : vector<32x64xf32>
    %56 = tpu.matmul %54, %55, %cst_60 {dimension_numbers = #tpu.dot_dimension_numbers<[1], [0], [0], [1], [0, 0, 1, 1], [], []>} : vector<32x256xf32>, vector<256x64xf32>, vector<32x64xf32> -> vector<32x64xf32>
    %c0_61 = arith.constant 0 : index
    %c0_62 = arith.constant 0 : index
    %57 = vector.load %arg5[%c0_61, %c0_62] : memref<1x64xf32, #tpu.memory_space<vmem>>, vector<1x64xf32>
    %58 = vector.broadcast %57 : vector<1x64xf32> to vector<32x64xf32>
    %59 = arith.addf %56, %58 : vector<32x64xf32>
    %cst_63 = arith.constant 0.000000e+00 : f32
    %60 = vector.broadcast %cst_63 : f32 to vector<32x64xf32>
    %61 = arith.maximumf %59, %60 : vector<32x64xf32>
    %62 = vector.extract_strided_slice %61 {offsets = [0, 0], sizes = [16, 64], strides = [1, 1]} : vector<32x64xf32> to vector<16x64xf32>
    %c2_64 = arith.constant 2 : index
    %c0_65 = arith.constant 0 : index
    %63 = vector.load %arg18[%c2_64, %c0_65] : memref<40x64xf32, #tpu.memory_space<vmem>>, vector<16x64xf32>
    tpu.vector_store %arg18[%c2_64, %c0_65], %62 {strides = array<i32>} : memref<40x64xf32, #tpu.memory_space<vmem>>, vector<16x64xf32>,
    %64 = vector.extract_strided_slice %61 {offsets = [16, 0], sizes = [16, 64], strides = [1, 1]} : vector<32x64xf32> to vector<16x64xf32>
    %c22 = arith.constant 22 : index
    %c0_66 = arith.constant 0 : index
    %65 = vector.load %arg18[%c22, %c0_66] : memref<40x64xf32, #tpu.memory_space<vmem>>, vector<16x64xf32>
    tpu.vector_store %arg18[%c22, %c0_66], %64 {strides = array<i32>} : memref<40x64xf32, #tpu.memory_space<vmem>>, vector<16x64xf32>,
    %c0_67 = arith.constant 0 : index
    %c0_68 = arith.constant 0 : index
    %66 = tpu.strided_load %arg18[%c0_67, %c0_68] {strides = array<i32: 4, 1>} : memref<40x64xf32, #tpu.memory_space<vmem>>, vector<4x64xf32>
    %c1_69 = arith.constant 1 : index
    %c0_70 = arith.constant 0 : index
    %67 = tpu.strided_load %arg18[%c1_69, %c0_70] {strides = array<i32: 4, 1>} : memref<40x64xf32, #tpu.memory_space<vmem>>, vector<4x64xf32>
    %c2_71 = arith.constant 2 : index
    %c0_72 = arith.constant 0 : index
    %68 = tpu.strided_load %arg18[%c2_71, %c0_72] {strides = array<i32: 4, 1>} : memref<40x64xf32, #tpu.memory_space<vmem>>, vector<4x64xf32>
    %c3_73 = arith.constant 3 : index
    %c0_74 = arith.constant 0 : index
    %69 = tpu.strided_load %arg18[%c3_73, %c0_74] {strides = array<i32: 4, 1>} : memref<40x64xf32, #tpu.memory_space<vmem>>, vector<4x64xf32>
    %c4_75 = arith.constant 4 : index
    %c0_76 = arith.constant 0 : index
    %70 = tpu.strided_load %arg18[%c4_75, %c0_76] {strides = array<i32: 4, 1>} : memref<40x64xf32, #tpu.memory_space<vmem>>, vector<4x64xf32>
    %c5_77 = arith.constant 5 : index
    %c0_78 = arith.constant 0 : index
    %71 = tpu.strided_load %arg18[%c5_77, %c0_78] {strides = array<i32: 4, 1>} : memref<40x64xf32, #tpu.memory_space<vmem>>, vector<4x64xf32>
    %c6_79 = arith.constant 6 : index
    %c0_80 = arith.constant 0 : index
    %72 = tpu.strided_load %arg18[%c6_79, %c0_80] {strides = array<i32: 4, 1>} : memref<40x64xf32, #tpu.memory_space<vmem>>, vector<4x64xf32>
    %c7_81 = arith.constant 7 : index
    %c0_82 = arith.constant 0 : index
    %73 = tpu.strided_load %arg18[%c7_81, %c0_82] {strides = array<i32: 4, 1>} : memref<40x64xf32, #tpu.memory_space<vmem>>, vector<4x64xf32>
    %74 = tpu.concatenate %66, %67, %68, %69, %70, %71, %72, %73 in 1 : vector<4x64xf32>, vector<4x64xf32>, vector<4x64xf32>, vector<4x64xf32>, vector<4x64xf32>, vector<4x64xf32>, vector<4x64xf32>, vector<4x64xf32> -> vector<4x512xf32>
    %c20 = arith.constant 20 : index
    %c0_83 = arith.constant 0 : index
    %75 = tpu.strided_load %arg18[%c20, %c0_83] {strides = array<i32: 4, 1>} : memref<40x64xf32, #tpu.memory_space<vmem>>, vector<4x64xf32>
    %c21 = arith.constant 21 : index
    %c0_84 = arith.constant 0 : index
    %76 = tpu.strided_load %arg18[%c21, %c0_84] {strides = array<i32: 4, 1>} : memref<40x64xf32, #tpu.memory_space<vmem>>, vector<4x64xf32>
    %c22_85 = arith.constant 22 : index
    %c0_86 = arith.constant 0 : index
    %77 = tpu.strided_load %arg18[%c22_85, %c0_86] {strides = array<i32: 4, 1>} : memref<40x64xf32, #tpu.memory_space<vmem>>, vector<4x64xf32>
    %c23 = arith.constant 23 : index
    %c0_87 = arith.constant 0 : index
    %78 = tpu.strided_load %arg18[%c23, %c0_87] {strides = array<i32: 4, 1>} : memref<40x64xf32, #tpu.memory_space<vmem>>, vector<4x64xf32>
    %c24 = arith.constant 24 : index
    %c0_88 = arith.constant 0 : index
    %79 = tpu.strided_load %arg18[%c24, %c0_88] {strides = array<i32: 4, 1>} : memref<40x64xf32, #tpu.memory_space<vmem>>, vector<4x64xf32>
    %c25 = arith.constant 25 : index
    %c0_89 = arith.constant 0 : index
    %80 = tpu.strided_load %arg18[%c25, %c0_89] {strides = array<i32: 4, 1>} : memref<40x64xf32, #tpu.memory_space<vmem>>, vector<4x64xf32>
    %c26 = arith.constant 26 : index
    %c0_90 = arith.constant 0 : index
    %81 = tpu.strided_load %arg18[%c26, %c0_90] {strides = array<i32: 4, 1>} : memref<40x64xf32, #tpu.memory_space<vmem>>, vector<4x64xf32>
    %c27 = arith.constant 27 : index
    %c0_91 = arith.constant 0 : index
    %82 = tpu.strided_load %arg18[%c27, %c0_91] {strides = array<i32: 4, 1>} : memref<40x64xf32, #tpu.memory_space<vmem>>, vector<4x64xf32>
    %83 = tpu.concatenate %75, %76, %77, %78, %79, %80, %81, %82 in 1 : vector<4x64xf32>, vector<4x64xf32>, vector<4x64xf32>, vector<4x64xf32>, vector<4x64xf32>, vector<4x64xf32>, vector<4x64xf32>, vector<4x64xf32> -> vector<4x512xf32>
    %84 = tpu.concatenate %74, %83 in 0 : vector<4x512xf32>, vector<4x512xf32> -> vector<8x512xf32>
    %c0_92 = arith.constant 0 : index
    %c0_93 = arith.constant 0 : index
    %85 = vector.load %arg6[%c0_92, %c0_93] : memref<512x128xf32, #tpu.memory_space<vmem>>, vector<512x128xf32>
    %cst_94 = arith.constant dense<0.000000e+00> : vector<8x128xf32>
    %86 = tpu.matmul %84, %85, %cst_94 {dimension_numbers = #tpu.dot_dimension_numbers<[1], [0], [0], [1], [0, 0, 1, 1], [], []>} : vector<8x512xf32>, vector<512x128xf32>, vector<8x128xf32> -> vector<8x128xf32>
    %c0_95 = arith.constant 0 : index
    %c0_96 = arith.constant 0 : index
    %87 = vector.load %arg7[%c0_95, %c0_96] : memref<1x128xf32, #tpu.memory_space<vmem>>, vector<1x128xf32>
    %88 = vector.broadcast %87 : vector<1x128xf32> to vector<8x128xf32>
    %89 = arith.addf %86, %88 : vector<8x128xf32>
    %cst_97 = arith.constant 0.000000e+00 : f32
    %90 = vector.broadcast %cst_97 : f32 to vector<8x128xf32>
    %91 = arith.maximumf %89, %90 : vector<8x128xf32>
    %92 = vector.extract_strided_slice %91 {offsets = [0, 0], sizes = [4, 128], strides = [1, 1]} : vector<8x128xf32> to vector<4x128xf32>
    %c2_98 = arith.constant 2 : index
    %c0_99 = arith.constant 0 : index
    %93 = vector.load %arg19[%c2_98, %c0_99] : memref<16x128xf32, #tpu.memory_space<vmem>>, vector<4x128xf32>
    tpu.vector_store %arg19[%c2_98, %c0_99], %92 {strides = array<i32>} : memref<16x128xf32, #tpu.memory_space<vmem>>, vector<4x128xf32>,
    %94 = vector.extract_strided_slice %91 {offsets = [4, 0], sizes = [4, 128], strides = [1, 1]} : vector<8x128xf32> to vector<4x128xf32>
    %c10 = arith.constant 10 : index
    %c0_100 = arith.constant 0 : index
    %95 = vector.load %arg19[%c10, %c0_100] : memref<16x128xf32, #tpu.memory_space<vmem>>, vector<4x128xf32>
    tpu.vector_store %arg19[%c10, %c0_100], %94 {strides = array<i32>} : memref<16x128xf32, #tpu.memory_space<vmem>>, vector<4x128xf32>,
    %c0_101 = arith.constant 0 : index
    %c0_102 = arith.constant 0 : index
    %96 = tpu.strided_load %arg19[%c0_101, %c0_102] {strides = array<i32: 4, 1>} : memref<16x128xf32, #tpu.memory_space<vmem>>, vector<1x128xf32>
    %c1_103 = arith.constant 1 : index
    %c0_104 = arith.constant 0 : index
    %97 = tpu.strided_load %arg19[%c1_103, %c0_104] {strides = array<i32: 4, 1>} : memref<16x128xf32, #tpu.memory_space<vmem>>, vector<1x128xf32>
    %c2_105 = arith.constant 2 : index
    %c0_106 = arith.constant 0 : index
    %98 = tpu.strided_load %arg19[%c2_105, %c0_106] {strides = array<i32: 4, 1>} : memref<16x128xf32, #tpu.memory_space<vmem>>, vector<1x128xf32>
    %c3_107 = arith.constant 3 : index
    %c0_108 = arith.constant 0 : index
    %99 = tpu.strided_load %arg19[%c3_107, %c0_108] {strides = array<i32: 4, 1>} : memref<16x128xf32, #tpu.memory_space<vmem>>, vector<1x128xf32>
    %c4_109 = arith.constant 4 : index
    %c0_110 = arith.constant 0 : index
    %100 = tpu.strided_load %arg19[%c4_109, %c0_110] {strides = array<i32: 4, 1>} : memref<16x128xf32, #tpu.memory_space<vmem>>, vector<1x128xf32>
    %c5_111 = arith.constant 5 : index
    %c0_112 = arith.constant 0 : index
    %101 = tpu.strided_load %arg19[%c5_111, %c0_112] {strides = array<i32: 4, 1>} : memref<16x128xf32, #tpu.memory_space<vmem>>, vector<1x128xf32>
    %c6_113 = arith.constant 6 : index
    %c0_114 = arith.constant 0 : index
    %102 = tpu.strided_load %arg19[%c6_113, %c0_114] {strides = array<i32: 4, 1>} : memref<16x128xf32, #tpu.memory_space<vmem>>, vector<1x128xf32>
    %c7_115 = arith.constant 7 : index
    %c0_116 = arith.constant 0 : index
    %103 = tpu.strided_load %arg19[%c7_115, %c0_116] {strides = array<i32: 4, 1>} : memref<16x128xf32, #tpu.memory_space<vmem>>, vector<1x128xf32>
    %104 = tpu.concatenate %96, %97, %98, %99, %100, %101, %102, %103 in 1 : vector<1x128xf32>, vector<1x128xf32>, vector<1x128xf32>, vector<1x128xf32>, vector<1x128xf32>, vector<1x128xf32>, vector<1x128xf32>, vector<1x128xf32> -> vector<1x1024xf32>
    %c8 = arith.constant 8 : index
    %c0_117 = arith.constant 0 : index
    %105 = tpu.strided_load %arg19[%c8, %c0_117] {strides = array<i32: 4, 1>} : memref<16x128xf32, #tpu.memory_space<vmem>>, vector<1x128xf32>
    %c9 = arith.constant 9 : index
    %c0_118 = arith.constant 0 : index
    %106 = tpu.strided_load %arg19[%c9, %c0_118] {strides = array<i32: 4, 1>} : memref<16x128xf32, #tpu.memory_space<vmem>>, vector<1x128xf32>
    %c10_119 = arith.constant 10 : index
    %c0_120 = arith.constant 0 : index
    %107 = tpu.strided_load %arg19[%c10_119, %c0_120] {strides = array<i32: 4, 1>} : memref<16x128xf32, #tpu.memory_space<vmem>>, vector<1x128xf32>
    %c11 = arith.constant 11 : index
    %c0_121 = arith.constant 0 : index
    %108 = tpu.strided_load %arg19[%c11, %c0_121] {strides = array<i32: 4, 1>} : memref<16x128xf32, #tpu.memory_space<vmem>>, vector<1x128xf32>
    %c12 = arith.constant 12 : index
    %c0_122 = arith.constant 0 : index
    %109 = tpu.strided_load %arg19[%c12, %c0_122] {strides = array<i32: 4, 1>} : memref<16x128xf32, #tpu.memory_space<vmem>>, vector<1x128xf32>
    %c13 = arith.constant 13 : index
    %c0_123 = arith.constant 0 : index
    %110 = tpu.strided_load %arg19[%c13, %c0_123] {strides = array<i32: 4, 1>} : memref<16x128xf32, #tpu.memory_space<vmem>>, vector<1x128xf32>
    %c14 = arith.constant 14 : index
    %c0_124 = arith.constant 0 : index
    %111 = tpu.strided_load %arg19[%c14, %c0_124] {strides = array<i32: 4, 1>} : memref<16x128xf32, #tpu.memory_space<vmem>>, vector<1x128xf32>
    %c15 = arith.constant 15 : index
    %c0_125 = arith.constant 0 : index
    %112 = tpu.strided_load %arg19[%c15, %c0_125] {strides = array<i32: 4, 1>} : memref<16x128xf32, #tpu.memory_space<vmem>>, vector<1x128xf32>
    %113 = tpu.concatenate %105, %106, %107, %108, %109, %110, %111, %112 in 1 : vector<1x128xf32>, vector<1x128xf32>, vector<1x128xf32>, vector<1x128xf32>, vector<1x128xf32>, vector<1x128xf32>, vector<1x128xf32>, vector<1x128xf32> -> vector<1x1024xf32>
    %114 = tpu.concatenate %104, %113 in 0 : vector<1x1024xf32>, vector<1x1024xf32> -> vector<2x1024xf32>
    %c0_126 = arith.constant 0 : index
    %c0_127 = arith.constant 0 : index
    %115 = vector.load %arg8[%c0_126, %c0_127] : memref<1024x256xf32, #tpu.memory_space<vmem>>, vector<1024x256xf32>
    %cst_128 = arith.constant dense<0.000000e+00> : vector<2x256xf32>
    %116 = tpu.matmul %114, %115, %cst_128 {dimension_numbers = #tpu.dot_dimension_numbers<[1], [0], [0], [1], [0, 0, 1, 1], [], []>} : vector<2x1024xf32>, vector<1024x256xf32>, vector<2x256xf32> -> vector<2x256xf32>
    %c0_129 = arith.constant 0 : index
    %c0_130 = arith.constant 0 : index
    %117 = vector.load %arg9[%c0_129, %c0_130] : memref<1x256xf32, #tpu.memory_space<vmem>>, vector<1x256xf32>
    %118 = vector.broadcast %117 : vector<1x256xf32> to vector<2x256xf32>
    %119 = arith.addf %116, %118 : vector<2x256xf32>
    %cst_131 = arith.constant 0.000000e+00 : f32
    %120 = vector.broadcast %cst_131 : f32 to vector<2x256xf32>
    %121 = arith.maximumf %119, %120 : vector<2x256xf32>
    %c0_132 = arith.constant 0 : index
    %c0_133 = arith.constant 0 : index
    %c0_134 = arith.constant 0 : index
    %122 = vector.load %arg10[%c0_132, %c0_133, %c0_134] : memref<1x256x64xf32, #tpu.memory_space<vmem>>, vector<1x256x64xf32>
    %123 = vector.shape_cast %122 : vector<1x256x64xf32> to vector<256x64xf32>
    %cst_135 = arith.constant dense<0.000000e+00> : vector<2x64xf32>
    %124 = tpu.matmul %121, %123, %cst_135 {dimension_numbers = #tpu.dot_dimension_numbers<[1], [0], [0], [1], [0, 0, 1, 1], [], []>} : vector<2x256xf32>, vector<256x64xf32>, vector<2x64xf32> -> vector<2x64xf32>
    %c0_136 = arith.constant 0 : index
    %c0_137 = arith.constant 0 : index
    %125 = vector.load %arg11[%c0_136, %c0_137] : memref<1x64xf32, #tpu.memory_space<vmem>>, vector<1x64xf32>
    %126 = vector.broadcast %125 : vector<1x64xf32> to vector<2x64xf32>
    %127 = arith.addf %124, %126 : vector<2x64xf32>
    %cst_138 = arith.constant 0.000000e+00 : f32
    %128 = vector.broadcast %cst_138 : f32 to vector<2x64xf32>
    %129 = arith.maximumf %127, %128 : vector<2x64xf32>
    %c0_139 = arith.constant 0 : index
    %c0_140 = arith.constant 0 : index
    %130 = vector.load %arg12[%c0_139, %c0_140] : memref<64x64xf32, #tpu.memory_space<vmem>>, vector<64x64xf32>
    %cst_141 = arith.constant dense<0.000000e+00> : vector<2x64xf32>
    %131 = tpu.matmul %129, %130, %cst_141 {dimension_numbers = #tpu.dot_dimension_numbers<[1], [0], [0], [1], [0, 0, 1, 1], [], []>} : vector<2x64xf32>, vector<64x64xf32>, vector<2x64xf32> -> vector<2x64xf32>
    %c0_142 = arith.constant 0 : index
    %c0_143 = arith.constant 0 : index
    %132 = vector.load %arg13[%c0_142, %c0_143] : memref<1x64xf32, #tpu.memory_space<vmem>>, vector<1x64xf32>
    %133 = vector.broadcast %132 : vector<1x64xf32> to vector<2x64xf32>
    %134 = arith.addf %131, %133 : vector<2x64xf32>
    %cst_144 = arith.constant 0.000000e+00 : f32
    %135 = vector.broadcast %cst_144 : f32 to vector<2x64xf32>
    %136 = arith.maximumf %134, %135 : vector<2x64xf32>
    %c0_145 = arith.constant 0 : index
    %c0_146 = arith.constant 0 : index
    %137 = vector.load %arg14[%c0_145, %c0_146] : memref<64x5xf32, #tpu.memory_space<vmem>>, vector<64x5xf32>
    %cst_147 = arith.constant dense<0.000000e+00> : vector<2x5xf32>
    %138 = tpu.matmul %136, %137, %cst_147 {dimension_numbers = #tpu.dot_dimension_numbers<[1], [0], [0], [1], [0, 0, 1, 1], [], []>} : vector<2x64xf32>, vector<64x5xf32>, vector<2x5xf32> -> vector<2x5xf32>
    %c0_148 = arith.constant 0 : index
    %c0_149 = arith.constant 0 : index
    %139 = vector.load %arg15[%c0_148, %c0_149] : memref<1x5xf32, #tpu.memory_space<vmem>>, vector<1x5xf32>
    %140 = vector.broadcast %139 : vector<1x5xf32> to vector<2x5xf32>
    %141 = arith.addf %138, %140 : vector<2x5xf32>
    %c0_150 = arith.constant 0 : index
    %c0_151 = arith.constant 0 : index
    %142 = vector.load %arg16[%c0_150, %c0_151] : memref<2x5xf32, #tpu.memory_space<vmem>>, vector<2x5xf32>
    tpu.vector_store %arg16[%c0_150, %c0_151], %141 {strides = array<i32>} : memref<2x5xf32, #tpu.memory_space<vmem>>, vector<2x5xf32>,
    return
  }
  func.func @transform_0(%arg0: i32) -> (i32, i32) {
    %c0_i32 = arith.constant 0 : i32
    %c0_i32_0 = arith.constant 0 : i32
    return %arg0, %c0_i32 : i32, i32
  }
  func.func @transform_1(%arg0: i32) -> (i32, i32) {
    %c0_i32 = arith.constant 0 : i32
    %c0_i32_0 = arith.constant 0 : i32
    %c0_i32_1 = arith.constant 0 : i32
    return %c0_i32, %c0_i32_0 : i32, i32
  }
  func.func @transform_2(%arg0: i32) -> (i32, i32) {
    %c0_i32 = arith.constant 0 : i32
    %c0_i32_0 = arith.constant 0 : i32
    %c0_i32_1 = arith.constant 0 : i32
    return %c0_i32, %c0_i32_0 : i32, i32
  }
  func.func @transform_3(%arg0: i32) -> (i32, i32) {
    %c0_i32 = arith.constant 0 : i32
    %c0_i32_0 = arith.constant 0 : i32
    %c0_i32_1 = arith.constant 0 : i32
    return %c0_i32, %c0_i32_0 : i32, i32
  }
  func.func @transform_4(%arg0: i32) -> (i32, i32) {
    %c0_i32 = arith.constant 0 : i32
    %c0_i32_0 = arith.constant 0 : i32
    %c0_i32_1 = arith.constant 0 : i32
    return %c0_i32, %c0_i32_0 : i32, i32
  }
  func.func @transform_5(%arg0: i32) -> (i32, i32) {
    %c0_i32 = arith.constant 0 : i32
    %c0_i32_0 = arith.constant 0 : i32
    %c0_i32_1 = arith.constant 0 : i32
    return %c0_i32, %c0_i32_0 : i32, i32
  }
  func.func @transform_6(%arg0: i32) -> (i32, i32) {
    %c0_i32 = arith.constant 0 : i32
    %c0_i32_0 = arith.constant 0 : i32
    %c0_i32_1 = arith.constant 0 : i32
    return %c0_i32, %c0_i32_0 : i32, i32
  }
  func.func @transform_7(%arg0: i32) -> (i32, i32) {
    %c0_i32 = arith.constant 0 : i32
    %c0_i32_0 = arith.constant 0 : i32
    %c0_i32_1 = arith.constant 0 : i32
    return %c0_i32, %c0_i32_0 : i32, i32
  }
  func.func @transform_8(%arg0: i32) -> (i32, i32) {
    %c0_i32 = arith.constant 0 : i32
    %c0_i32_0 = arith.constant 0 : i32
    %c0_i32_1 = arith.constant 0 : i32
    return %c0_i32, %c0_i32_0 : i32, i32
  }
  func.func @transform_9(%arg0: i32) -> (i32, i32, i32) {
    %c0_i32 = arith.constant 0 : i32
    %c0_i32_0 = arith.constant 0 : i32
    %c0_i32_1 = arith.constant 0 : i32
    %c0_i32_2 = arith.constant 0 : i32
    return %c0_i32, %c0_i32_0, %c0_i32_1 : i32, i32, i32
  }
  func.func @transform_10(%arg0: i32) -> (i32, i32) {
    %c0_i32 = arith.constant 0 : i32
    %c0_i32_0 = arith.constant 0 : i32
    %c0_i32_1 = arith.constant 0 : i32
    return %c0_i32, %c0_i32_0 : i32, i32
  }
  func.func @transform_11(%arg0: i32) -> (i32, i32) {
    %c0_i32 = arith.constant 0 : i32
    %c0_i32_0 = arith.constant 0 : i32
    %c0_i32_1 = arith.constant 0 : i32
    return %c0_i32, %c0_i32_0 : i32, i32
  }
  func.func @transform_12(%arg0: i32) -> (i32, i32) {
    %c0_i32 = arith.constant 0 : i32
    %c0_i32_0 = arith.constant 0 : i32
    %c0_i32_1 = arith.constant 0 : i32
    return %c0_i32, %c0_i32_0 : i32, i32
  }
  func.func @transform_13(%arg0: i32) -> (i32, i32) {
    %c0_i32 = arith.constant 0 : i32
    %c0_i32_0 = arith.constant 0 : i32
    %c0_i32_1 = arith.constant 0 : i32
    return %c0_i32, %c0_i32_0 : i32, i32
  }
  func.func @transform_14(%arg0: i32) -> (i32, i32) {
    %c0_i32 = arith.constant 0 : i32
    %c0_i32_0 = arith.constant 0 : i32
    %c0_i32_1 = arith.constant 0 : i32
    return %c0_i32, %c0_i32_0 : i32, i32
  }
  func.func @transform_15(%arg0: i32) -> (i32, i32) {
    %c0_i32 = arith.constant 0 : i32
    %c0_i32_0 = arith.constant 0 : i32
    return %arg0, %c0_i32 : i32, i32
  }
}

</mosaic_0001>

<bundles_post_ra>
// kernel: classifier_1dconv_forward.1
= control target key start
LH: loop header
LB: loop body
LE: loop exit
PB: predicated region body
PF: predicated region fallthrough
CT: control target
= control target key end

     0   :  { %20 = vsyncpa [#allocation6], 0  ;;  %s3907_s0 = inlined_call_operand.vmem [shape: f32[268,4], index: 0, kind: input, shape index: {}]   ;;  %s3908_s1 = inlined_call_operand.vmem [shape: f32[32,32], index: 1, kind: input, shape index: {}]   ;;  %s3909_s2 = inlined_call_operand.vmem [shape: f32[1,32], index: 2, kind: input, shape index: {}]   ;;  %s3910_s3 = inlined_call_operand.hbm [shape: f32[256,64], index: 3, kind: input, shape index: {}]   ;;  %s3911_s4 = inlined_call_operand.vmem [shape: f32[1,64], index: 4, kind: input, shape index: {}]   ;;  %s3912_s5 = inlined_call_operand.hbm [shape: f32[512,128], index: 5, kind: input, shape index: {}]   ;;  %s3913_s6 = inlined_call_operand.vmem [shape: f32[1,128], index: 6, kind: input, shape index: {}]   ;;  %s3914_s7 = inlined_call_operand.hbm [shape: f32[1024,256], index: 7, kind: input, shape index: {}]   ;;  %s3915_s8 = inlined_call_operand.vmem [shape: f32[1,256], index: 8, kind: input, shape index: {}]   ;;  %s3916_s9 = inlined_call_operand.vmem [shape: f32[1,256,64], index: 9, kind: input, shape index: {}]   ;;  %s3917_s10 = inlined_call_operand.vmem [shape: f32[1,64], index: 10, kind: input, shape index: {}]   ;;  %s3918_s11 = inlined_call_operand.hbm [shape: f32[64,64], index: 11, kind: input, shape index: {}]   ;;  %s3919_s12 = inlined_call_operand.vmem [shape: f32[1,64], index: 12, kind: input, shape index: {}]   ;;  %s3920_s13 = inlined_call_operand.vmem [shape: f32[64,5], index: 13, kind: input, shape index: {}]   ;;  %s3921_s14 = inlined_call_operand.vmem [shape: f32[1,5], index: 14, kind: input, shape index: {}]   ;;  %s3922_s15 = inlined_call_operand.hbm [shape: f32[2,5], index: 15, kind: output, shape index: {}]  }
   0x1   :  { %21 = vsyncpa [#allocation9], 0 }
   0x2   :  { %22 = vsyncpa [#allocation12], 0 }
   0x3   :  { %23 = vsyncpa [#allocation7], 0  ;;  %s49_s20 = sshll.u32 %s3912_s5, 4  ;;  %s2829_s21 = smov [#allocation8]   ;;  %s50_s20 = int_to_ptr.hbm [resolvable:$true] %s49_s20 }
   0x4   :  { %s51_s22 = sshll.u32 %s2829_s21, 4  ;;  %s34_s25 = sshll.u32 %s3910_s3, 4  ;;  %s52_s22 = int_to_ptr.vmem [resolvable:$true] %s51_s22  ;;  %s35_s25 = int_to_ptr.hbm [resolvable:$true] %s34_s25 }
   0x5   :  { %s2830_s26 = smov 128   ;;  %s2831_s27 = smov 8  }
   0x6   :  { %57 = dma.hbm_to_vmem [thread:$0]  %s50_s20, 8192, %s52_s22, [#allocation9], %s2830_s26, %s2830_s26, %s2831_s27  }
   0x7   :  { %s2832_s28 = smov [#allocation5]   ;;  %s64_s17 = sshll.u32 %s3914_s7, 4  ;;  %s65_s17 = int_to_ptr.hbm [resolvable:$true] %s64_s17 }
   0x8   :  { %s36_s29 = sshll.u32 %s2832_s28, 4  ;;  %s2833_s5 = smov [#allocation10]   ;;  %s37_s29 = int_to_ptr.vmem [resolvable:$true] %s36_s29 }
   0x9   :  { %42 = dma.hbm_to_vmem [thread:$0]  %s35_s25, 4096, %s37_s29, [#allocation6], %s2830_s26, %s2830_s26, %s2831_s27  }
   0xa   :  { %s66_s18 = sshll.u32 %s2833_s5, 4  ;;  %s83_s21 = sshll.u32 %s3918_s11, 4  ;;  %s67_s18 = int_to_ptr.vmem [resolvable:$true] %s66_s18  ;;  %s84_s21 = int_to_ptr.hbm [resolvable:$true] %s83_s21 }
   0xb   :  { %s2834_s23 = smov 256   ;;  %s2835_s20 = smov 16  }
   0xc   :  { %72 = dma.hbm_to_vmem [thread:$0]  %s65_s17, 32768, %s67_s18, [#allocation9], %s2834_s23, %s2834_s23, %s2835_s20  }
   0xd   :  { %s2836_s22 = smov [#allocation11]  }
   0xe   :  { %s85_s24 = sshll.u32 %s2836_s22, 4  ;;  %s86_s24 = int_to_ptr.vmem [resolvable:$true] %s85_s24 }
   0xf   :  { %91 = dma.hbm_to_vmem [thread:$0]  %s84_s21, 1024, %s86_s24, [#allocation12], %s2830_s26, %s2830_s26, %s2831_s27  }
  0x10   :  { %2821 = dma.done.wait [#allocation6], 4096  }
  0x11   :  { %2822 = vsyncadd [#allocation6], 4294963200 }
  0x12   :  { %2823 = dma.done.wait [#allocation9], 40960  }
  0x13   :  { %2824 = vsyncadd [#allocation9], 4294926336 }
  0x14   :  { %2825 = dma.done.wait [#allocation12], 1024  }
  0x15   :  { %2826 = vsyncadd [#allocation12], 4294966272  ;;  %v2464_v0 = vld [vmem:[%s3907_s0 + $0x1] ss:$2 sm:$0xff]  ;;  %s2837_s29 = smov 4   ;;  %s2838_s30 = smov 12  }
  0x16   :  { %v2480_v1 = vld [vmem:[%s3907_s0 + $0x3] ss:$2 sm:$0xff]  ;;  %275 = vrot.lane.b32.xlu0 %v2464_v0, %s2837_s29  ;;  %v2472_v3 = vld [vmem:[%s3907_s0 + $0x2] ss:$2 sm:$0xff]  ;;  %s2839_s18 = smov 20   ;;  %s2840_s22 = smov 24  }
  0x17   :  { %339 = vrot.lane.b32.xlu1 %v2480_v1, %s2838_s30  ;;  %v2496_v2 = vld [vmem:[%s3907_s0 + $0x5] ss:$2 sm:$0xff]  ;;  %v2488_v4 = vld [vmem:[%s3907_s0 + $0x4] ss:$2 sm:$0xff]  ;;  %s2841_s28 = smov 28   ;;  %v965_v36 = vld [vmem:[%s3908_s1 + $0x18] sm:$0xff] }
  0x18   :  { %403 = vrot.lane.b32.xlu2 %v2496_v2, %s2839_s18  ;;  %v2504_v5 = vld [vmem:[%s3907_s0 + $0x6] ss:$2 sm:$0xff]  ;;  %v2512_v6 = vld [vmem:[%s3907_s0 + $0x7] ss:$2 sm:$0xff]  ;;  %v2505_v12 = vld [vmem:[%s3907_s0 + $0x16] ss:$2 sm:$0xff]  ;;  %1030 = vmatpush.msra.mxu0 %v965_v36 }
  0x19   :  { %v2465_v7 = vld [vmem:[%s3907_s0 + $0x11] ss:$2 sm:$0xff]  ;;  %v2473_v8 = vld [vmem:[%s3907_s0 + $0x12] ss:$2 sm:$0xff]  ;;  %v2466_v14 = vld [vmem:[%s3907_s0 + $0x21] ss:$2 sm:$0xff] }
  0x1a   :  { %v2481_v9 = vld [vmem:[%s3907_s0 + $0x13] ss:$2 sm:$0xff]  ;;  %v2489_v10 = vld [vmem:[%s3907_s0 + $0x14] ss:$2 sm:$0xff]  ;;  %v2482_v16 = vld [vmem:[%s3907_s0 + $0x23] ss:$2 sm:$0xff] }
  0x1b   :  { %v2497_v11 = vld [vmem:[%s3907_s0 + $0x15] ss:$2 sm:$0xff]  ;;  %v2474_v15 = vld [vmem:[%s3907_s0 + $0x22] ss:$2 sm:$0xff]  ;;  %v2498_v18 = vld [vmem:[%s3907_s0 + $0x25] ss:$2 sm:$0xff] }
  0x1c   :  { %v2513_v13 = vld [vmem:[%s3907_s0 + $0x17] ss:$2 sm:$0xff]  ;;  %v2490_v17 = vld [vmem:[%s3907_s0 + $0x24] ss:$2 sm:$0xff]  ;;  %v2514_v20 = vld [vmem:[%s3907_s0 + $0x27] ss:$2 sm:$0xff] }
  0x1d   :  { %v2506_v19 = vld [vmem:[%s3907_s0 + $0x26] ss:$2 sm:$0xff]  ;;  %v2467_v21 = vld [vmem:[%s3907_s0 + $0x31] ss:$2 sm:$0xff]  ;;  %v2507_v26 = vld [vmem:[%s3907_s0 + $0x36] ss:$2 sm:$0xff] }
  0x1e   :  { %307 = vrot.lane.b32.xlu0 %v2472_v3, %s2831_s27  ;;  %v2475_v22 = vld [vmem:[%s3907_s0 + $0x32] ss:$2 sm:$0xff]  ;;  %v2483_v23 = vld [vmem:[%s3907_s0 + $0x33] ss:$2 sm:$0xff]  ;;  %v2476_v29 = vld [vmem:[%s3907_s0 + $0x42] ss:$2 sm:$0xff] }
  0x1f   :  { %371 = vrot.lane.b32.xlu1 %v2488_v4, %s2835_s20  ;;  %v2491_v24 = vld [vmem:[%s3907_s0 + $0x34] ss:$2 sm:$0xff]  ;;  %v2499_v25 = vld [vmem:[%s3907_s0 + $0x35] ss:$2 sm:$0xff]  ;;  %v2492_v31 = vld [vmem:[%s3907_s0 + $0x44] ss:$2 sm:$0xff] }
  0x20   :  { %435 = vrot.lane.b32.xlu2 %v2504_v5, %s2840_s22  ;;  %v2515_v27 = vld [vmem:[%s3907_s0 + $0x37] ss:$2 sm:$0xff]  ;;  %v2508_v33 = vld [vmem:[%s3907_s0 + $0x46] ss:$2 sm:$0xff]  ;;  %v2516_v34 = vld [vmem:[%s3907_s0 + $0x47] ss:$2 sm:$0xff] }
  0x21   :  { %v2468_v28 = vld [vmem:[%s3907_s0 + $0x41] ss:$2 sm:$0xff]  ;;  %v2469_v35 = vld [vmem:[%s3907_s0 + $0x51] ss:$2 sm:$0xff]  ;;  %v2477_v37 = vld [vmem:[%s3907_s0 + $0x52] ss:$2 sm:$0xff] }
  0x22   :  { %v2484_v30 = vld [vmem:[%s3907_s0 + $0x43] ss:$2 sm:$0xff]  ;;  %v2485_v38 = vld [vmem:[%s3907_s0 + $0x53] ss:$2 sm:$0xff]  ;;  %v2493_v41 = vld [vmem:[%s3907_s0 + $0x54] ss:$2 sm:$0xff] }
  0x23   :  { %v2500_v32 = vld [vmem:[%s3907_s0 + $0x45] ss:$2 sm:$0xff]  ;;  %v2501_v44 = vld [vmem:[%s3907_s0 + $0x55] ss:$2 sm:$0xff]  ;;  %v2509_v45 = vld [vmem:[%s3907_s0 + $0x56] ss:$2 sm:$0xff] }
  0x24   :  { %v964_v40 = vld [vmem:[%s3908_s1 + $0x10] sm:$0xff]  ;;  %v963_v42 = vld [vmem:[%s3908_s1 + $0x8] sm:$0xff]  ;;  %v962_v43 = vld [vmem:[%s3908_s1] sm:$0xff]  ;;  %vm491_vm0 = vcmask 31744   ;;  %vm500_vm1 = vcmask 64512   ;;  %vm509_vm2 = vcmask 97280  }
  0x25   :  { %1031 = vmatpush.msra.mxu0 %v964_v40  ;;  %v2517_v47 = vld [vmem:[%s3907_s0 + $0x57] ss:$2 sm:$0xff]  ;;  %v2478_v49 = vld [vmem:[%s3907_s0 + $0x62] ss:$2 sm:$0xff]  ;;  %vm518_vm3 = vcmask 130048   ;;  %vm527_vm4 = vcmask 162816  }
  0x26   :  { %467 = vrot.lane.b32.xlu0 %v2512_v6, %s2841_s28  ;;  %v2470_v48 = vld [vmem:[%s3907_s0 + $0x61] ss:$2 sm:$0xff]  ;;  %v2494_v54 = vld [vmem:[%s3907_s0 + $0x64] ss:$2 sm:$0xff]  ;;  %v2471_v2 = vld [vmem:[%s3907_s0 + $0x71] ss:$2 sm:$0xff] }
  0x27   :  { %277 = vrot.lane.b32.xlu1 %v2465_v7, %s2837_s29  ;;  %1032 = vmatpush.msra.mxu0 %v963_v42  ;;  %v2486_v51 = vld [vmem:[%s3907_s0 + $0x63] ss:$2 sm:$0xff]  ;;  %v140_v57 = vld [vmem:[%s3907_s0] ss:$2 sm:$0xff]  ;;  %vm536_vm5 = vcmask 195584   ;;  %vm545_vm6 = vcmask 228352  }
  0x28   :  { %309 = vrot.lane.b32.xlu2 %v2473_v8, %s2831_s27  ;;  %v2502_v55 = vld [vmem:[%s3907_s0 + $0x65] ss:$2 sm:$0xff]  ;;  %v2510_v58 = vld [vmem:[%s3907_s0 + $0x66] ss:$2 sm:$0xff]  ;;  %vm114_vm7 = vcmask 261120   ;;  %s2843_s19 = smov 32  }
  0x29   :  { %1033 = vmatpush.msra.mxu0 %v962_v43  ;;  %v2518_v1 = vld [vmem:[%s3907_s0 + $0x67] ss:$2 sm:$0xff]  ;;  %v2479_v5 = vld [vmem:[%s3907_s0 + $0x72] ss:$2 sm:$0xff]  ;;  %s2844_s21 = smov 96   ;;  %s2845_s23 = smov 64  }
  0x2a   :  { %v2568_v40 = vld [vmem:[%s3907_s0 + $0x8c] ss:$2 sm:$0xff]  ;;  %v2576_v43 = vld [vmem:[%s3907_s0 + $0x8d] ss:$2 sm:$0xff]  ;;  %vm132_vm8 = vcmask 523264   ;;  %vm1198_vm9 = vcmask 785408  }
  0x2b   :  { %vm1484_vm10 = vcmask 1043456   ;;  %vm1695_vm11 = vcmask 1040384   ;;  %vm2436_vm12 = vcmask 33792  }
  0x2e   :  { %341 = vrot.lane.b32.xlu0 %v2481_v9, %s2838_s30  ;;  %v2457_v9 = vld [vmem:[%s3907_s0 + $0x10] ss:$2 sm:$0xff] }
  0x2f   :  { %373 = vrot.lane.b32.xlu1 %v2489_v10, %s2835_s20 }
  0x30   :  { %405 = vrot.lane.b32.xlu2 %v2497_v11, %s2839_s18  ;;  %v2487_v11 = vld [vmem:[%s3907_s0 + $0x73] ss:$2 sm:$0xff] }
  0x36   :  { %437 = vrot.lane.b32.xlu0 %v2505_v12, %s2840_s22  ;;  %v2495_v12 = vld [vmem:[%s3907_s0 + $0x74] ss:$2 sm:$0xff] }
  0x37   :  { %469 = vrot.lane.b32.xlu1 %v2513_v13, %s2841_s28 }
  0x38   :  { %279 = vrot.lane.b32.xlu2 %v2466_v14, %s2837_s29 }
  0x3e   :  { %311 = vrot.lane.b32.xlu0 %v2474_v15, %s2831_s27  ;;  %v2503_v15 = vld [vmem:[%s3907_s0 + $0x75] ss:$2 sm:$0xff] }
  0x3f   :  { %343 = vrot.lane.b32.xlu1 %v2482_v16, %s2838_s30 }
  0x40   :  { %375 = vrot.lane.b32.xlu2 %v2490_v17, %s2835_s20 }
  0x46   :  { %407 = vrot.lane.b32.xlu0 %v2498_v18, %s2839_s18 }
  0x47   :  { %439 = vrot.lane.b32.xlu1 %v2506_v19, %s2840_s22 }
  0x48   :  { %471 = vrot.lane.b32.xlu2 %v2514_v20, %s2841_s28  ;;  %v2511_v20 = vld [vmem:[%s3907_s0 + $0x76] ss:$2 sm:$0xff] }
  0x4e   :  { %281 = vrot.lane.b32.xlu0 %v2467_v21, %s2837_s29  ;;  %v2519_v21 = vld [vmem:[%s3907_s0 + $0x77] ss:$2 sm:$0xff] }
  0x4f   :  { %313 = vrot.lane.b32.xlu1 %v2475_v22, %s2831_s27 }
  0x50   :  { %345 = vrot.lane.b32.xlu2 %v2483_v23, %s2838_s30 }
  0x56   :  { %377 = vrot.lane.b32.xlu0 %v2491_v24, %s2835_s20  ;;  %v2528_v24 = vld [vmem:[%s3907_s0 + $0x87] ss:$2 sm:$0xff] }
  0x57   :  { %409 = vrot.lane.b32.xlu1 %v2499_v25, %s2839_s18 }
  0x58   :  { %441 = vrot.lane.b32.xlu2 %v2507_v26, %s2840_s22 }
  0x5e   :  { %473 = vrot.lane.b32.xlu0 %v2515_v27, %s2841_s28 }
  0x5f   :  { %283 = vrot.lane.b32.xlu1 %v2468_v28, %s2837_s29 }
  0x60   :  { %315 = vrot.lane.b32.xlu2 %v2476_v29, %s2831_s27 }
  0x66   :  { %347 = vrot.lane.b32.xlu0 %v2484_v30, %s2838_s30  ;;  %v2536_v30 = vld [vmem:[%s3907_s0 + $0x88] ss:$2 sm:$0xff] }
  0x67   :  { %379 = vrot.lane.b32.xlu1 %v2492_v31, %s2835_s20  ;;  %v2544_v31 = vld [vmem:[%s3907_s0 + $0x89] ss:$2 sm:$0xff] }
  0x68   :  { %411 = vrot.lane.b32.xlu2 %v2500_v32, %s2839_s18 }
  0x6e   :  { %443 = vrot.lane.b32.xlu0 %v2508_v33, %s2840_s22  ;;  %v2458_v33 = vld [vmem:[%s3907_s0 + $0x20] ss:$2 sm:$0xff] }
  0x6f   :  { %475 = vrot.lane.b32.xlu1 %v2516_v34, %s2841_s28  ;;  %v2552_v34 = vld [vmem:[%s3907_s0 + $0x8a] ss:$2 sm:$0xff] }
  0x70   :  { %285 = vrot.lane.b32.xlu2 %v2469_v35, %s2837_s29 }
  0x72   :  { %v404_v39 = vpop.permute.xlu2 %403 }
  0x76   :  { %317 = vrot.lane.b32.xlu0 %v2477_v37, %s2831_s27 }
  0x77   :  { %349 = vrot.lane.b32.xlu1 %v2485_v38, %s2838_s30 }
  0x78   :  { %381 = vrot.lane.b32.xlu2 %v2493_v41, %s2835_s20 }
  0x7a   :  { %v436_v46 = vpop.permute.xlu2 %435 }
  0x7e   :  { %413 = vrot.lane.b32.xlu0 %v2501_v44, %s2839_s18 }
  0x7f   :  { %445 = vrot.lane.b32.xlu1 %v2509_v45, %s2840_s22 }
  0x80   :  { %477 = vrot.lane.b32.xlu2 %v2517_v47, %s2841_s28 }
  0x82   :  { %v310_v50 = vpop.permute.xlu2 %309 }
  0x86   :  { %287 = vrot.lane.b32.xlu0 %v2470_v48, %s2837_s29 }
  0x87   :  { %319 = vrot.lane.b32.xlu1 %v2478_v49, %s2831_s27 }
  0x88   :  { %v276_v52 = vpop.permute.xlu0 %275  ;;  %351 = vrot.lane.b32.xlu2 %v2486_v51, %s2838_s30  ;;  %v2537_v51 = vld [vmem:[%s3907_s0 + $0x98] ss:$2 sm:$0xff] }
  0x89   :  { %v340_v53 = vpop.permute.xlu1 %339  ;;  %v492_v59 = vsel %vm491_vm0, %v140_v57, %v276_v52 }
  0x8a   :  { %v406_v56 = vpop.permute.xlu2 %405 }
  0x8e   :  { %383 = vrot.lane.b32.xlu0 %v2494_v54, %s2835_s20 }
  0x8f   :  { %415 = vrot.lane.b32.xlu1 %v2502_v55, %s2839_s18  ;;  %v2459_v55 = vld [vmem:[%s3907_s0 + $0x30] ss:$2 sm:$0xff] }
  0x90   :  { %v308_v60 = vpop.permute.xlu0 %307  ;;  %447 = vrot.lane.b32.xlu2 %v2510_v58, %s2840_s22  ;;  %v2553_v58 = vld [vmem:[%s3907_s0 + $0x9a] ss:$2 sm:$0xff] }
  0x91   :  { %v372_v61 = vpop.permute.xlu1 %371  ;;  %v501_v62 = vsel %vm500_vm1, %v492_v59, %v308_v60  ;;  %v2561_v59 = vld [vmem:[%s3907_s0 + $0x9b] ss:$2 sm:$0xff] }
  0x92   :  { %v510_v63 = vsel %vm509_vm2, %v501_v62, %v340_v53  ;;  %v280_v3 = vpop.permute.xlu2 %279  ;;  %v2545_v53 = vld [vmem:[%s3907_s0 + $0x99] ss:$2 sm:$0xff]  ;;  %v2569_v62 = vld [vmem:[%s3907_s0 + $0x9c] ss:$2 sm:$0xff] }
  0x93   :  { %v519_v0 = vsel %vm518_vm3, %v510_v63, %v372_v61  ;;  %v494_v35 = vsel %vm491_vm0, %v2458_v33, %v280_v3  ;;  %v2577_v3 = vld [vmem:[%s3907_s0 + $0x9d] ss:$2 sm:$0xff] }
  0x94   :  { %v528_v4 = vsel %vm527_vm4, %v519_v0, %v404_v39  ;;  %v2560_v39 = vld [vmem:[%s3907_s0 + $0x8b] ss:$2 sm:$0xff] }
  0x95   :  { %v537_v6 = vsel %vm536_vm5, %v528_v4, %v436_v46  ;;  %v2530_v4 = vld [vmem:[%s3907_s0 + $0xa7] ss:$2 sm:$0xff] }
  0x96   :  { %479 = vrot.lane.b32.xlu0 %v2518_v1, %s2841_s28  ;;  %v2547_v33 = vld [vmem:[%s3907_s0 + $0xb9] ss:$2 sm:$0xff] }
  0x97   :  { %289 = vrot.lane.b32.xlu1 %v2471_v2, %s2837_s29 }
  0x98   :  { %v468_v7 = vpop.permute.xlu0 %467  ;;  %321 = vrot.lane.b32.xlu2 %v2479_v5, %s2831_s27 }
  0x99   :  { %v278_v8 = vpop.permute.xlu1 %277  ;;  %v546_v10 = vsel %vm545_vm6, %v537_v6, %v468_v7  ;;  %v2538_v7 = vld [vmem:[%s3907_s0 + $0xa8] ss:$2 sm:$0xff] }
  0x9a   :  { %2584 = vmatmul.msk.f32.vlgmr.msra.gmra.mxu0 %vm114_vm7, %v546_v10  ;;  %v376_v13 = vpop.permute.xlu2 %375  ;;  %v493_v14 = vsel %vm491_vm0, %v2457_v9, %v278_v8 }
  0x9b   :  { %v502_v16 = vsel %vm500_vm1, %v493_v14, %v310_v50  ;;  %v2529_v50 = vld [vmem:[%s3907_s0 + $0x97] ss:$2 sm:$0xff]  ;;  %v2554_v14 = vld [vmem:[%s3907_s0 + $0xaa] ss:$2 sm:$0xff] }
  0x9e   :  { %353 = vrot.lane.b32.xlu0 %v2487_v11, %s2838_s30  ;;  %v2460_v11 = vld [vmem:[%s3907_s0 + $0x40] ss:$2 sm:$0xff] }
  0x9f   :  { %385 = vrot.lane.b32.xlu1 %v2495_v12, %s2835_s20 }
  0xa0   :  { %v342_v17 = vpop.permute.xlu0 %341  ;;  %417 = vrot.lane.b32.xlu2 %v2503_v15, %s2839_s18 }
  0xa1   :  { %v374_v18 = vpop.permute.xlu1 %373  ;;  %v511_v19 = vsel %vm509_vm2, %v502_v16, %v342_v17  ;;  %v2562_v17 = vld [vmem:[%s3907_s0 + $0xab] ss:$2 sm:$0xff] }
  0xa2   :  { %v472_v22 = vpop.permute.xlu2 %471  ;;  %v520_v23 = vsel %vm518_vm3, %v511_v19, %v374_v18 }
  0xa3   :  { %v529_v25 = vsel %vm527_vm4, %v520_v23, %v406_v56  ;;  %v2578_v23 = vld [vmem:[%s3907_s0 + $0xad] ss:$2 sm:$0xff] }
  0xa6   :  { %449 = vrot.lane.b32.xlu0 %v2511_v20, %s2840_s22 }
  0xa7   :  { %481 = vrot.lane.b32.xlu1 %v2519_v21, %s2841_s28 }
  0xa8   :  { %v438_v26 = vpop.permute.xlu0 %437  ;;  %690 = vrot.lane.b32.xlu2 %v2528_v24, %s2837_s29 }
  0xa9   :  { %v470_v27 = vpop.permute.xlu1 %469  ;;  %v538_v28 = vsel %vm536_vm5, %v529_v25, %v438_v26  ;;  %v2531_v26 = vld [vmem:[%s3907_s0 + $0xb7] ss:$2 sm:$0xff] }
  0xaa   :  { %v547_v29 = vsel %vm545_vm6, %v538_v28, %v470_v27  ;;  %v346_v32 = vpop.permute.xlu2 %345 }
  0xab   :  { %2585 = vmatmul.msk.f32.gmra.mxu0 %vm114_vm7, %v547_v29 }
  0xae   :  { %722 = vrot.lane.b32.xlu0 %v2536_v30, %s2831_s27 }
  0xaf   :  { %754 = vrot.lane.b32.xlu1 %v2544_v31, %s2838_s30 }
  0xb0   :  { %v312_v36 = vpop.permute.xlu0 %311  ;;  %786 = vrot.lane.b32.xlu2 %v2552_v34, %s2835_s20 }
  0xb1   :  { %v344_v37 = vpop.permute.xlu1 %343  ;;  %v503_v38 = vsel %vm500_vm1, %v494_v35, %v312_v36  ;;  %v2461_v35 = vld [vmem:[%s3907_s0 + $0x50] ss:$2 sm:$0xff] }
  0xb2   :  { %v442_v41 = vpop.permute.xlu2 %441  ;;  %v512_v42 = vsel %vm509_vm2, %v503_v38, %v344_v37  ;;  %v2555_v36 = vld [vmem:[%s3907_s0 + $0xba] ss:$2 sm:$0xff] }
  0xb3   :  { %v521_v44 = vsel %vm518_vm3, %v512_v42, %v376_v13  ;;  %v2546_v13 = vld [vmem:[%s3907_s0 + $0xa9] ss:$2 sm:$0xff]  ;;  %v2571_v42 = vld [vmem:[%s3907_s0 + $0xbc] ss:$2 sm:$0xff] }
  0xb6   :  { %818 = vrot.lane.b32.xlu0 %v2560_v39, %s2839_s18 }
  0xb7   :  { %850 = vrot.lane.b32.xlu1 %v2568_v40, %s2840_s22 }
  0xb8   :  { %v408_v45 = vpop.permute.xlu0 %407  ;;  %882 = vrot.lane.b32.xlu2 %v2576_v43, %s2841_s28 }
  0xb9   :  { %v440_v46 = vpop.permute.xlu1 %439  ;;  %v530_v47 = vsel %vm527_vm4, %v521_v44, %v408_v45  ;;  %v2579_v45 = vld [vmem:[%s3907_s0 + $0xbd] ss:$2 sm:$0xff] }
  0xba   :  { %v539_v48 = vsel %vm536_vm5, %v530_v47, %v440_v46  ;;  %v316_v52 = vpop.permute.xlu2 %315 }
  0xbb   :  { %v548_v49 = vsel %vm545_vm6, %v539_v48, %v472_v22  ;;  %v2570_v22 = vld [vmem:[%s3907_s0 + $0xac] ss:$2 sm:$0xff] }
  0xbc   :  { %2586 = vmatmul.msk.f32.gmra.mxu0 %vm114_vm7, %v548_v49 }
  0xbe   :  { %692 = vrot.lane.b32.xlu0 %v2529_v50, %s2837_s29 }
  0xbf   :  { %724 = vrot.lane.b32.xlu1 %v2537_v51, %s2831_s27 }
  0xc0   :  { %v282_v54 = vpop.permute.xlu0 %281  ;;  %756 = vrot.lane.b32.xlu2 %v2545_v53, %s2838_s30  ;;  %v2540_v53 = vld [vmem:[%s3907_s0 + $0xc8] ss:$2 sm:$0xff] }
  0xc1   :  { %v314_v56 = vpop.permute.xlu1 %313  ;;  %v495_v57 = vsel %vm491_vm0, %v2459_v55, %v282_v54  ;;  %v2548_v55 = vld [vmem:[%s3907_s0 + $0xc9] ss:$2 sm:$0xff] }
  0xc2   :  { %v412_v60 = vpop.permute.xlu2 %411  ;;  %v504_v61 = vsel %vm500_vm1, %v495_v57, %v314_v56  ;;  %v2842_v56 = vmov 0.0  }
  0xc3   :  { %v513_v1 = vsel %vm509_vm2, %v504_v61, %v346_v32  ;;  %v2539_v32 = vld [vmem:[%s3907_s0 + $0xb8] ss:$2 sm:$0xff]  ;;  %115 = vst.msk [vmem:[#allocation2] sm:$0xff] %vm114_vm7, %v2842_v56 }
  0xc4   :  { %116 = vst.msk [vmem:[#allocation2 + $0x8] sm:$0xff] %vm114_vm7, %v2842_v56  ;;  %v2556_v61 = vld [vmem:[%s3907_s0 + $0xca] ss:$2 sm:$0xff] }
  0xc5   :  { %117 = vst.msk [vmem:[#allocation2 + $0x10] sm:$0xff] %vm114_vm7, %v2842_v56 }
  0xc6   :  { %788 = vrot.lane.b32.xlu0 %v2553_v58, %s2835_s20  ;;  %v2462_v58 = vld [vmem:[%s3907_s0 + $0x60] ss:$2 sm:$0xff]  ;;  %118 = vst.msk [vmem:[#allocation2 + $0x18] sm:$0xff] %vm114_vm7, %v2842_v56 }
  0xc7   :  { %820 = vrot.lane.b32.xlu1 %v2561_v59, %s2839_s18  ;;  %119 = vst.msk [vmem:[#allocation2 + $0x20] sm:$0xff] %vm114_vm7, %v2842_v56 }
  0xc8   :  { %v378_v63 = vpop.permute.xlu0 %377  ;;  %852 = vrot.lane.b32.xlu2 %v2569_v62, %s2840_s22  ;;  %v2564_v62 = vld [vmem:[%s3907_s0 + $0xcb] ss:$2 sm:$0xff]  ;;  %120 = vst.msk [vmem:[#allocation2 + $0x28] sm:$0xff] %vm114_vm7, %v2842_v56 }
  0xc9   :  { %v410_v0 = vpop.permute.xlu1 %409  ;;  %v522_v2 = vsel %vm518_vm3, %v513_v1, %v378_v63  ;;  %121 = vst.msk [vmem:[#allocation2 + $0x30] sm:$0xff] %vm114_vm7, %v2842_v56  ;;  %v2572_v1 = vld [vmem:[%s3907_s0 + $0xcc] ss:$2 sm:$0xff] }
  0xca   :  { %v286_v5 = vpop.permute.xlu2 %285  ;;  %v531_v6 = vsel %vm527_vm4, %v522_v2, %v410_v0  ;;  %122 = vst.msk [vmem:[#allocation2 + $0x38] sm:$0xff] %vm114_vm7, %v2842_v56 }
  0xcb   :  { %v540_v8 = vsel %vm536_vm5, %v531_v6, %v442_v41  ;;  %v497_v37 = vsel %vm491_vm0, %v2461_v35, %v286_v5  ;;  %v2563_v41 = vld [vmem:[%s3907_s0 + $0xbb] ss:$2 sm:$0xff]  ;;  %123 = vst.msk [vmem:[#allocation2 + $0x40] sm:$0xff] %vm114_vm7, %v2842_v56 }
  0xcc   :  { %124 = vst.msk [vmem:[#allocation2 + $0x48] sm:$0xff] %vm114_vm7, %v2842_v56  ;;  %v2580_v6 = vld [vmem:[%s3907_s0 + $0xcd] ss:$2 sm:$0xff] }
  0xcd   :  { %125 = vst.msk [vmem:[#allocation2 + $0x50] sm:$0xff] %vm114_vm7, %v2842_v56 }
  0xce   :  { %884 = vrot.lane.b32.xlu0 %v2577_v3, %s2841_s28  ;;  %126 = vst.msk [vmem:[#allocation2 + $0x58] sm:$0xff] %vm114_vm7, %v2842_v56 }
  0xcf   :  { %694 = vrot.lane.b32.xlu1 %v2530_v4, %s2837_s29  ;;  %127 = vst.msk [vmem:[#allocation2 + $0x60] sm:$0xff] %vm114_vm7, %v2842_v56 }
  0xd0   :  { %v474_v9 = vpop.permute.xlu0 %473  ;;  %726 = vrot.lane.b32.xlu2 %v2538_v7, %s2831_s27  ;;  %v2533_v7 = vld [vmem:[%s3907_s0 + $0xd7] ss:$2 sm:$0xff]  ;;  %128 = vst.msk [vmem:[#allocation2 + $0x68] sm:$0xff] %vm114_vm7, %v2842_v56 }
  0xd1   :  { %v284_v10 = vpop.permute.xlu1 %283  ;;  %v549_v12 = vsel %vm545_vm6, %v540_v8, %v474_v9  ;;  %129 = vst.msk [vmem:[#allocation2 + $0x70] sm:$0xff] %vm114_vm7, %v2842_v56 }
  0xd2   :  { %2587 = vmatmul.msk.f32.gmra.mxu0 %vm114_vm7, %v549_v12  ;;  %v382_v15 = vpop.permute.xlu2 %381  ;;  %v496_v16 = vsel %vm491_vm0, %v2460_v11, %v284_v10  ;;  %130 = vst.msk [vmem:[#allocation2 + $0x78] sm:$0xff] %vm114_vm7, %v2842_v56  ;;  %v2541_v10 = vld [vmem:[%s3907_s0 + $0xd8] ss:$2 sm:$0xff] }
  0xd3   :  { %v505_v18 = vsel %vm500_vm1, %v496_v16, %v316_v52  ;;  %v2532_v52 = vld [vmem:[%s3907_s0 + $0xc7] ss:$2 sm:$0xff]  ;;  %131 = vst.msk [vmem:[#allocation2 + $0x80] sm:$0xff] %vm114_vm7, %v2842_v56 }
  0xd4   :  { %138 = vst [vmem:[#allocation4] sm:$0xff] %v2842_v56  ;;  %v2549_v16 = vld [vmem:[%s3907_s0 + $0xd9] ss:$2 sm:$0xff] }
  0xd5   :  { %139 = vst [vmem:[#allocation4 + $0x8] sm:$0xff] %v2842_v56 }
  0xd6   :  { %758 = vrot.lane.b32.xlu0 %v2546_v13, %s2838_s30  ;;  %133 = vst.msk [vmem:[#allocation3] sm:$0xff] %vm132_vm8, %v2842_v56 }
  0xd7   :  { %790 = vrot.lane.b32.xlu1 %v2554_v14, %s2835_s20  ;;  %v2463_v14 = vld [vmem:[%s3907_s0 + $0x70] ss:$2 sm:$0xff]  ;;  %134 = vst.msk [vmem:[#allocation3 + $0x8] sm:$0xff] %vm132_vm8, %v2842_v56 }
  0xd8   :  { %v348_v19 = vpop.permute.xlu0 %347  ;;  %822 = vrot.lane.b32.xlu2 %v2562_v17, %s2839_s18  ;;  %v2557_v17 = vld [vmem:[%s3907_s0 + $0xda] ss:$2 sm:$0xff]  ;;  %135 = vst.msk [vmem:[#allocation3 + $0x10] sm:$0xff] %vm132_vm8, %v2842_v56 }
  0xd9   :  { %v380_v20 = vpop.permute.xlu1 %379  ;;  %v514_v21 = vsel %vm509_vm2, %v505_v18, %v348_v19  ;;  %136 = vst.msk [vmem:[#allocation3 + $0x18] sm:$0xff] %vm132_vm8, %v2842_v56 }
  0xda   :  { %v478_v24 = vpop.permute.xlu2 %477  ;;  %v523_v25 = vsel %vm518_vm3, %v514_v21, %v380_v20  ;;  %v2565_v20 = vld [vmem:[%s3907_s0 + $0xdb] ss:$2 sm:$0xff]  ;;  %137 = vst.msk [vmem:[#allocation3 + $0x20] sm:$0xff] %vm132_vm8, %v2842_v56 }
  0xdb   :  { %v532_v27 = vsel %vm527_vm4, %v523_v25, %v412_v60  ;;  %v2573_v25 = vld [vmem:[%s3907_s0 + $0xdc] ss:$2 sm:$0xff] }
  0xdc   :  { %v1300_v56 = vld [vmem:[#allocation5 + $0x8] sm:$0xff] }
  0xde   :  { %854 = vrot.lane.b32.xlu0 %v2570_v22, %s2840_s22 }
  0xdf   :  { %886 = vrot.lane.b32.xlu1 %v2578_v23, %s2841_s28 }
  0xe0   :  { %v444_v28 = vpop.permute.xlu0 %443  ;;  %696 = vrot.lane.b32.xlu2 %v2531_v26, %s2837_s29  ;;  %v2581_v26 = vld [vmem:[%s3907_s0 + $0xdd] ss:$2 sm:$0xff] }
  0xe1   :  { %v476_v29 = vpop.permute.xlu1 %475  ;;  %v541_v30 = vsel %vm536_vm5, %v532_v27, %v444_v28  ;;  %v3470_v28 = vld [vmem:[%s3909_s2] ss:$0 sm:$0xff] }
  0xe2   :  { %v550_v31 = vsel %vm545_vm6, %v541_v30, %v476_v29  ;;  %v352_v34 = vpop.permute.xlu2 %351  ;;  %v2534_v30 = vld [vmem:[%s3907_s0 + $0xe7] ss:$2 sm:$0xff] }
  0xe3   :  { %2588 = vmatmul.msk.f32.gmra.mxu0 %vm114_vm7, %v550_v31 }
  0xe6   :  { %728 = vrot.lane.b32.xlu0 %v2539_v32, %s2831_s27 }
  0xe7   :  { %760 = vrot.lane.b32.xlu1 %v2547_v33, %s2838_s30 }
  0xe8   :  { %v318_v38 = vpop.permute.xlu0 %317  ;;  %792 = vrot.lane.b32.xlu2 %v2555_v36, %s2835_s20 }
  0xe9   :  { %v350_v39 = vpop.permute.xlu1 %349  ;;  %v506_v40 = vsel %vm500_vm1, %v497_v37, %v318_v38 }
  0xea   :  { %v448_v43 = vpop.permute.xlu2 %447  ;;  %v515_v44 = vsel %vm509_vm2, %v506_v40, %v350_v39  ;;  %v2542_v39 = vld [vmem:[%s3907_s0 + $0xe8] ss:$2 sm:$0xff]  ;;  %v2550_v40 = vld [vmem:[%s3907_s0 + $0xe9] ss:$2 sm:$0xff] }
  0xeb   :  { %v524_v46 = vsel %vm518_vm3, %v515_v44, %v382_v15 }
  0xee   :  { %824 = vrot.lane.b32.xlu0 %v2563_v41, %s2839_s18 }
  0xef   :  { %856 = vrot.lane.b32.xlu1 %v2571_v42, %s2840_s22  ;;  %v2520_v42 = vld [vmem:[%s3907_s0 + $0x86] ss:$2 sm:$0xff] }
  0xf0   :  { %v414_v47 = vpop.permute.xlu0 %413  ;;  %888 = vrot.lane.b32.xlu2 %v2579_v45, %s2841_s28 }
  0xf1   :  { %v446_v48 = vpop.permute.xlu1 %445  ;;  %v533_v49 = vsel %vm527_vm4, %v524_v46, %v414_v47 }
  0xf2   :  { %v542_v50 = vsel %vm536_vm5, %v533_v49, %v446_v48  ;;  %v3362_v54 = vpop.permute.xlu2 %321  ;;  %v2566_v48 = vld [vmem:[%s3907_s0 + $0xeb] ss:$2 sm:$0xff]  ;;  %v2574_v49 = vld [vmem:[%s3907_s0 + $0xec] ss:$2 sm:$0xff] }
  0xf3   :  { %v551_v51 = vsel %vm545_vm6, %v542_v50, %v478_v24 }
  0xf4   :  { %2589 = vmatmul.msk.f32.gmra.mxu0 %vm114_vm7, %v551_v51 }
  0xf6   :  { %698 = vrot.lane.b32.xlu0 %v2532_v52, %s2837_s29  ;;  %v2582_v52 = vld [vmem:[%s3907_s0 + $0xed] ss:$2 sm:$0xff] }
  0xf7   :  { %730 = vrot.lane.b32.xlu1 %v2540_v53, %s2831_s27 }
  0xf8   :  { %v288_v57 = vpop.permute.xlu0 %287  ;;  %762 = vrot.lane.b32.xlu2 %v2548_v55, %s2838_s30 }
  0xf9   :  { %v320_v59 = vpop.permute.xlu1 %319  ;;  %v498_v60 = vsel %vm491_vm0, %v2462_v58, %v288_v57 }
  0xfa   :  { %v418_v63 = vpop.permute.xlu2 %417  ;;  %v507_v0 = vsel %vm500_vm1, %v498_v60, %v320_v59 }
  0xfb   :  { %v516_v4 = vsel %vm509_vm2, %v507_v0, %v352_v34  ;;  %v2543_v0 = vld [vmem:[%s3907_s0 + $0xf8] ss:$2 sm:$0xff] }
  0xfe   :  { %794 = vrot.lane.b32.xlu0 %v2556_v61, %s2835_s20 }
  0xff   :  { %826 = vrot.lane.b32.xlu1 %v2564_v62, %s2839_s18 }
 0x100   :  { %v384_v2 = vpop.permute.xlu0 %383  ;;  %858 = vrot.lane.b32.xlu2 %v2572_v1, %s2840_s22 }
 0x101   :  { %v416_v3 = vpop.permute.xlu1 %415  ;;  %v525_v5 = vsel %vm518_vm3, %v516_v4, %v384_v2  ;;  %v2551_v2 = vld [vmem:[%s3907_s0 + $0xf9] ss:$2 sm:$0xff] }
 0x102   :  { %v691_v8 = vpop.permute.xlu2 %690  ;;  %v534_v9 = vsel %vm527_vm4, %v525_v5, %v416_v3  ;;  %v2521_v3 = vld [vmem:[%s3907_s0 + $0x96] ss:$2 sm:$0xff] }
 0x103   :  { %v543_v11 = vsel %vm536_vm5, %v534_v9, %v448_v43  ;;  %v2558_v43 = vld [vmem:[%s3907_s0 + $0xea] ss:$2 sm:$0xff]  ;;  %v906_v44 = vsel %vm491_vm0, %v2520_v42, %v691_v8  ;;  %v2567_v8 = vld [vmem:[%s3907_s0 + $0xfb] ss:$2 sm:$0xff] }
 0x106   :  { %890 = vrot.lane.b32.xlu0 %v2580_v6, %s2841_s28 }
 0x107   :  { %700 = vrot.lane.b32.xlu1 %v2533_v7, %s2837_s29  ;;  %v2559_v7 = vld [vmem:[%s3907_s0 + $0xfa] ss:$2 sm:$0xff] }
 0x108   :  { %v480_v12 = vpop.permute.xlu0 %479  ;;  %732 = vrot.lane.b32.xlu2 %v2541_v10, %s2831_s27 }
 0x109   :  { %v290_v13 = vpop.permute.xlu1 %289  ;;  %v552_v15 = vsel %vm545_vm6, %v543_v11, %v480_v12  ;;  %v2575_v11 = vld [vmem:[%s3907_s0 + $0xfc] ss:$2 sm:$0xff] }
 0x10a   :  { %2590 = vmatmul.msk.f32.gmra.mxu0 %vm114_vm7, %v552_v15  ;;  %v787_v18 = vpop.permute.xlu2 %786  ;;  %v499_v19 = vsel %vm491_vm0, %v2463_v14, %v290_v13 }
 0x10b   :  { %v508_v21 = vsel %vm500_vm1, %v499_v19, %v3362_v54 }
 0x10e   :  { %764 = vrot.lane.b32.xlu0 %v2549_v16, %s2838_s30 }
 0x10f   :  { %796 = vrot.lane.b32.xlu1 %v2557_v17, %s2835_s20 }
 0x110   :  { %v354_v22 = vpop.permute.xlu0 %353  ;;  %828 = vrot.lane.b32.xlu2 %v2565_v20, %s2839_s18 }
 0x111   :  { %v386_v23 = vpop.permute.xlu1 %385  ;;  %v517_v24 = vsel %vm509_vm2, %v508_v21, %v354_v22 }
 0x112   :  { %v883_v27 = vpop.permute.xlu2 %882  ;;  %v526_v29 = vsel %vm518_vm3, %v517_v24, %v386_v23  ;;  %v2522_v24 = vld [vmem:[%s3907_s0 + $0xa6] ss:$2 sm:$0xff] }
 0x113   :  { %v535_v32 = vsel %vm527_vm4, %v526_v29, %v418_v63  ;;  %v2535_v63 = vld [vmem:[%s3907_s0 + $0xf7] ss:$2 sm:$0xff] }
 0x116   :  { %860 = vrot.lane.b32.xlu0 %v2573_v25, %s2840_s22 }
 0x117   :  { %892 = vrot.lane.b32.xlu1 %v2581_v26, %s2841_s28  ;;  %v1035_v31 = vpop.f32.mrf.mxu0 }
 0x118   :  { %v1036_v33 = vadd.f32 %v3470_v28, %v1035_v31  ;;  %v450_v34 = vpop.permute.xlu0 %449  ;;  %702 = vrot.lane.b32.xlu2 %v2534_v30, %s2837_s29 }
 0x119   :  { %v482_v35 = vpop.permute.xlu1 %481  ;;  %v544_v36 = vsel %vm536_vm5, %v535_v32, %v450_v34 }
 0x11a   :  { %v1083_v37 = vmax.f32 %v1036_v33, 0.0  ;;  %v553_v38 = vsel %vm545_vm6, %v544_v36, %v482_v35  ;;  %v757_v41 = vpop.permute.xlu2 %756 }
 0x11b   :  { %2591 = vmatmul.msk.f32.gmra.mxu0 %vm114_vm7, %v553_v38 }
 0x11c   :  { %1099 = vst.msk [vmem:[#allocation2 + $0x2] sm:$0xff] %vm114_vm7, %v1083_v37 }
 0x11e   :  { %734 = vrot.lane.b32.xlu0 %v2542_v39, %s2831_s27 }
 0x11f   :  { %766 = vrot.lane.b32.xlu1 %v2550_v40, %s2838_s30 }
 0x120   :  { %v723_v45 = vpop.permute.xlu0 %722  ;;  %798 = vrot.lane.b32.xlu2 %v2558_v43, %s2835_s20 }
 0x121   :  { %v755_v46 = vpop.permute.xlu1 %754  ;;  %v914_v47 = vsel %vm500_vm1, %v906_v44, %v723_v45  ;;  %v2523_v44 = vld [vmem:[%s3907_s0 + $0xb6] ss:$2 sm:$0xff] }
 0x122   :  { %v853_v50 = vpop.permute.xlu2 %852  ;;  %v922_v51 = vsel %vm509_vm2, %v914_v47, %v755_v46 }
 0x123   :  { %v930_v53 = vsel %vm518_vm3, %v922_v51, %v787_v18  ;;  %v2583_v18 = vld [vmem:[%s3907_s0 + $0xfd] ss:$2 sm:$0xff] }
 0x126   :  { %830 = vrot.lane.b32.xlu0 %v2566_v48, %s2839_s18 }
 0x127   :  { %862 = vrot.lane.b32.xlu1 %v2574_v49, %s2840_s22 }
 0x128   :  { %v819_v54 = vpop.permute.xlu0 %818  ;;  %v1038_v55 = vpop.f32.mrf.mxu0  ;;  %894 = vrot.lane.b32.xlu2 %v2582_v52, %s2841_s28 }
 0x129   :  { %v938_v57 = vsel %vm527_vm4, %v930_v53, %v819_v54  ;;  %v1039_v58 = vadd.f32 %v3470_v28, %v1038_v55  ;;  %v851_v59 = vpop.permute.xlu1 %850 }
 0x12a   :  { %v946_v60 = vsel %vm536_vm5, %v938_v57, %v851_v59  ;;  %v727_v1 = vpop.permute.xlu2 %726 }
 0x12b   :  { %v1084_v61 = vmax.f32 %v1039_v58, 0.0  ;;  %v954_v62 = vsel %vm545_vm6, %v946_v60, %v883_v27 }
 0x12c   :  { %2592 = vmatmul.msk.f32.gmra.mxu0 %vm114_vm7, %v954_v62 }
 0x12d   :  { %1100 = vst.msk [vmem:[#allocation2 + $0xa] sm:$0xff] %vm114_vm7, %v1084_v61 }
 0x12e   :  { %704 = vrot.lane.b32.xlu0 %v2535_v63, %s2837_s29 }
 0x12f   :  { %736 = vrot.lane.b32.xlu1 %v2543_v0, %s2831_s27 }
 0x130   :  { %v693_v4 = vpop.permute.xlu0 %692  ;;  %768 = vrot.lane.b32.xlu2 %v2551_v2, %s2838_s30 }
 0x131   :  { %v725_v5 = vpop.permute.xlu1 %724  ;;  %v907_v6 = vsel %vm491_vm0, %v2521_v3, %v693_v4 }
 0x132   :  { %v823_v9 = vpop.permute.xlu2 %822  ;;  %v915_v10 = vsel %vm500_vm1, %v907_v6, %v725_v5 }
 0x133   :  { %v923_v13 = vsel %vm509_vm2, %v915_v10, %v757_v41 }
 0x136   :  { %800 = vrot.lane.b32.xlu0 %v2559_v7, %s2835_s20 }
 0x137   :  { %832 = vrot.lane.b32.xlu1 %v2567_v8, %s2839_s18 }
 0x138   :  { %v789_v12 = vpop.permute.xlu0 %788  ;;  %864 = vrot.lane.b32.xlu2 %v2575_v11, %s2840_s22 }
 0x139   :  { %v821_v14 = vpop.permute.xlu1 %820  ;;  %v1041_v15 = vpop.f32.mrf.mxu0  ;;  %v931_v16 = vsel %vm518_vm3, %v923_v13, %v789_v12 }
 0x13a   :  { %v1042_v17 = vadd.f32 %v3470_v28, %v1041_v15  ;;  %v939_v20 = vsel %vm527_vm4, %v931_v16, %v821_v14  ;;  %v697_v21 = vpop.permute.xlu2 %696 }
 0x13b   :  { %v947_v22 = vsel %vm536_vm5, %v939_v20, %v853_v50  ;;  %v909_v45 = vsel %vm491_vm0, %v2523_v44, %v697_v21 }
 0x13c   :  { %v1085_v19 = vmax.f32 %v1042_v17, 0.0 }
 0x13e   :  { %1101 = vst.msk [vmem:[#allocation2 + $0x12] sm:$0xff] %vm114_vm7, %v1085_v19  ;;  %896 = vrot.lane.b32.xlu0 %v2583_v18, %s2841_s28 }
 0x140   :  { %v885_v23 = vpop.permute.xlu0 %884 }
 0x141   :  { %v695_v25 = vpop.permute.xlu1 %694  ;;  %v955_v26 = vsel %vm545_vm6, %v947_v22, %v885_v23  ;;  %v2525_v23 = vld [vmem:[%s3907_s0 + $0xd6] ss:$2 sm:$0xff] }
 0x142   :  { %2593 = vmatmul.msk.f32.gmra.mxu0 %vm114_vm7, %v955_v26  ;;  %v908_v27 = vsel %vm491_vm0, %v2522_v24, %v695_v25  ;;  %v793_v30 = vpop.permute.xlu2 %792 }
 0x143   :  { %v916_v29 = vsel %vm500_vm1, %v908_v27, %v727_v1  ;;  %v2524_v1 = vld [vmem:[%s3907_s0 + $0xc6] ss:$2 sm:$0xff] }
 0x148   :  { %v759_v31 = vpop.permute.xlu0 %758 }
 0x149   :  { %v791_v32 = vpop.permute.xlu1 %790  ;;  %v924_v33 = vsel %vm509_vm2, %v916_v29, %v759_v31 }
 0x14a   :  { %v932_v34 = vsel %vm518_vm3, %v924_v33, %v791_v32  ;;  %v889_v41 = vpop.permute.xlu2 %888 }
 0x14b   :  { %v940_v36 = vsel %vm527_vm4, %v932_v34, %v823_v9 }
 0x14f   :  { %v1044_v35 = vpop.f32.mrf.mxu0 }
 0x150   :  { %v1045_v37 = vadd.f32 %v3470_v28, %v1044_v35  ;;  %v855_v38 = vpop.permute.xlu0 %854 }
 0x151   :  { %v948_v39 = vsel %vm536_vm5, %v940_v36, %v855_v38  ;;  %v887_v40 = vpop.permute.xlu1 %886 }
 0x152   :  { %v1086_v42 = vmax.f32 %v1045_v37, 0.0  ;;  %v956_v43 = vsel %vm545_vm6, %v948_v39, %v887_v40  ;;  %v763_v51 = vpop.permute.xlu2 %762 }
 0x153   :  { %2594 = vmatmul.msk.f32.gmra.mxu0 %vm114_vm7, %v956_v43  ;;  %v2526_v43 = vld [vmem:[%s3907_s0 + $0xe6] ss:$2 sm:$0xff] }
 0x154   :  { %1102 = vst.msk [vmem:[#allocation2 + $0x1a] sm:$0xff] %vm114_vm7, %v1086_v42 }
 0x158   :  { %v729_v46 = vpop.permute.xlu0 %728 }
 0x159   :  { %v761_v47 = vpop.permute.xlu1 %760  ;;  %v917_v48 = vsel %vm500_vm1, %v909_v45, %v729_v46 }
 0x15a   :  { %v925_v53 = vsel %vm509_vm2, %v917_v48, %v761_v47  ;;  %v859_v0 = vpop.permute.xlu2 %858 }
 0x15b   :  { %v1119_v49 = vld [vmem:[#allocation2 + $0x1] ss:$4 sm:$0xff]  ;;  %v933_v54 = vsel %vm518_vm3, %v925_v53, %v793_v30  ;;  %v1127_v5 = vld [vmem:[#allocation2 + $0x3] ss:$4 sm:$0xff]  ;;  %v1123_v7 = vld [vmem:[#allocation2 + $0x2] ss:$4 sm:$0xff] }
 0x15c   :  { %v1135_v50 = vld [vmem:[#allocation2 + $0x5] ss:$4 sm:$0xff] }
 0x15d   :  { %v2620_v52 = vpack.i.bf16 %v1119_v49, %v1135_v50 }
 0x15f   :  { %2621 = vrot.lane.b32.xlu1 %v2620_v52, %s2843_s19 }
 0x160   :  { %v825_v55 = vpop.permute.xlu0 %824  ;;  %v1047_v57 = vpop.f32.mrf.mxu0 }
 0x161   :  { %v941_v58 = vsel %vm527_vm4, %v933_v54, %v825_v55  ;;  %v1048_v59 = vadd.f32 %v3470_v28, %v1047_v57  ;;  %v857_v60 = vpop.permute.xlu1 %856 }
 0x162   :  { %v949_v61 = vsel %vm536_vm5, %v941_v58, %v857_v60  ;;  %v733_v12 = vpop.permute.xlu2 %732 }
 0x163   :  { %v1087_v62 = vmax.f32 %v1048_v59, 0.0  ;;  %v957_v63 = vsel %vm545_vm6, %v949_v61, %v889_v41  ;;  %v2527_v61 = vld [vmem:[%s3907_s0 + $0xf6] ss:$2 sm:$0xff] }
 0x164   :  { %2595 = vmatmul.msk.f32.gmra.mxu0 %vm114_vm7, %v957_v63 }
 0x165   :  { %1103 = vst.msk [vmem:[#allocation2 + $0x22] sm:$0xff] %vm114_vm7, %v1087_v62 }
 0x168   :  { %v699_v2 = vpop.permute.xlu0 %698 }
 0x169   :  { %v731_v3 = vpop.permute.xlu1 %730  ;;  %v910_v4 = vsel %vm491_vm0, %v2524_v1, %v699_v2 }
 0x16a   :  { %v918_v11 = vsel %vm500_vm1, %v910_v4, %v731_v3  ;;  %v829_v26 = vpop.permute.xlu2 %828 }
 0x16b   :  { %v926_v14 = vsel %vm509_vm2, %v918_v11, %v763_v51 }
 0x16c   :  { %v1143_v6 = vld [vmem:[#allocation2 + $0x7] ss:$4 sm:$0xff]  ;;  %v1139_v8 = vld [vmem:[#allocation2 + $0x6] ss:$4 sm:$0xff] }
 0x16d   :  { %v2630_v9 = vpack.i.bf16 %v1127_v5, %v1143_v6  ;;  %v2625_v10 = vpack.i.bf16 %v1123_v7, %v1139_v8 }
 0x16f   :  { %2631 = vrot.lane.b32.xlu0 %v2630_v9, %s2844_s21  ;;  %2626 = vrot.lane.b32.xlu2 %v2625_v10, %s2845_s23 }
 0x170   :  { %v795_v13 = vpop.permute.xlu0 %794 }
 0x171   :  { %v827_v15 = vpop.permute.xlu1 %826  ;;  %v1050_v16 = vpop.f32.mrf.mxu0  ;;  %v934_v17 = vsel %vm518_vm3, %v926_v14, %v795_v13  ;;  %v1330_v13 = vld [vmem:[#allocation5 + $0xf8] sm:$0xff]  ;;  %v1313_v14 = vld [vmem:[#allocation5 + $0x70] sm:$0xff] }
 0x172   :  { %v1051_v18 = vadd.f32 %v3470_v28, %v1050_v16  ;;  %v942_v20 = vsel %vm527_vm4, %v934_v17, %v827_v15  ;;  %v703_v33 = vpop.permute.xlu2 %702  ;;  %v1329_v16 = vld [vmem:[#allocation5 + $0xf0] sm:$0xff]  ;;  %1364 = vmatpush.msra.mxu2 %v1330_v13 }
 0x173   :  { %v950_v21 = vsel %vm536_vm5, %v942_v20, %v859_v0  ;;  %v912_v45 = vsel %vm491_vm0, %v2526_v43, %v703_v33  ;;  %v1305_v43 = vld [vmem:[#allocation5 + $0x30] sm:$0xff] }
 0x174   :  { %v1088_v19 = vmax.f32 %v1051_v18, 0.0  ;;  %1365 = vmatpush.msra.mxu2 %v1329_v16 }
 0x176   :  { %1104 = vst.msk [vmem:[#allocation2 + $0x2a] sm:$0xff] %vm114_vm7, %v1088_v19 }
 0x178   :  { %v891_v22 = vpop.permute.xlu0 %890 }
 0x179   :  { %v701_v24 = vpop.permute.xlu1 %700  ;;  %v958_v25 = vsel %vm545_vm6, %v950_v21, %v891_v22  ;;  %v1312_v22 = vld [vmem:[#allocation5 + $0x68] sm:$0xff] }
 0x17a   :  { %2596 = vmatmul.msk.f32.gmra.mxu0 %vm114_vm7, %v958_v25  ;;  %v911_v27 = vsel %vm491_vm0, %v2525_v23, %v701_v24  ;;  %v799_v44 = vpop.permute.xlu2 %798  ;;  %v1328_v23 = vld [vmem:[#allocation5 + $0xe8] sm:$0xff]  ;;  %v1311_v24 = vld [vmem:[#allocation5 + $0x60] sm:$0xff] }
 0x17b   :  { %v919_v29 = vsel %vm500_vm1, %v911_v27, %v733_v12  ;;  %v1314_v12 = vld [vmem:[#allocation5 + $0x78] sm:$0xff]  ;;  %1366 = vmatpush.msra.mxu2 %v1328_v23 }
 0x17c   :  { %1335 = vmatpush.msra.mxu1 %v1314_v12  ;;  %v1310_v27 = vld [vmem:[#allocation5 + $0x58] sm:$0xff] }
 0x17e   :  { %1336 = vmatpush.msra.mxu1 %v1313_v14 }
 0x180   :  { %v765_v30 = vpop.permute.xlu0 %764  ;;  %1337 = vmatpush.msra.mxu1 %v1312_v22 }
 0x181   :  { %v797_v31 = vpop.permute.xlu1 %796  ;;  %v927_v32 = vsel %vm509_vm2, %v919_v29, %v765_v30 }
 0x182   :  { %v935_v34 = vsel %vm518_vm3, %v927_v32, %v797_v31  ;;  %v895_v50 = vpop.permute.xlu2 %894  ;;  %1338 = vmatpush.msra.mxu1 %v1311_v24  ;;  %v1326_v31 = vld [vmem:[#allocation5 + $0xd8] sm:$0xff] }
 0x183   :  { %v943_v36 = vsel %vm527_vm4, %v935_v34, %v829_v26  ;;  %v1327_v26 = vld [vmem:[#allocation5 + $0xe0] sm:$0xff]  ;;  %v1309_v34 = vld [vmem:[#allocation5 + $0x50] sm:$0xff] }
 0x184   :  { %1367 = vmatpush.msra.mxu2 %v1327_v26  ;;  %1339 = vmatpush.msra.mxu1 %v1310_v27 }
 0x186   :  { %1368 = vmatpush.msra.mxu2 %v1326_v31  ;;  %1340 = vmatpush.msra.mxu1 %v1309_v34 }
 0x187   :  { %v1053_v35 = vpop.f32.mrf.mxu0 }
 0x188   :  { %v1054_v37 = vadd.f32 %v3470_v28, %v1053_v35  ;;  %v861_v38 = vpop.permute.xlu0 %860  ;;  %v1325_v35 = vld [vmem:[#allocation5 + $0xd0] sm:$0xff] }
 0x189   :  { %v951_v39 = vsel %vm536_vm5, %v943_v36, %v861_v38  ;;  %v893_v40 = vpop.permute.xlu1 %892  ;;  %v1324_v38 = vld [vmem:[#allocation5 + $0xc8] sm:$0xff]  ;;  %1369 = vmatpush.msra.mxu2 %v1325_v35 }
 0x18a   :  { %v1089_v41 = vmax.f32 %v1054_v37, 0.0  ;;  %v959_v42 = vsel %vm545_vm6, %v951_v39, %v893_v40  ;;  %v769_v1 = vpop.permute.xlu2 %768  ;;  %v1308_v37 = vld [vmem:[#allocation5 + $0x48] sm:$0xff]  ;;  %v1307_v39 = vld [vmem:[#allocation5 + $0x40] sm:$0xff] }
 0x18b   :  { %2597 = vmatmul.msk.f32.gmra.mxu0 %vm114_vm7, %v959_v42  ;;  %1341 = vmatpush.msra.mxu1 %v1308_v37  ;;  %v1323_v40 = vld [vmem:[#allocation5 + $0xc0] sm:$0xff]  ;;  %v1322_v42 = vld [vmem:[#allocation5 + $0xb8] sm:$0xff] }
 0x18c   :  { %1105 = vst.msk [vmem:[#allocation2 + $0x32] sm:$0xff] %vm114_vm7, %v1089_v41  ;;  %1370 = vmatpush.msra.mxu2 %v1324_v38  ;;  %v1306_v41 = vld [vmem:[#allocation5 + $0x38] sm:$0xff] }
 0x18d   :  { %1342 = vmatpush.msra.mxu1 %v1307_v39 }
 0x18e   :  { %1371 = vmatpush.msra.mxu2 %v1323_v40 }
 0x18f   :  { %1343 = vmatpush.msra.mxu1 %v1306_v41 }
 0x190   :  { %v735_v46 = vpop.permute.xlu0 %734  ;;  %1372 = vmatpush.msra.mxu2 %v1322_v42 }
 0x191   :  { %v767_v47 = vpop.permute.xlu1 %766  ;;  %v920_v48 = vsel %vm500_vm1, %v912_v45, %v735_v46  ;;  %v1304_v45 = vld [vmem:[#allocation5 + $0x28] sm:$0xff]  ;;  %1344 = vmatpush.msra.mxu1 %v1305_v43 }
 0x192   :  { %v928_v49 = vsel %vm509_vm2, %v920_v48, %v767_v47  ;;  %v865_v30 = vpop.permute.xlu2 %864  ;;  %v1320_v46 = vld [vmem:[#allocation5 + $0xa8] sm:$0xff]  ;;  %v1303_v47 = vld [vmem:[#allocation5 + $0x20] sm:$0xff] }
 0x193   :  { %v936_v51 = vsel %vm518_vm3, %v928_v49, %v799_v44  ;;  %v1321_v44 = vld [vmem:[#allocation5 + $0xb0] sm:$0xff]  ;;  %1345 = vmatpush.msra.mxu1 %v1304_v45  ;;  %v1319_v48 = vld [vmem:[#allocation5 + $0xa0] sm:$0xff]  ;;  %v1302_v49 = vld [vmem:[#allocation5 + $0x18] sm:$0xff] }
 0x194   :  { %1373 = vmatpush.msra.mxu2 %v1321_v44 }
 0x195   :  { %1346 = vmatpush.msra.mxu1 %v1303_v47 }
 0x196   :  { %1374 = vmatpush.msra.mxu2 %v1320_v46 }
 0x197   :  { %1347 = vmatpush.msra.mxu1 %v1302_v49 }
 0x198   :  { %v831_v52 = vpop.permute.xlu0 %830  ;;  %v1056_v53 = vpop.f32.mrf.mxu0  ;;  %1375 = vmatpush.msra.mxu2 %v1319_v48 }
 0x199   :  { %v944_v54 = vsel %vm527_vm4, %v936_v51, %v831_v52  ;;  %v1057_v55 = vadd.f32 %v3470_v28, %v1056_v53  ;;  %v863_v57 = vpop.permute.xlu1 %862  ;;  %v1301_v51 = vld [vmem:[#allocation5 + $0x10] sm:$0xff] }
 0x19a   :  { %v952_v58 = vsel %vm536_vm5, %v944_v54, %v863_v57  ;;  %v1317_v54 = vld [vmem:[#allocation5 + $0x90] sm:$0xff]  ;;  %1348 = vmatpush.msra.mxu1 %v1301_v51  ;;  %v1316_v57 = vld [vmem:[#allocation5 + $0x88] sm:$0xff] }
 0x19b   :  { %v1090_v59 = vmax.f32 %v1057_v55, 0.0  ;;  %v960_v60 = vsel %vm545_vm6, %v952_v58, %v895_v50  ;;  %v1318_v50 = vld [vmem:[#allocation5 + $0x98] sm:$0xff]  ;;  %v1299_v58 = vld [vmem:[#allocation5] sm:$0xff] }
 0x19c   :  { %2598 = vmatmul.msk.f32.gmra.mxu0 %vm114_vm7, %v960_v60  ;;  %1376 = vmatpush.msra.mxu2 %v1318_v50 }
 0x19d   :  { %1106 = vst.msk [vmem:[#allocation2 + $0x3a] sm:$0xff] %vm114_vm7, %v1090_v59  ;;  %1349 = vmatpush.msra.mxu1 %v1300_v56  ;;  %v1315_v59 = vld [vmem:[#allocation5 + $0x80] sm:$0xff] }
 0x19e   :  { %1377 = vmatpush.msra.mxu2 %v1317_v54 }
 0x19f   :  { %1350 = vmatpush.msra.mxu1 %v1299_v58 }
 0x1a0   :  { %v705_v62 = vpop.permute.xlu0 %704  ;;  %1378 = vmatpush.msra.mxu2 %v1316_v57 }
 0x1a1   :  { %v737_v63 = vpop.permute.xlu1 %736  ;;  %v913_v0 = vsel %vm491_vm0, %v2527_v61, %v705_v62 }
 0x1a2   :  { %v921_v9 = vsel %vm500_vm1, %v913_v0, %v737_v63  ;;  %1379 = vmatpush.msra.mxu2 %v1315_v59 }
 0x1a3   :  { %v929_v17 = vsel %vm509_vm2, %v921_v9, %v769_v1 }
 0x1a4   :  { %v1129_v2 = vld [vmem:[#allocation2 + $0x23] ss:$4 sm:$0xff]  ;;  %v1125_v4 = vld [vmem:[#allocation2 + $0x22] ss:$4 sm:$0xff]  ;;  %v1121_v7 = vld [vmem:[#allocation2 + $0x21] ss:$4 sm:$0xff] }
 0x1a5   :  { %v1145_v3 = vld [vmem:[#allocation2 + $0x27] ss:$4 sm:$0xff]  ;;  %v1141_v6 = vld [vmem:[#allocation2 + $0x26] ss:$4 sm:$0xff]  ;;  %v1137_v8 = vld [vmem:[#allocation2 + $0x25] ss:$4 sm:$0xff] }
 0x1a6   :  { %v2645_v5 = vpack.i.bf16 %v1129_v2, %v1145_v3  ;;  %v2640_v10 = vpack.i.bf16 %v1125_v4, %v1141_v6  ;;  %v2635_v11 = vpack.i.bf16 %v1121_v7, %v1137_v8  ;;  %v1115_v3 = vld [vmem:[#allocation2] ss:$4 sm:$0xff] }
 0x1a7   :  { %v1131_v4 = vld [vmem:[#allocation2 + $0x4] ss:$4 sm:$0xff] }
 0x1a8   :  { %2646 = vrot.lane.b32.xlu0 %v2645_v5, %s2844_s21  ;;  %2641 = vrot.lane.b32.xlu2 %v2640_v10, %s2845_s23  ;;  %v801_v15 = vpop.permute.xlu0 %800  ;;  %v1117_v45 = vld [vmem:[#allocation2 + $0x20] ss:$4 sm:$0xff] }
 0x1a9   :  { %2636 = vrot.lane.b32.xlu1 %v2635_v11, %s2843_s19  ;;  %v1059_v18 = vpop.f32.mrf.mxu0  ;;  %v937_v19 = vsel %vm518_vm3, %v929_v17, %v801_v15  ;;  %v833_v20 = vpop.permute.xlu1 %832  ;;  %v1133_v46 = vld [vmem:[#allocation2 + $0x24] ss:$4 sm:$0xff] }
 0x1aa   :  { %v1060_v21 = vadd.f32 %v3470_v28, %v1059_v18  ;;  %v945_v29 = vsel %vm527_vm4, %v937_v19, %v833_v20 }
 0x1ab   :  { %v953_v32 = vsel %vm536_vm5, %v945_v29, %v865_v30 }
 0x1ac   :  { %v1091_v25 = vmax.f32 %v1060_v21, 0.0 }
 0x1ae   :  { %1107 = vst.msk [vmem:[#allocation2 + $0x46] sm:$0xff] %vm114_vm7, %v1091_v25 }
 0x1b0   :  { %v897_v33 = vpop.permute.xlu0 %896 }
 0x1b1   :  { %v961_v36 = vsel %vm545_vm6, %v953_v32, %v897_v33 }
 0x1b2   :  { %2599 = vmatmul.msk.f32.gmra.mxu0 %vm114_vm7, %v961_v36 }
 0x1bf   :  { %v1062_v52 = vpop.f32.mrf.mxu0 }
 0x1c0   :  { %v1063_v53 = vadd.f32 %v3470_v28, %v1062_v52 }
 0x1c2   :  { %v1092_v55 = vmax.f32 %v1063_v53, 0.0 }
 0x1c4   :  { %1108 = vst.msk [vmem:[#allocation2 + $0x4e] sm:$0xff] %vm114_vm7, %v1092_v55 }
 0x1c9   :  { %v2627_v2 = vpop.permute.xlu2 %2626 }
 0x1ca   :  { %v2629_v7 = vunpack.i.h.bf16 %v2627_v2  ;;  %v2628_v8 = vunpack.i.l.bf16 %v2627_v2 }
 0x1d0   :  { %v1065_v60 = vpop.f32.mrf.mxu0 }
 0x1d1   :  { %v1066_v61 = vadd.f32 %v3470_v28, %v1065_v60  ;;  %v2622_v63 = vpop.permute.xlu1 %2621 }
 0x1d2   :  { %v2624_v0 = vunpack.i.h.bf16 %v2622_v63  ;;  %v2623_v1 = vunpack.i.l.bf16 %v2622_v63 }
 0x1d3   :  { %v1093_v62 = vmax.f32 %v1066_v61, 0.0 }
 0x1d4   :  { %v1194_v5 = vsel %vm114_vm7, %v1115_v3, %v2624_v0  ;;  %v1201_v6 = vsel %vm114_vm7, %v1131_v4, %v2623_v1 }
 0x1d5   :  { %1109 = vst.msk [vmem:[#allocation2 + $0x56] sm:$0xff] %vm114_vm7, %v1093_v62  ;;  %v1196_v14 = vsel %vm132_vm8, %v1194_v5, %v2629_v7  ;;  %v1203_v15 = vsel %vm132_vm8, %v1201_v6, %v2628_v8 }
 0x1e1   :  { %v1068_v9 = vpop.f32.mrf.mxu0  ;;  %v2632_v10 = vpop.permute.xlu0 %2631 }
 0x1e2   :  { %v1069_v11 = vadd.f32 %v3470_v28, %v1068_v9  ;;  %v2634_v12 = vunpack.i.h.bf16 %v2632_v10  ;;  %v2633_v13 = vunpack.i.l.bf16 %v2632_v10 }
 0x1e4   :  { %v1094_v16 = vmax.f32 %v1069_v11, 0.0  ;;  %v1199_v17 = vsel %vm1198_vm9, %v1196_v14, %v2634_v12  ;;  %v1205_v18 = vsel %vm1198_vm9, %v1203_v15, %v2633_v13 }
 0x1e5   :  { %1351 = vmatmul.f32.vlgmr.msra.gmra.mxu1 %v1199_v17  ;;  %1380 = vmatmul.f32.vlgmr.msra.gmra.mxu2 %v1205_v18 }
 0x1e6   :  { %1110 = vst.msk [vmem:[#allocation2 + $0x5e] sm:$0xff] %vm114_vm7, %v1094_v16 }
 0x1ed   :  { %v1212_v19 = vld [vmem:[#allocation2 + $0x45] ss:$4 sm:$0xff]  ;;  %v1220_v25 = vld [vmem:[#allocation2 + $0x47] ss:$4 sm:$0xff]  ;;  %v1216_v27 = vld [vmem:[#allocation2 + $0x46] ss:$4 sm:$0xff] }
 0x1ee   :  { %v1228_v20 = vld [vmem:[#allocation2 + $0x49] ss:$4 sm:$0xff]  ;;  %v1208_v11 = vld [vmem:[#allocation2 + $0x44] ss:$4 sm:$0xff] }
 0x1ef   :  { %v2650_v21 = vpack.i.bf16 %v1212_v19, %v1228_v20  ;;  %v1224_v12 = vld [vmem:[#allocation2 + $0x48] ss:$4 sm:$0xff] }
 0x1f1   :  { %2651 = vrot.lane.b32.xlu1 %v2650_v21, %s2843_s19 }
 0x1f7   :  { %v1071_v22 = vpop.f32.mrf.mxu0 }
 0x1f8   :  { %v1072_v23 = vadd.f32 %v3470_v28, %v1071_v22 }
 0x1fa   :  { %v1095_v24 = vmax.f32 %v1072_v23, 0.0 }
 0x1fc   :  { %1111 = vst.msk [vmem:[#allocation2 + $0x66] sm:$0xff] %vm114_vm7, %v1095_v24 }
 0x202   :  { %v2642_v35 = vpop.permute.xlu2 %2641 }
 0x203   :  { %v1236_v26 = vld [vmem:[#allocation2 + $0x4b] ss:$4 sm:$0xff]  ;;  %v1232_v29 = vld [vmem:[#allocation2 + $0x4a] ss:$4 sm:$0xff]  ;;  %v2644_v42 = vunpack.i.h.bf16 %v2642_v35  ;;  %v2643_v43 = vunpack.i.l.bf16 %v2642_v35 }
 0x204   :  { %v2660_v30 = vpack.i.bf16 %v1220_v25, %v1236_v26  ;;  %v2655_v31 = vpack.i.bf16 %v1216_v27, %v1232_v29 }
 0x206   :  { %2661 = vrot.lane.b32.xlu0 %v2660_v30, %s2844_s21  ;;  %2656 = vrot.lane.b32.xlu2 %v2655_v31, %s2845_s23 }
 0x208   :  { %v1074_v32 = vpop.f32.mrf.mxu0 }
 0x209   :  { %v1075_v33 = vadd.f32 %v3470_v28, %v1074_v32 }
 0x20b   :  { %v1096_v34 = vmax.f32 %v1075_v33, 0.0 }
 0x20d   :  { %1112 = vst.msk [vmem:[#allocation2 + $0x6e] sm:$0xff] %vm114_vm7, %v1096_v34 }
 0x219   :  { %v1077_v36 = vpop.f32.mrf.mxu0 }
 0x21a   :  { %v1078_v37 = vadd.f32 %v3470_v28, %v1077_v36  ;;  %v2647_v38 = vpop.permute.xlu0 %2646 }
 0x21b   :  { %v2637_v39 = vpop.permute.xlu1 %2636  ;;  %v2649_v47 = vunpack.i.h.bf16 %v2647_v38  ;;  %v2648_v48 = vunpack.i.l.bf16 %v2647_v38 }
 0x21c   :  { %v2639_v40 = vunpack.i.h.bf16 %v2637_v39  ;;  %v2638_v41 = vunpack.i.l.bf16 %v2637_v39  ;;  %v1097_v44 = vmax.f32 %v1078_v37, 0.0 }
 0x21e   :  { %v1195_v49 = vsel %vm114_vm7, %v1117_v45, %v2639_v40  ;;  %v1202_v50 = vsel %vm114_vm7, %v1133_v46, %v2638_v41  ;;  %1113 = vst.msk [vmem:[#allocation2 + $0x76] sm:$0xff] %vm114_vm7, %v1097_v44 }
 0x21f   :  { %v1197_v51 = vsel %vm132_vm8, %v1195_v49, %v2644_v42  ;;  %v1204_v52 = vsel %vm132_vm8, %v1202_v50, %v2643_v43 }
 0x220   :  { %v1200_v53 = vsel %vm1198_vm9, %v1197_v51, %v2649_v47  ;;  %v1206_v54 = vsel %vm1198_vm9, %v1204_v52, %v2648_v48  ;;  %v1504_v51 = vld [vmem:[#allocation8 + $0x78] sm:$0xff]  ;;  %v1503_v52 = vld [vmem:[#allocation8 + $0x70] sm:$0xff] }
 0x221   :  { %1354 = vmatmul.f32.gmra.mxu1 %v1200_v53  ;;  %1383 = vmatmul.f32.gmra.mxu2 %v1206_v54  ;;  %v1502_v53 = vld [vmem:[#allocation8 + $0x68] sm:$0xff]  ;;  %v1520_v54 = vld [vmem:[#allocation8 + $0xf8] sm:$0xff] }
 0x222   :  { %1557 = vmatpush.msra.mxu3 %v1504_v51  ;;  %1577 = vmatpush.msrb.mxu1 %v1520_v54  ;;  %v1545_v51 = vld [vmem:[#allocation8 + $0x1c0] sm:$0xff]  ;;  %v1527_v54 = vld [vmem:[#allocation8 + $0x130] sm:$0xff] }
 0x224   :  { %1558 = vmatpush.msra.mxu3 %v1503_v52  ;;  %v1528_v52 = vld [vmem:[#allocation8 + $0x138] sm:$0xff] }
 0x226   :  { %1559 = vmatpush.msra.mxu3 %v1502_v53  ;;  %v1544_v53 = vld [vmem:[#allocation8 + $0x1b8] sm:$0xff] }
 0x22f   :  { %v1080_v55 = vpop.f32.mrf.mxu0 }
 0x230   :  { %v1081_v56 = vadd.f32 %v3470_v28, %v1080_v55  ;;  %v3693_v28 = vld [vmem:[%s3911_s4] ss:$0 sm:$0xff]  ;;  %v1519_v55 = vld [vmem:[#allocation8 + $0xf0] sm:$0xff] }
 0x231   :  { %1578 = vmatpush.msrb.mxu1 %v1519_v55  ;;  %v1543_v55 = vld [vmem:[#allocation8 + $0x1b0] sm:$0xff] }
 0x232   :  { %v1098_v57 = vmax.f32 %v1081_v56, 0.0  ;;  %v1501_v56 = vld [vmem:[#allocation8 + $0x60] sm:$0xff] }
 0x233   :  { %1560 = vmatpush.msra.mxu3 %v1501_v56  ;;  %v1526_v56 = vld [vmem:[#allocation8 + $0x128] sm:$0xff] }
 0x234   :  { %1114 = vst.msk [vmem:[#allocation2 + $0x7e] sm:$0xff] %vm114_vm7, %v1098_v57  ;;  %v1518_v57 = vld [vmem:[#allocation8 + $0xe8] sm:$0xff] }
 0x235   :  { %1579 = vmatpush.msrb.mxu1 %v1518_v57  ;;  %v1542_v57 = vld [vmem:[#allocation8 + $0x1a8] sm:$0xff] }
 0x23b   :  { %v1238_v58 = vld [vmem:[#allocation2 + $0x6b] ss:$4 sm:$0xff]  ;;  %v1218_v59 = vld [vmem:[#allocation2 + $0x66] ss:$4 sm:$0xff]  ;;  %v1214_v62 = vld [vmem:[#allocation2 + $0x65] ss:$4 sm:$0xff] }
 0x23c   :  { %v1234_v60 = vld [vmem:[#allocation2 + $0x6a] ss:$4 sm:$0xff]  ;;  %1283 = vrot.lane.b32.xlu0 %v1238_v58, %s2844_s21  ;;  %v1230_v63 = vld [vmem:[#allocation2 + $0x69] ss:$4 sm:$0xff]  ;;  %v1222_v1 = vld [vmem:[#allocation2 + $0x67] ss:$4 sm:$0xff] }
 0x23d   :  { %v2670_v61 = vpack.i.bf16 %v1218_v59, %v1234_v60  ;;  %v2665_v0 = vpack.i.bf16 %v1214_v62, %v1230_v63  ;;  %v1226_v35 = vld [vmem:[#allocation2 + $0x68] ss:$4 sm:$0xff] }
 0x23e   :  { %v1210_v39 = vld [vmem:[#allocation2 + $0x64] ss:$4 sm:$0xff] }
 0x23f   :  { %2671 = vrot.lane.b32.xlu2 %v2670_v61, %s2845_s23  ;;  %2666 = vrot.lane.b32.xlu1 %v2665_v0, %s2843_s19  ;;  %v1500_v59 = vld [vmem:[#allocation8 + $0x58] sm:$0xff]  ;;  %v1517_v60 = vld [vmem:[#allocation8 + $0xe0] sm:$0xff]  ;;  %v1499_v63 = vld [vmem:[#allocation8 + $0x50] sm:$0xff] }
 0x240   :  { %v1516_v0 = vld [vmem:[#allocation8 + $0xd8] sm:$0xff]  ;;  %1561 = vmatpush.msra.mxu3 %v1500_v59  ;;  %1580 = vmatpush.msrb.mxu1 %v1517_v60  ;;  %v1541_v59 = vld [vmem:[#allocation8 + $0x1a0] sm:$0xff] }
 0x241   :  { %v1524_v60 = vld [vmem:[#allocation8 + $0x118] sm:$0xff] }
 0x242   :  { %1562 = vmatpush.msra.mxu3 %v1499_v63  ;;  %1581 = vmatpush.msrb.mxu1 %v1516_v0  ;;  %v1539_v63 = vld [vmem:[#allocation8 + $0x190] sm:$0xff]  ;;  %v1522_v0 = vld [vmem:[#allocation8 + $0x108] sm:$0xff] }
 0x247   :  { %1259 = vrot.lane.b32.xlu1 %v1222_v1, %s2844_s21  ;;  %v1536_v1 = vld [vmem:[#allocation8 + $0x178] sm:$0xff]  ;;  %s2846_s21 = smov [#allocation13]  }
 0x248   :  { %1597 = vmatpush.msrb.mxu2 %v1536_v1  ;;  %v1538_v1 = vld [vmem:[#allocation8 + $0x188] sm:$0xff] }
 0x260   :  { %v2657_v10 = vpop.permute.xlu2 %2656 }
 0x261   :  { %v2659_v15 = vunpack.i.h.bf16 %v2657_v10  ;;  %v2658_v16 = vunpack.i.l.bf16 %v2657_v10  ;;  %v1512_v10 = vld [vmem:[#allocation8 + $0xb8] sm:$0xff] }
 0x262   :  { %v1352_v2 = vpop.f32.mrf.mxu1 }
 0x263   :  { %v1353_v3 = vadd.f32 %v3693_v28, %v1352_v2  ;;  %v2652_v7 = vpop.permute.xlu1 %2651 }
 0x264   :  { %v2654_v8 = vunpack.i.h.bf16 %v2652_v7  ;;  %v2653_v9 = vunpack.i.l.bf16 %v2652_v7  ;;  %v1514_v7 = vld [vmem:[#allocation8 + $0xc8] sm:$0xff] }
 0x266   :  { %v1287_v13 = vsel %vm114_vm7, %v1208_v11, %v2654_v8  ;;  %v1293_v14 = vsel %vm114_vm7, %v1224_v12, %v2653_v9  ;;  %v1513_v8 = vld [vmem:[#allocation8 + $0xc0] sm:$0xff]  ;;  %v1495_v9 = vld [vmem:[#allocation8 + $0x30] sm:$0xff]  ;;  %v1494_v12 = vld [vmem:[#allocation8 + $0x28] sm:$0xff] }
 0x267   :  { %v1289_v20 = vsel %vm132_vm8, %v1287_v13, %v2659_v15  ;;  %v1295_v21 = vsel %vm132_vm8, %v1293_v14, %v2658_v16 }
 0x268   :  { %v1381_v4 = vpop.f32.mrf.mxu2 }
 0x269   :  { %v1382_v5 = vadd.f32 %v1381_v4, %v1353_v3  ;;  %v1498_v3 = vld [vmem:[#allocation8 + $0x48] sm:$0xff]  ;;  %v1515_v4 = vld [vmem:[#allocation8 + $0xd0] sm:$0xff] }
 0x26a   :  { %1563 = vmatpush.msra.mxu3 %v1498_v3  ;;  %1582 = vmatpush.msrb.mxu1 %v1515_v4  ;;  %v1537_v3 = vld [vmem:[#allocation8 + $0x180] sm:$0xff]  ;;  %v1734_v4 = vld [vmem:[#allocation10 + $0xf0] sm:$0xff] }
 0x26b   :  { %v1393_v6 = vmax.f32 %v1382_v5, 0.0 }
 0x26c   :  { %1583 = vmatpush.msrb.mxu1 %v1514_v7 }
 0x26d   :  { %1397 = vst.msk [vmem:[#allocation3 + $0x2] sm:$0xff] %vm132_vm8, %v1393_v6  ;;  %v1497_v6 = vld [vmem:[#allocation8 + $0x40] sm:$0xff] }
 0x26e   :  { %1564 = vmatpush.msra.mxu3 %v1497_v6  ;;  %1584 = vmatpush.msrb.mxu1 %v1513_v8  ;;  %v1732_v6 = vld [vmem:[#allocation10 + $0xe0] sm:$0xff]  ;;  %v1730_v8 = vld [vmem:[#allocation10 + $0xd0] sm:$0xff] }
 0x270   :  { %1585 = vmatpush.msrb.mxu1 %v1512_v10 }
 0x278   :  { %v2662_v17 = vpop.permute.xlu0 %2661 }
 0x279   :  { %v2664_v18 = vunpack.i.h.bf16 %v2662_v17  ;;  %v2663_v19 = vunpack.i.l.bf16 %v2662_v17 }
 0x27b   :  { %v1291_v22 = vsel %vm1198_vm9, %v1289_v20, %v2664_v18  ;;  %v1297_v23 = vsel %vm1198_vm9, %v1295_v21, %v2663_v19  ;;  %v1493_v20 = vld [vmem:[#allocation8 + $0x20] sm:$0xff] }
 0x27c   :  { %1357 = vmatmul.f32.gmra.mxu1 %v1291_v22  ;;  %1386 = vmatmul.f32.gmra.mxu2 %v1297_v23  ;;  %v1492_v22 = vld [vmem:[#allocation8 + $0x18] sm:$0xff]  ;;  %v1491_v23 = vld [vmem:[#allocation8 + $0x10] sm:$0xff] }
 0x299   :  { %v2672_v30 = vpop.permute.xlu2 %2671 }
 0x29a   :  { %v2673_v34 = vunpack.i.l.bf16 %v2672_v30  ;;  %v2674_v42 = vunpack.i.h.bf16 %v2672_v30  ;;  %v1552_v30 = vld [vmem:[#allocation8 + $0x1f8] sm:$0xff] }
 0x29e   :  { %v1355_v24 = vpop.f32.mrf.mxu1 }
 0x29f   :  { %v1356_v25 = vadd.f32 %v3693_v28, %v1355_v24 }
 0x2a4   :  { %v1384_v26 = vpop.f32.mrf.mxu2 }
 0x2a5   :  { %v1385_v27 = vadd.f32 %v1384_v26, %v1356_v25  ;;  %v1490_v25 = vld [vmem:[#allocation8 + $0x8] sm:$0xff] }
 0x2a7   :  { %v1394_v29 = vmax.f32 %v1385_v27, 0.0  ;;  %v1489_v27 = vld [vmem:[#allocation8] sm:$0xff] }
 0x2a9   :  { %1398 = vst.msk [vmem:[#allocation3 + $0xa] sm:$0xff] %vm132_vm8, %v1394_v29 }
 0x2ae   :  { %v1284_v37 = vpop.permute.xlu0 %1283 }
 0x2b0   :  { %v1415_v11 = vld [vmem:[#allocation3 + $0x7] ss:$4 sm:$0xf]  ;;  %v1411_v13 = vld [vmem:[#allocation3 + $0x5] ss:$4 sm:$0xf] }
 0x2b1   :  { %v2667_v31 = vpop.permute.xlu1 %2666  ;;  %v1403_v14 = vld [vmem:[#allocation3 + $0x1] ss:$4 sm:$0xf]  ;;  %v1407_v26 = vld [vmem:[#allocation3 + $0x3] ss:$4 sm:$0xf] }
 0x2b2   :  { %v2669_v32 = vunpack.i.h.bf16 %v2667_v31  ;;  %v2668_v33 = vunpack.i.l.bf16 %v2667_v31  ;;  %v1511_v31 = vld [vmem:[#allocation8 + $0xb0] sm:$0xff] }
 0x2b3   :  { %1586 = vmatpush.msrb.mxu1 %v1511_v31  ;;  %v1722_v31 = vld [vmem:[#allocation10 + $0x90] sm:$0xff] }
 0x2b4   :  { %v1294_v36 = vsel %vm114_vm7, %v1226_v35, %v2668_v33  ;;  %v1288_v41 = vsel %vm114_vm7, %v1210_v39, %v2669_v32  ;;  %v1535_v32 = vld [vmem:[#allocation8 + $0x170] sm:$0xff]  ;;  %v1534_v35 = vld [vmem:[#allocation8 + $0x168] sm:$0xff]  ;;  %v1549_v39 = vld [vmem:[#allocation8 + $0x1e0] sm:$0xff] }
 0x2b5   :  { %v1296_v38 = vsel %vm132_vm8, %v1294_v36, %v2673_v34  ;;  %v1290_v44 = vsel %vm132_vm8, %v1288_v41, %v2674_v42  ;;  %v1551_v33 = vld [vmem:[#allocation8 + $0x1f0] sm:$0xff]  ;;  %1598 = vmatpush.msrb.mxu2 %v1535_v32  ;;  %v1510_v34 = vld [vmem:[#allocation8 + $0xa8] sm:$0xff]  ;;  %v1532_v41 = vld [vmem:[#allocation8 + $0x158] sm:$0xff] }
 0x2b6   :  { %v1298_v40 = vsel %vm1198_vm9, %v1296_v38, %v1284_v37  ;;  %v1550_v36 = vld [vmem:[#allocation8 + $0x1e8] sm:$0xff]  ;;  %v1509_v37 = vld [vmem:[#allocation8 + $0xa0] sm:$0xff]  ;;  %1587 = vmatpush.msrb.mxu1 %v1510_v34  ;;  %v1548_v42 = vld [vmem:[#allocation8 + $0x1d8] sm:$0xff] }
 0x2b7   :  { %1389 = vmatmul.f32.gmra.mxu2 %v1298_v40  ;;  %v1533_v38 = vld [vmem:[#allocation8 + $0x160] sm:$0xff]  ;;  %v1508_v40 = vld [vmem:[#allocation8 + $0x98] sm:$0xff]  ;;  %v1754_v34 = vld [vmem:[#allocation10 + $0x190] sm:$0xff] }
 0x2b8   :  { %1599 = vmatpush.msrb.mxu2 %v1534_v35  ;;  %1588 = vmatpush.msrb.mxu1 %v1509_v37  ;;  %v1920_v32 = vld [vmem:[#allocation10 + $0x6c0] sm:$0xff]  ;;  %v1798_v35 = vld [vmem:[#allocation10 + $0x2f0] sm:$0xff] }
 0x2b9   :  { %v1260_v43 = vpop.permute.xlu1 %1259  ;;  %v1720_v37 = vld [vmem:[#allocation10 + $0x80] sm:$0xff] }
 0x2ba   :  { %v1292_v45 = vsel %vm1198_vm9, %v1290_v44, %v1260_v43  ;;  %1600 = vmatpush.msrb.mxu2 %v1533_v38  ;;  %1589 = vmatpush.msrb.mxu1 %v1508_v40  ;;  %v1507_v43 = vld [vmem:[#allocation8 + $0x90] sm:$0xff]  ;;  %v1796_v38 = vld [vmem:[#allocation10 + $0x2e0] sm:$0xff] }
 0x2bb   :  { %1360 = vmatmul.f32.gmra.mxu1 %v1292_v45  ;;  %v1531_v44 = vld [vmem:[#allocation8 + $0x150] sm:$0xff] }
 0x2bc   :  { %1601 = vmatpush.msrb.mxu2 %v1532_v41  ;;  %v1547_v45 = vld [vmem:[#allocation8 + $0x1d0] sm:$0xff]  ;;  %1590 = vmatpush.msrb.mxu1 %v1507_v43  ;;  %v1752_v41 = vld [vmem:[#allocation10 + $0x180] sm:$0xff] }
 0x2bd   :  { %v1405_v40 = vld [vmem:[#allocation3 + $0x2] ss:$4 sm:$0xf] }
 0x2be   :  { %1602 = vmatpush.msrb.mxu2 %v1531_v44  ;;  %v1718_v43 = vld [vmem:[#allocation10 + $0x70] sm:$0xff] }
 0x2bf   :  { %v1794_v44 = vld [vmem:[#allocation10 + $0x2d0] sm:$0xff] }
 0x2f9   :  { %v1358_v46 = vpop.f32.mrf.mxu1 }
 0x2fa   :  { %v1359_v47 = vadd.f32 %v3693_v28, %v1358_v46  ;;  %v1506_v46 = vld [vmem:[#allocation8 + $0x88] sm:$0xff] }
 0x2fb   :  { %1591 = vmatpush.msrb.mxu1 %v1506_v46 }
 0x2ff   :  { %v1387_v48 = vpop.f32.mrf.mxu2 }
 0x300   :  { %v1388_v49 = vadd.f32 %v1387_v48, %v1359_v47  ;;  %v1530_v47 = vld [vmem:[#allocation8 + $0x148] sm:$0xff] }
 0x301   :  { %v1546_v48 = vld [vmem:[#allocation8 + $0x1c8] sm:$0xff]  ;;  %1603 = vmatpush.msrb.mxu2 %v1530_v47  ;;  %v1750_v47 = vld [vmem:[#allocation10 + $0x170] sm:$0xff] }
 0x302   :  { %v1395_v50 = vmax.f32 %v1388_v49, 0.0  ;;  %v1505_v49 = vld [vmem:[#allocation8 + $0x80] sm:$0xff] }
 0x303   :  { %1592 = vmatpush.msrb.mxu1 %v1505_v49  ;;  %v1792_v49 = vld [vmem:[#allocation10 + $0x2c0] sm:$0xff] }
 0x304   :  { %1399 = vst.msk [vmem:[#allocation3 + $0x16] sm:$0xff] %vm132_vm8, %v1395_v50  ;;  %v1529_v50 = vld [vmem:[#allocation8 + $0x140] sm:$0xff] }
 0x305   :  { %1604 = vmatpush.msrb.mxu2 %v1529_v50  ;;  %1966 = vmatpush.msra.mxu1 %v1734_v4  ;;  %v1748_v50 = vld [vmem:[#allocation10 + $0x160] sm:$0xff] }
 0x307   :  { %1605 = vmatpush.msrb.mxu2 %v1528_v52  ;;  %1967 = vmatpush.msra.mxu1 %v1732_v6  ;;  %v1714_v52 = vld [vmem:[#allocation10 + $0x50] sm:$0xff] }
 0x309   :  { %1606 = vmatpush.msrb.mxu2 %v1527_v54  ;;  %1968 = vmatpush.msra.mxu1 %v1730_v8  ;;  %v1914_v54 = vld [vmem:[#allocation10 + $0x690] sm:$0xff]  ;;  %v1740_v8 = vld [vmem:[#allocation10 + $0x120] sm:$0xff] }
 0x30b   :  { %1607 = vmatpush.msrb.mxu2 %v1526_v56  ;;  %v1712_v56 = vld [vmem:[#allocation10 + $0x40] sm:$0xff] }
 0x338   :  { %v1361_v58 = vpop.f32.mrf.mxu1 }
 0x339   :  { %v1362_v61 = vadd.f32 %v3693_v28, %v1361_v58  ;;  %v1496_v28 = vld [vmem:[#allocation8 + $0x38] sm:$0xff]  ;;  %v1525_v58 = vld [vmem:[#allocation8 + $0x120] sm:$0xff] }
 0x33a   :  { %v1390_v62 = vpop.f32.mrf.mxu2  ;;  %1565 = vmatpush.msra.mxu3 %v1496_v28  ;;  %1608 = vmatpush.msrb.mxu2 %v1525_v58  ;;  %v1764_v28 = vld [vmem:[#allocation10 + $0x1e0] sm:$0xff] }
 0x33b   :  { %v1391_v2 = vadd.f32 %v1390_v62, %v1362_v61  ;;  %v1540_v61 = vld [vmem:[#allocation8 + $0x198] sm:$0xff]  ;;  %v1523_v62 = vld [vmem:[#allocation8 + $0x110] sm:$0xff]  ;;  %v1912_v58 = vld [vmem:[#allocation10 + $0x680] sm:$0xff] }
 0x33c   :  { %1566 = vmatpush.msra.mxu3 %v1495_v9  ;;  %1609 = vmatpush.msrb.mxu2 %v1524_v60  ;;  %v1926_v9 = vld [vmem:[#allocation10 + $0x6f0] sm:$0xff] }
 0x33d   :  { %v1396_v5 = vmax.f32 %v1391_v2, 0.0  ;;  %v1521_v2 = vld [vmem:[#allocation8 + $0x100] sm:$0xff]  ;;  %2086 = vmatpush.msrb.mxu0 %v1926_v9  ;;  %v1910_v60 = vld [vmem:[#allocation10 + $0x670] sm:$0xff] }
 0x33e   :  { %1567 = vmatpush.msra.mxu3 %v1494_v12  ;;  %1610 = vmatpush.msrb.mxu2 %v1523_v62  ;;  %v1786_v62 = vld [vmem:[#allocation10 + $0x290] sm:$0xff]  ;;  %v1784_v9 = vld [vmem:[#allocation10 + $0x280] sm:$0xff] }
 0x33f   :  { %1400 = vst.msk [vmem:[#allocation3 + $0x1e] sm:$0xff] %vm132_vm8, %v1396_v5  ;;  %v1766_v5 = vld [vmem:[#allocation10 + $0x1f0] sm:$0xff] }
 0x340   :  { %1568 = vmatpush.msra.mxu3 %v1493_v20  ;;  %1611 = vmatpush.msrb.mxu2 %v1522_v0  ;;  %v1908_v0 = vld [vmem:[#allocation10 + $0x660] sm:$0xff] }
 0x342   :  { %1569 = vmatpush.msra.mxu3 %v1492_v22  ;;  %1612 = vmatpush.msrb.mxu2 %v1521_v2 }
 0x344   :  { %1570 = vmatpush.msra.mxu3 %v1491_v23  ;;  %1986 = vmatpush.msra.mxu2 %v1766_v5  ;;  %v1758_v23 = vld [vmem:[#allocation10 + $0x1b0] sm:$0xff] }
 0x346   :  { %v1451_v15 = vld [vmem:[#allocation3 + $0x1b] ss:$4 sm:$0xf]  ;;  %v1447_v16 = vld [vmem:[#allocation3 + $0x19] ss:$4 sm:$0xf]  ;;  %1571 = vmatpush.msra.mxu3 %v1490_v25  ;;  %1987 = vmatpush.msra.mxu2 %v1764_v28 }
 0x347   :  { %v2685_v17 = vpack.i.bf16 %v1415_v11, %v1451_v15  ;;  %v2680_v18 = vpack.i.bf16 %v1411_v13, %v1447_v16  ;;  %v1439_v19 = vld [vmem:[#allocation3 + $0x15] ss:$4 sm:$0xf]  ;;  %v1443_v24 = vld [vmem:[#allocation3 + $0x17] ss:$4 sm:$0xf] }
 0x348   :  { %v2675_v21 = vpack.i.bf16 %v1403_v14, %v1439_v19  ;;  %v2690_v29 = vpack.i.bf16 %v1407_v26, %v1443_v24  ;;  %1572 = vmatpush.msra.mxu3 %v1489_v27  ;;  %v1437_v12 = vld [vmem:[#allocation3 + $0x14] ss:$4 sm:$0xf]  ;;  %v1762_v13 = vld [vmem:[#allocation10 + $0x1d0] sm:$0xff] }
 0x349   :  { %2686 = vrot.lane.b32.xlu1 %v2685_v17, %s2845_s23  ;;  %2681 = vrot.lane.b32.xlu0 %v2680_v18, %s2845_s23  ;;  %v1728_v14 = vld [vmem:[#allocation10 + $0xc0] sm:$0xff]  ;;  %v1401_v17 = vld [vmem:[#allocation3] ss:$4 sm:$0xf] }
 0x34a   :  { %2676 = vrot.lane.b32.xlu2 %v2675_v21, %s2845_s23  ;;  %1617 = vmatpush.msrb.mxu3 %v1552_v30  ;;  %v1924_v16 = vld [vmem:[#allocation10 + $0x6e0] sm:$0xff]  ;;  %v1726_v21 = vld [vmem:[#allocation10 + $0xb0] sm:$0xff] }
 0x34b   :  { %v1760_v19 = vld [vmem:[#allocation10 + $0x1c0] sm:$0xff]  ;;  %2087 = vmatpush.msrb.mxu0 %v1924_v16  ;;  %1988 = vmatpush.msra.mxu2 %v1762_v13  ;;  %v1922_v24 = vld [vmem:[#allocation10 + $0x6d0] sm:$0xff] }
 0x34c   :  { %1618 = vmatpush.msrb.mxu3 %v1551_v33  ;;  %1969 = vmatpush.msra.mxu1 %v1728_v14  ;;  %v1724_v25 = vld [vmem:[#allocation10 + $0xa0] sm:$0xff]  ;;  %v1409_v14 = vld [vmem:[#allocation3 + $0x4] ss:$4 sm:$0xf] }
 0x34d   :  { %1989 = vmatpush.msra.mxu2 %v1760_v19  ;;  %v1756_v27 = vld [vmem:[#allocation10 + $0x1a0] sm:$0xff]  ;;  %2088 = vmatpush.msrb.mxu0 %v1922_v24  ;;  %v1782_v16 = vld [vmem:[#allocation10 + $0x270] sm:$0xff] }
 0x34e   :  { %1619 = vmatpush.msrb.mxu3 %v1550_v36  ;;  %1970 = vmatpush.msra.mxu1 %v1726_v21  ;;  %v1441_v33 = vld [vmem:[#allocation3 + $0x16] ss:$4 sm:$0xf]  ;;  %v1413_v19 = vld [vmem:[#allocation3 + $0x6] ss:$4 sm:$0xf] }
 0x34f   :  { %1990 = vmatpush.msra.mxu2 %v1758_v23  ;;  %2089 = vmatpush.msrb.mxu0 %v1920_v32  ;;  %v1449_v4 = vld [vmem:[#allocation3 + $0x1a] ss:$4 sm:$0xf]  ;;  %v1826_v32 = vld [vmem:[#allocation10 + $0x3d0] sm:$0xff] }
 0x350   :  { %1620 = vmatpush.msrb.mxu3 %v1549_v39  ;;  %1971 = vmatpush.msra.mxu1 %v1724_v25  ;;  %v1736_v23 = vld [vmem:[#allocation10 + $0x100] sm:$0xff] }
 0x351   :  { %1991 = vmatpush.msra.mxu2 %v1756_v27  ;;  %v1862_v27 = vld [vmem:[#allocation10 + $0x4f0] sm:$0xff] }
 0x352   :  { %2691 = vrot.lane.b32.xlu2 %v2690_v29, %s2845_s23  ;;  %1621 = vmatpush.msrb.mxu3 %v1548_v42  ;;  %s2443_s23 = sshll.u32 %s2846_s21, 4  ;;  %s2444_s23 = int_to_ptr.vmem [resolvable:$true] %s2443_s23 }
 0x353   :  { %1972 = vmatpush.msra.mxu1 %v1722_v31  ;;  %1992 = vmatpush.msra.mxu2 %v1754_v34  ;;  %v1860_v31 = vld [vmem:[#allocation10 + $0x4e0] sm:$0xff] }
 0x354   :  { %1622 = vmatpush.msrb.mxu3 %v1547_v45  ;;  %v1918_v45 = vld [vmem:[#allocation10 + $0x6b0] sm:$0xff]  ;;  %v1824_v34 = vld [vmem:[#allocation10 + $0x3c0] sm:$0xff] }
 0x355   :  { %1973 = vmatpush.msra.mxu1 %v1720_v37  ;;  %2090 = vmatpush.msrb.mxu0 %v1918_v45  ;;  %v1854_v37 = vld [vmem:[#allocation10 + $0x4b0] sm:$0xff] }
 0x356   :  { %1623 = vmatpush.msrb.mxu3 %v1546_v48  ;;  %1993 = vmatpush.msra.mxu2 %v1752_v41  ;;  %v1716_v48 = vld [vmem:[#allocation10 + $0x60] sm:$0xff]  ;;  %v1850_v41 = vld [vmem:[#allocation10 + $0x490] sm:$0xff] }
 0x357   :  { %1974 = vmatpush.msra.mxu1 %v1718_v43  ;;  %v1848_v43 = vld [vmem:[#allocation10 + $0x480] sm:$0xff]  ;;  %v1846_v45 = vld [vmem:[#allocation10 + $0x470] sm:$0xff] }
 0x358   :  { %1624 = vmatpush.msrb.mxu3 %v1545_v51  ;;  %v1916_v51 = vld [vmem:[#allocation10 + $0x6a0] sm:$0xff]  ;;  %1994 = vmatpush.msra.mxu2 %v1750_v47 }
 0x359   :  { %2091 = vmatpush.msrb.mxu0 %v1916_v51  ;;  %1975 = vmatpush.msra.mxu1 %v1716_v48  ;;  %v1844_v47 = vld [vmem:[#allocation10 + $0x460] sm:$0xff]  ;;  %v1778_v48 = vld [vmem:[#allocation10 + $0x250] sm:$0xff] }
 0x35a   :  { %1625 = vmatpush.msrb.mxu3 %v1544_v53  ;;  %v1790_v53 = vld [vmem:[#allocation10 + $0x2b0] sm:$0xff]  ;;  %1995 = vmatpush.msra.mxu2 %v1748_v50 }
 0x35b   :  { %2092 = vmatpush.msrb.mxu0 %v1914_v54  ;;  %1976 = vmatpush.msra.mxu1 %v1714_v52  ;;  %v1842_v50 = vld [vmem:[#allocation10 + $0x450] sm:$0xff]  ;;  %v1776_v52 = vld [vmem:[#allocation10 + $0x240] sm:$0xff] }
 0x35c   :  { %1626 = vmatpush.msrb.mxu3 %v1543_v55  ;;  %v1746_v55 = vld [vmem:[#allocation10 + $0x150] sm:$0xff]  ;;  %v1840_v54 = vld [vmem:[#allocation10 + $0x440] sm:$0xff] }
 0x35d   :  { %1996 = vmatpush.msra.mxu2 %v1746_v55  ;;  %2093 = vmatpush.msrb.mxu0 %v1912_v58  ;;  %v1906_v51 = vld [vmem:[#allocation10 + $0x650] sm:$0xff]  ;;  %v1904_v55 = vld [vmem:[#allocation10 + $0x640] sm:$0xff] }
 0x35e   :  { %1627 = vmatpush.msrb.mxu3 %v1542_v57  ;;  %v1788_v57 = vld [vmem:[#allocation10 + $0x2a0] sm:$0xff]  ;;  %1977 = vmatpush.msra.mxu1 %v1712_v56  ;;  %v1774_v56 = vld [vmem:[#allocation10 + $0x230] sm:$0xff] }
 0x35f   :  { %2094 = vmatpush.msrb.mxu0 %v1910_v60  ;;  %v1838_v58 = vld [vmem:[#allocation10 + $0x430] sm:$0xff]  ;;  %v1772_v60 = vld [vmem:[#allocation10 + $0x220] sm:$0xff] }
 0x360   :  { %1628 = vmatpush.msrb.mxu3 %v1541_v59  ;;  %v1744_v59 = vld [vmem:[#allocation10 + $0x140] sm:$0xff] }
 0x361   :  { %1997 = vmatpush.msra.mxu2 %v1744_v59  ;;  %2095 = vmatpush.msrb.mxu0 %v1908_v0  ;;  %v1902_v59 = vld [vmem:[#allocation10 + $0x630] sm:$0xff] }
 0x362   :  { %1629 = vmatpush.msrb.mxu3 %v1540_v61  ;;  %v1710_v61 = vld [vmem:[#allocation10 + $0x30] sm:$0xff] }
 0x363   :  { %1978 = vmatpush.msra.mxu1 %v1710_v61  ;;  %2096 = vmatpush.msrb.mxu0 %v1906_v51  ;;  %v1804_v61 = vld [vmem:[#allocation10 + $0x320] sm:$0xff]  ;;  %v1770_v0 = vld [vmem:[#allocation10 + $0x210] sm:$0xff]  ;;  %v1783_v51 = vld [vmem:[#allocation10 + $0x278] sm:$0xff] }
 0x364   :  { %1630 = vmatpush.msrb.mxu3 %v1539_v63  ;;  %v1742_v63 = vld [vmem:[#allocation10 + $0x130] sm:$0xff] }
 0x365   :  { %1998 = vmatpush.msra.mxu2 %v1742_v63  ;;  %2097 = vmatpush.msrb.mxu0 %v1904_v55  ;;  %v1900_v63 = vld [vmem:[#allocation10 + $0x620] sm:$0xff]  ;;  %v1781_v55 = vld [vmem:[#allocation10 + $0x268] sm:$0xff] }
 0x366   :  { %1631 = vmatpush.msrb.mxu3 %v1538_v1 }
 0x367   :  { %1999 = vmatpush.msra.mxu2 %v1740_v8  ;;  %2098 = vmatpush.msrb.mxu0 %v1902_v59  ;;  %v1656_v8 = vld [vmem:[#allocation4 + $0x8] ss:$4 sm:$0x1] }
 0x368   :  { %1632 = vmatpush.msrb.mxu3 %v1537_v3  ;;  %v1708_v3 = vld [vmem:[#allocation10 + $0x20] sm:$0xff]  ;;  %v1779_v59 = vld [vmem:[#allocation10 + $0x258] sm:$0xff] }
 0x369   :  { %1979 = vmatpush.msra.mxu1 %v1708_v3  ;;  %v1898_v3 = vld [vmem:[#allocation10 + $0x610] sm:$0xff]  ;;  %2099 = vmatpush.msrb.mxu0 %v1900_v63  ;;  %v1668_v63 = vld [vmem:[#allocation4 + $0xe] ss:$4 sm:$0x1] }
 0x36b   :  { %2100 = vmatpush.msrb.mxu0 %v1898_v3  ;;  %v1870_v3 = vld [vmem:[#allocation10 + $0x530] sm:$0xff] }
 0x3a4   :  { %v2677_v7 = vpop.permute.xlu2 %2676 }
 0x3a5   :  { %v2679_v10 = vunpack.i.h.bf16 %v2677_v7  ;;  %v2678_v11 = vunpack.i.l.bf16 %v2677_v7 }
 0x3a7   :  { %v1468_v15 = vsel %vm132_vm8, %v1437_v12, %v2678_v11  ;;  %v1432_v20 = vsel %vm132_vm8, %v1401_v17, %v2679_v10  ;;  %v1445_v10 = vld [vmem:[#allocation3 + $0x18] ss:$4 sm:$0xf]  ;;  %v1706_v11 = vld [vmem:[#allocation10 + $0x10] sm:$0xff] }
 0x3a8   :  { %v1476_v18 = vrot.slane %v1468_v15, 4  ;;  %v1738_v15 = vld [vmem:[#allocation10 + $0x110] sm:$0xff]  ;;  %1980 = vmatpush.msra.mxu1 %v1706_v11  ;;  %v1658_v11 = vld [vmem:[#allocation4 + $0x9] ss:$4 sm:$0x1] }
 0x3a9   :  { %2000 = vmatpush.msra.mxu2 %v1738_v15 }
 0x3aa   :  { %v1485_v22 = vsel %vm1484_vm10, %v1432_v20, %v1476_v18 }
 0x3ab   :  { %1573 = vmatmul.f32.vlgmr.msra.gmra.mxu3 %v1485_v22  ;;  %v1704_v22 = vld [vmem:[#allocation10] sm:$0xff]  ;;  %2001 = vmatpush.msra.mxu2 %v1736_v23  ;;  %v1890_v23 = vld [vmem:[#allocation10 + $0x5d0] sm:$0xff] }
 0x3ac   :  { %v2692_v26 = vpop.permute.xlu2 %2691  ;;  %2006 = vmatpush.msra.mxu3 %v1798_v35  ;;  %1981 = vmatpush.msra.mxu1 %v1704_v22  ;;  %v1856_v35 = vld [vmem:[#allocation10 + $0x4c0] sm:$0xff]  ;;  %v1797_v22 = vld [vmem:[#allocation10 + $0x2e8] sm:$0xff] }
 0x3ad   :  { %v2694_v29 = vunpack.i.h.bf16 %v2692_v26  ;;  %v2693_v30 = vunpack.i.l.bf16 %v2692_v26  ;;  %v1830_v26 = vld [vmem:[#allocation10 + $0x3f0] sm:$0xff] }
 0x3ae   :  { %2007 = vmatpush.msra.mxu3 %v1796_v38  ;;  %v1820_v38 = vld [vmem:[#allocation10 + $0x3a0] sm:$0xff] }
 0x3af   :  { %v1469_v36 = vsel %vm132_vm8, %v1441_v33, %v2693_v30  ;;  %v1433_v42 = vsel %vm132_vm8, %v1405_v40, %v2694_v29  ;;  %v1780_v29 = vld [vmem:[#allocation10 + $0x260] sm:$0xff]  ;;  %v1858_v33 = vld [vmem:[#allocation10 + $0x4d0] sm:$0xff] }
 0x3b0   :  { %v1477_v39 = vrot.slane %v1469_v36, 4  ;;  %2008 = vmatpush.msra.mxu3 %v1794_v44  ;;  %v1828_v30 = vld [vmem:[#allocation10 + $0x3e0] sm:$0xff]  ;;  %v1822_v36 = vld [vmem:[#allocation10 + $0x3b0] sm:$0xff] }
 0x3b1   :  { %v1818_v40 = vld [vmem:[#allocation10 + $0x390] sm:$0xff] }
 0x3b2   :  { %v1486_v46 = vsel %vm1484_vm10, %v1433_v42, %v1477_v39  ;;  %2009 = vmatpush.msra.mxu3 %v1792_v49  ;;  %v1852_v39 = vld [vmem:[#allocation10 + $0x4a0] sm:$0xff]  ;;  %v1814_v44 = vld [vmem:[#allocation10 + $0x370] sm:$0xff] }
 0x3b3   :  { %1593 = vmatmul.f32.vlgmr.msrb.gmra.mxu1 %v1486_v46  ;;  %v1816_v42 = vld [vmem:[#allocation10 + $0x380] sm:$0xff]  ;;  %v1810_v49 = vld [vmem:[#allocation10 + $0x350] sm:$0xff] }
 0x3b4   :  { %2010 = vmatpush.msra.mxu3 %v1790_v53  ;;  %2026 = vmatpush.msrb.mxu1 %v1830_v26  ;;  %v1812_v46 = vld [vmem:[#allocation10 + $0x360] sm:$0xff]  ;;  %v1795_v26 = vld [vmem:[#allocation10 + $0x2d8] sm:$0xff] }
 0x3b5   :  { %v1808_v53 = vld [vmem:[#allocation10 + $0x340] sm:$0xff] }
 0x3b6   :  { %2011 = vmatpush.msra.mxu3 %v1788_v57  ;;  %2027 = vmatpush.msrb.mxu1 %v1828_v30  ;;  %v1806_v57 = vld [vmem:[#allocation10 + $0x330] sm:$0xff]  ;;  %v1729_v30 = vld [vmem:[#allocation10 + $0xc8] sm:$0xff] }
 0x3b8   :  { %2012 = vmatpush.msra.mxu3 %v1786_v62  ;;  %2028 = vmatpush.msrb.mxu1 %v1826_v32  ;;  %v1836_v62 = vld [vmem:[#allocation10 + $0x420] sm:$0xff]  ;;  %v1886_v32 = vld [vmem:[#allocation10 + $0x5b0] sm:$0xff] }
 0x3ba   :  { %2013 = vmatpush.msra.mxu3 %v1784_v9  ;;  %2029 = vmatpush.msrb.mxu1 %v1824_v34  ;;  %v1642_v9 = vld [vmem:[#allocation4 + $0x1] ss:$4 sm:$0x1]  ;;  %v1727_v34 = vld [vmem:[#allocation10 + $0xb8] sm:$0xff] }
 0x3bb   :  { %v2687_v1 = vpop.permute.xlu1 %2686  ;;  %v2682_v2 = vpop.permute.xlu0 %2681 }
 0x3bc   :  { %v2689_v5 = vunpack.i.h.bf16 %v2687_v1  ;;  %v2688_v6 = vunpack.i.l.bf16 %v2687_v1  ;;  %v2684_v7 = vunpack.i.h.bf16 %v2682_v2  ;;  %v2683_v28 = vunpack.i.l.bf16 %v2682_v2  ;;  %2014 = vmatpush.msra.mxu3 %v1782_v16  ;;  %2030 = vmatpush.msrb.mxu1 %v1822_v36  ;;  %v1802_v1 = vld [vmem:[#allocation10 + $0x310] sm:$0xff]  ;;  %v1735_v16 = vld [vmem:[#allocation10 + $0xf8] sm:$0xff]  ;;  %v1884_v36 = vld [vmem:[#allocation10 + $0x5a0] sm:$0xff] }
 0x3bd   :  { %v1834_v2 = vld [vmem:[#allocation10 + $0x410] sm:$0xff] }
 0x3be   :  { %v1471_v12 = vsel %vm132_vm8, %v1449_v4, %v2688_v6  ;;  %v1470_v13 = vsel %vm132_vm8, %v1445_v10, %v2683_v28  ;;  %v1434_v20 = vsel %vm132_vm8, %v1409_v14, %v2684_v7  ;;  %v1435_v21 = vsel %vm132_vm8, %v1413_v19, %v2689_v5  ;;  %2015 = vmatpush.msra.mxu3 %v1780_v29  ;;  %v1768_v4 = vld [vmem:[#allocation10 + $0x200] sm:$0xff]  ;;  %v1640_v28 = vld [vmem:[#allocation4] ss:$4 sm:$0x1] }
 0x3bf   :  { %v1479_v17 = vrot.slane %v1471_v12, 4  ;;  %v1478_v18 = vrot.slane %v1470_v13, 4  ;;  %2031 = vmatpush.msrb.mxu1 %v1820_v38  ;;  %v1800_v5 = vld [vmem:[#allocation10 + $0x300] sm:$0xff]  ;;  %v1679_v10 = vrot.slane %v1656_v8, 7  ;;  %v1894_v12 = vld [vmem:[#allocation10 + $0x5f0] sm:$0xff]  ;;  %v1680_v13 = vrot.slane %v1658_v11, 7 }
 0x3c0   :  { %2016 = vmatpush.msra.mxu3 %v1778_v48  ;;  %v1832_v6 = vld [vmem:[#allocation10 + $0x400] sm:$0xff]  ;;  %v1958_v14 = vld [vmem:[#allocation10 + $0x7f0] sm:$0xff]  ;;  %v1725_v38 = vld [vmem:[#allocation10 + $0xa8] sm:$0xff] }
 0x3c1   :  { %v1487_v24 = vsel %vm1484_vm10, %v1434_v20, %v1478_v18  ;;  %v1488_v25 = vsel %vm1484_vm10, %v1435_v21, %v1479_v17  ;;  %2032 = vmatpush.msrb.mxu1 %v1818_v40  ;;  %v1896_v7 = vld [vmem:[#allocation10 + $0x600] sm:$0xff]  ;;  %v3732_v15 = vsel %vm1695_vm11, %v1640_v28, %v1679_v10  ;;  %v1799_v17 = vld [vmem:[#allocation10 + $0x2f8] sm:$0xff]  ;;  %v3736_v18 = vsel %vm1695_vm11, %v1642_v9, %v1680_v13  ;;  %v1733_v21 = vld [vmem:[#allocation10 + $0xe8] sm:$0xff] }
 0x3c2   :  { %1613 = vmatmul.f32.vlgmr.msrb.gmra.mxu2 %v1487_v24  ;;  %1633 = vmatmul.f32.vlgmr.msrb.gmra.mxu3 %v1488_v25  ;;  %v1892_v19 = vld [vmem:[#allocation10 + $0x5e0] sm:$0xff]  ;;  %v1954_v24 = vld [vmem:[#allocation10 + $0x7d0] sm:$0xff]  ;;  %v1731_v25 = vld [vmem:[#allocation10 + $0xd8] sm:$0xff] }
 0x3c3   :  { %2046 = vmatpush.msrb.mxu2 %v1862_v27  ;;  %2033 = vmatpush.msrb.mxu1 %v1816_v42  ;;  %v1956_v20 = vld [vmem:[#allocation10 + $0x7e0] sm:$0xff]  ;;  %v1882_v40 = vld [vmem:[#allocation10 + $0x590] sm:$0xff]  ;;  %v1723_v42 = vld [vmem:[#allocation10 + $0x98] sm:$0xff] }
 0x3c4   :  { %2017 = vmatpush.msra.mxu3 %v1776_v52  ;;  %2101 = vmatpush.msrb.mxu0 %v1896_v7  ;;  %v1888_v27 = vld [vmem:[#allocation10 + $0x5c0] sm:$0xff]  ;;  %v1878_v48 = vld [vmem:[#allocation10 + $0x570] sm:$0xff]  ;;  %v1775_v7 = vld [vmem:[#allocation10 + $0x238] sm:$0xff] }
 0x3c5   :  { %2047 = vmatpush.msrb.mxu2 %v1860_v31  ;;  %2034 = vmatpush.msrb.mxu1 %v1814_v44  ;;  %v1952_v29 = vld [vmem:[#allocation10 + $0x7c0] sm:$0xff]  ;;  %v1793_v31 = vld [vmem:[#allocation10 + $0x2c8] sm:$0xff]  ;;  %v1866_v11 = vld [vmem:[#allocation10 + $0x510] sm:$0xff] }
 0x3c6   :  { %2018 = vmatpush.msra.mxu3 %v1774_v56  ;;  %1982 = vmatmul.f32.vlgmr.msra.gmra.mxu1 %v3732_v15  ;;  %v1880_v44 = vld [vmem:[#allocation10 + $0x580] sm:$0xff]  ;;  %v1874_v56 = vld [vmem:[#allocation10 + $0x550] sm:$0xff]  ;;  %v1709_v9 = vld [vmem:[#allocation10 + $0x28] sm:$0xff] }
 0x3c7   :  { %2048 = vmatpush.msrb.mxu2 %v1858_v33  ;;  %2035 = vmatpush.msrb.mxu1 %v1812_v46  ;;  %v1950_v33 = vld [vmem:[#allocation10 + $0x7b0] sm:$0xff]  ;;  %v1721_v46 = vld [vmem:[#allocation10 + $0x88] sm:$0xff]  ;;  %v1876_v52 = vld [vmem:[#allocation10 + $0x560] sm:$0xff] }
 0x3c8   :  { %2019 = vmatpush.msra.mxu3 %v1772_v60  ;;  %2166 = vmatpush.msra.mxu0 %v1799_v17  ;;  %v1872_v60 = vld [vmem:[#allocation10 + $0x540] sm:$0xff]  ;;  %v1773_v10 = vld [vmem:[#allocation10 + $0x228] sm:$0xff]  ;;  %v1707_v13 = vld [vmem:[#allocation10 + $0x18] sm:$0xff] }
 0x3c9   :  { %2049 = vmatpush.msrb.mxu2 %v1856_v35  ;;  %2036 = vmatpush.msrb.mxu1 %v1810_v49  ;;  %v1791_v35 = vld [vmem:[#allocation10 + $0x2b8] sm:$0xff]  ;;  %v1942_v49 = vld [vmem:[#allocation10 + $0x770] sm:$0xff]  ;;  %v1868_v28 = vld [vmem:[#allocation10 + $0x520] sm:$0xff] }
 0x3ca   :  { %2020 = vmatpush.msra.mxu3 %v1770_v0  ;;  %2002 = vmatmul.f32.vlgmr.msra.gmra.mxu2 %v3736_v18  ;;  %v1713_v0 = vld [vmem:[#allocation10 + $0x48] sm:$0xff]  ;;  %v1932_v8 = vld [vmem:[#allocation10 + $0x720] sm:$0xff] }
 0x3cb   :  { %2050 = vmatpush.msrb.mxu2 %v1854_v37  ;;  %2037 = vmatpush.msrb.mxu1 %v1808_v53  ;;  %v1948_v37 = vld [vmem:[#allocation10 + $0x7a0] sm:$0xff] }
 0x3cc   :  { %2021 = vmatpush.msra.mxu3 %v1768_v4  ;;  %2167 = vmatpush.msra.mxu0 %v1797_v22  ;;  %v1940_v53 = vld [vmem:[#allocation10 + $0x760] sm:$0xff] }
 0x3cd   :  { %2051 = vmatpush.msrb.mxu2 %v1852_v39  ;;  %2038 = vmatpush.msrb.mxu1 %v1806_v57  ;;  %v1789_v39 = vld [vmem:[#allocation10 + $0x2a8] sm:$0xff]  ;;  %v1938_v57 = vld [vmem:[#allocation10 + $0x750] sm:$0xff]  ;;  %v1928_v17 = vld [vmem:[#allocation10 + $0x700] sm:$0xff] }
 0x3ce   :  { %2066 = vmatpush.msrb.mxu3 %v1894_v12  ;;  %2168 = vmatpush.msra.mxu0 %v1795_v26  ;;  %v1930_v12 = vld [vmem:[#allocation10 + $0x710] sm:$0xff] }
 0x3cf   :  { %2052 = vmatpush.msrb.mxu2 %v1850_v41  ;;  %2039 = vmatpush.msrb.mxu1 %v1804_v61  ;;  %v1946_v41 = vld [vmem:[#allocation10 + $0x790] sm:$0xff]  ;;  %v1936_v61 = vld [vmem:[#allocation10 + $0x740] sm:$0xff] }
 0x3d0   :  { %2067 = vmatpush.msrb.mxu3 %v1892_v19  ;;  %2169 = vmatpush.msra.mxu0 %v1793_v31  ;;  %v1705_v19 = vld [vmem:[#allocation10 + $0x8] sm:$0xff] }
 0x3d1   :  { %2053 = vmatpush.msrb.mxu2 %v1848_v43  ;;  %2040 = vmatpush.msrb.mxu1 %v1802_v1  ;;  %v1787_v43 = vld [vmem:[#allocation10 + $0x298] sm:$0xff]  ;;  %v1777_v1 = vld [vmem:[#allocation10 + $0x248] sm:$0xff] }
 0x3d2   :  { %2068 = vmatpush.msrb.mxu3 %v1890_v23  ;;  %2170 = vmatpush.msra.mxu0 %v1791_v35 }
 0x3d3   :  { %2054 = vmatpush.msrb.mxu2 %v1846_v45  ;;  %2041 = vmatpush.msrb.mxu1 %v1800_v5  ;;  %v1944_v45 = vld [vmem:[#allocation10 + $0x780] sm:$0xff]  ;;  %v1934_v5 = vld [vmem:[#allocation10 + $0x730] sm:$0xff] }
 0x3d4   :  { %2069 = vmatpush.msrb.mxu3 %v1888_v27  ;;  %2171 = vmatpush.msra.mxu0 %v1789_v39 }
 0x3d5   :  { %2055 = vmatpush.msrb.mxu2 %v1844_v47  ;;  %2106 = vmatpush.msra.mxu1 %v1958_v14  ;;  %v1785_v47 = vld [vmem:[#allocation10 + $0x288] sm:$0xff]  ;;  %v1771_v14 = vld [vmem:[#allocation10 + $0x218] sm:$0xff] }
 0x3d6   :  { %2070 = vmatpush.msrb.mxu3 %v1886_v32  ;;  %2172 = vmatpush.msra.mxu0 %v1787_v43  ;;  %v1831_v43 = vld [vmem:[#allocation10 + $0x3f8] sm:$0xff] }
 0x3d7   :  { %2056 = vmatpush.msrb.mxu2 %v1842_v50  ;;  %2107 = vmatpush.msra.mxu1 %v1956_v20  ;;  %v1719_v50 = vld [vmem:[#allocation10 + $0x78] sm:$0xff]  ;;  %v1769_v20 = vld [vmem:[#allocation10 + $0x208] sm:$0xff] }
 0x3d8   :  { %2071 = vmatpush.msrb.mxu3 %v1884_v36  ;;  %2173 = vmatpush.msra.mxu0 %v1785_v47 }
 0x3d9   :  { %2057 = vmatpush.msrb.mxu2 %v1840_v54  ;;  %2108 = vmatpush.msra.mxu1 %v1954_v24  ;;  %v1717_v54 = vld [vmem:[#allocation10 + $0x68] sm:$0xff] }
 0x3da   :  { %2072 = vmatpush.msrb.mxu3 %v1882_v40  ;;  %2174 = vmatpush.msra.mxu0 %v1783_v51  ;;  %v1763_v51 = vld [vmem:[#allocation10 + $0x1d8] sm:$0xff] }
 0x3db   :  { %2058 = vmatpush.msrb.mxu2 %v1838_v58  ;;  %2109 = vmatpush.msra.mxu1 %v1952_v29  ;;  %v1715_v58 = vld [vmem:[#allocation10 + $0x58] sm:$0xff] }
 0x3dc   :  { %2073 = vmatpush.msrb.mxu3 %v1880_v44  ;;  %2175 = vmatpush.msra.mxu0 %v1781_v55  ;;  %v1863_v44 = vld [vmem:[#allocation10 + $0x4f8] sm:$0xff]  ;;  %v1761_v55 = vld [vmem:[#allocation10 + $0x1c8] sm:$0xff] }
 0x3dd   :  { %2059 = vmatpush.msrb.mxu2 %v1836_v62  ;;  %2110 = vmatpush.msra.mxu1 %v1950_v33  ;;  %v1652_v62 = vld [vmem:[#allocation4 + $0x6] ss:$4 sm:$0x1] }
 0x3de   :  { %2074 = vmatpush.msrb.mxu3 %v1878_v48  ;;  %2176 = vmatpush.msra.mxu0 %v1779_v59  ;;  %v1759_v59 = vld [vmem:[#allocation10 + $0x1b8] sm:$0xff] }
 0x3df   :  { %2060 = vmatpush.msrb.mxu2 %v1834_v2  ;;  %2111 = vmatpush.msra.mxu1 %v1948_v37  ;;  %v1685_v2 = vrot.slane %v1668_v63, 7  ;;  %v1767_v37 = vld [vmem:[#allocation10 + $0x1f8] sm:$0xff]  ;;  %v1757_v63 = vld [vmem:[#allocation10 + $0x1a8] sm:$0xff] }
 0x3e0   :  { %2075 = vmatpush.msrb.mxu3 %v1876_v52  ;;  %2177 = vmatpush.msra.mxu0 %v1777_v1  ;;  %v1827_v52 = vld [vmem:[#allocation10 + $0x3d8] sm:$0xff] }
 0x3e1   :  { %2061 = vmatpush.msrb.mxu2 %v1832_v6  ;;  %2112 = vmatpush.msra.mxu1 %v1946_v41  ;;  %v3740_v4 = vsel %vm1695_vm11, %v1652_v62, %v1685_v2  ;;  %v1711_v6 = vld [vmem:[#allocation10 + $0x38] sm:$0xff]  ;;  %v1853_v2 = vld [vmem:[#allocation10 + $0x4a8] sm:$0xff] }
 0x3e2   :  { %2076 = vmatpush.msrb.mxu3 %v1874_v56  ;;  %2102 = vmatmul.f32.vlgmr.msrb.gmra.mxu0 %v3740_v4  ;;  %v1825_v56 = vld [vmem:[#allocation10 + $0x3c8] sm:$0xff]  ;;  %v1855_v62 = vld [vmem:[#allocation10 + $0x4b8] sm:$0xff] }
 0x3e3   :  { %2126 = vmatpush.msra.mxu2 %v1735_v16  ;;  %2113 = vmatpush.msra.mxu1 %v1944_v45  ;;  %v1864_v16 = vld [vmem:[#allocation10 + $0x500] sm:$0xff]  ;;  %v1765_v45 = vld [vmem:[#allocation10 + $0x1e8] sm:$0xff]  ;;  %v1670_v1 = vld [vmem:[#allocation4 + $0xf] ss:$4 sm:$0x1] }
 0x3e4   :  { %2077 = vmatpush.msrb.mxu3 %v1872_v60  ;;  %2178 = vmatpush.msra.mxu0 %v1775_v7  ;;  %v1851_v7 = vld [vmem:[#allocation10 + $0x498] sm:$0xff] }
 0x3e5   :  { %2127 = vmatpush.msra.mxu2 %v1733_v21  ;;  %2114 = vmatpush.msra.mxu1 %v1942_v49  ;;  %v2697_v21 = vld [vmem:[%s3913_s6] ss:$0 sm:$0xff]  ;;  %v1829_v49 = vld [vmem:[#allocation10 + $0x3e8] sm:$0xff] }
 0x3e6   :  { %2078 = vmatpush.msrb.mxu3 %v1870_v3  ;;  %2179 = vmatpush.msra.mxu0 %v1773_v10  ;;  %v1755_v3 = vld [vmem:[#allocation10 + $0x198] sm:$0xff]  ;;  %v1817_v10 = vld [vmem:[#allocation10 + $0x388] sm:$0xff] }
 0x3e7   :  { %2128 = vmatpush.msra.mxu2 %v1731_v25  ;;  %2115 = vmatpush.msra.mxu1 %v1940_v53 }
 0x3e8   :  { %2079 = vmatpush.msrb.mxu3 %v1868_v28  ;;  %2180 = vmatpush.msra.mxu0 %v1771_v14  ;;  %v1753_v28 = vld [vmem:[#allocation10 + $0x188] sm:$0xff]  ;;  %v1923_v14 = vld [vmem:[#allocation10 + $0x6d8] sm:$0xff] }
 0x3e9   :  { %2129 = vmatpush.msra.mxu2 %v1729_v30  ;;  %2116 = vmatpush.msra.mxu1 %v1938_v57  ;;  %v1857_v57 = vld [vmem:[#allocation10 + $0x4c8] sm:$0xff] }
 0x3ea   :  { %2080 = vmatpush.msrb.mxu3 %v1866_v11  ;;  %2181 = vmatpush.msra.mxu0 %v1769_v20  ;;  %v1654_v11 = vld [vmem:[#allocation4 + $0x7] ss:$4 sm:$0x1]  ;;  %v1749_v20 = vld [vmem:[#allocation10 + $0x168] sm:$0xff] }
 0x3eb   :  { %2130 = vmatpush.msra.mxu2 %v1727_v34  ;;  %2117 = vmatpush.msra.mxu1 %v1936_v61  ;;  %v1823_v61 = vld [vmem:[#allocation10 + $0x3b8] sm:$0xff] }
 0x3ec   :  { %2081 = vmatpush.msrb.mxu3 %v1864_v16  ;;  %v1847_v16 = vld [vmem:[#allocation10 + $0x478] sm:$0xff] }
 0x3ed   :  { %2131 = vmatpush.msra.mxu2 %v1725_v38  ;;  %2118 = vmatpush.msra.mxu1 %v1934_v5  ;;  %v1927_v5 = vld [vmem:[#allocation10 + $0x6f8] sm:$0xff] }
 0x3ee   :  { %2246 = vmatpush.msrb.mxu0 %v1927_v5  ;;  %v1881_v5 = vld [vmem:[#allocation10 + $0x588] sm:$0xff] }
 0x3ef   :  { %2132 = vmatpush.msra.mxu2 %v1723_v42  ;;  %2119 = vmatpush.msra.mxu1 %v1932_v8  ;;  %v1686_v8 = vrot.slane %v1670_v1, 7  ;;  %v1897_v1 = vld [vmem:[#allocation10 + $0x608] sm:$0xff] }
 0x3f1   :  { %2133 = vmatpush.msra.mxu2 %v1721_v46  ;;  %2120 = vmatpush.msra.mxu1 %v1930_v12  ;;  %v1849_v12 = vld [vmem:[#allocation10 + $0x488] sm:$0xff] }
 0x3f3   :  { %2134 = vmatpush.msra.mxu2 %v1719_v50  ;;  %2121 = vmatpush.msra.mxu1 %v1928_v17  ;;  %v1861_v50 = vld [vmem:[#allocation10 + $0x4e8] sm:$0xff]  ;;  %v3761_v17 = vsel %vm1695_vm11, %v1654_v11, %v1686_v8  ;;  %v1939_v11 = vld [vmem:[#allocation10 + $0x758] sm:$0xff] }
 0x3f4   :  { %v1877_v8 = vld [vmem:[#allocation10 + $0x568] sm:$0xff] }
 0x3f5   :  { %2135 = vmatpush.msra.mxu2 %v1717_v54  ;;  %v1859_v54 = vld [vmem:[#allocation10 + $0x4d8] sm:$0xff] }
 0x3f7   :  { %2136 = vmatpush.msra.mxu2 %v1715_v58 }
 0x3f9   :  { %2137 = vmatpush.msra.mxu2 %v1713_v0  ;;  %v1821_v0 = vld [vmem:[#allocation10 + $0x3a8] sm:$0xff] }
 0x3fb   :  { %2138 = vmatpush.msra.mxu2 %v1711_v6  ;;  %v1819_v6 = vld [vmem:[#allocation10 + $0x398] sm:$0xff] }
 0x3fd   :  { %2139 = vmatpush.msra.mxu2 %v1709_v9  ;;  %v1925_v9 = vld [vmem:[#allocation10 + $0x6e8] sm:$0xff] }
 0x3fe   :  { %2247 = vmatpush.msrb.mxu0 %v1925_v9  ;;  %v1941_v9 = vld [vmem:[#allocation10 + $0x768] sm:$0xff] }
 0x3ff   :  { %2140 = vmatpush.msra.mxu2 %v1707_v13  ;;  %v1751_v13 = vld [vmem:[#allocation10 + $0x178] sm:$0xff] }
 0x400   :  { %2248 = vmatpush.msrb.mxu0 %v1923_v14  ;;  %v1871_v14 = vld [vmem:[#allocation10 + $0x538] sm:$0xff] }
 0x401   :  { %2141 = vmatpush.msra.mxu2 %v1705_v19  ;;  %v1921_v19 = vld [vmem:[#allocation10 + $0x6c8] sm:$0xff] }
 0x402   :  { %2249 = vmatpush.msrb.mxu0 %v1921_v19  ;;  %v2303_v19 = vld [vmem:[%s3916_s9 + $0x78] sm:$0xff] }
 0x42e   :  { %v1574_v22 = vpop.f32.mrf.mxu3 }
 0x42f   :  { %v1575_v23 = vadd.f32 %v2697_v21, %v1574_v22  ;;  %v1813_v21 = vld [vmem:[#allocation10 + $0x368] sm:$0xff] }
 0x430   :  { %v1594_v24 = vpop.f32.mrf.mxu1  ;;  %v1845_v22 = vld [vmem:[#allocation10 + $0x468] sm:$0xff] }
 0x431   :  { %v1595_v25 = vadd.f32 %v1594_v24, %v1575_v23  ;;  %v1919_v23 = vld [vmem:[#allocation10 + $0x6b8] sm:$0xff] }
 0x432   :  { %v1747_v24 = vld [vmem:[#allocation10 + $0x158] sm:$0xff]  ;;  %2250 = vmatpush.msrb.mxu0 %v1919_v23  ;;  %v2301_v23 = vld [vmem:[%s3916_s9 + $0x68] sm:$0xff] }
 0x445   :  { %v1614_v26 = vpop.f32.mrf.mxu2  ;;  %v1634_v29 = vpop.f32.mrf.mxu3 }
 0x446   :  { %v1615_v27 = vadd.f32 %v1614_v26, %v1595_v25  ;;  %v1811_v25 = vld [vmem:[#allocation10 + $0x358] sm:$0xff] }
 0x447   :  { %v1843_v26 = vld [vmem:[#allocation10 + $0x458] sm:$0xff] }
 0x448   :  { %v1635_v30 = vadd.f32 %v1634_v29, %v1615_v27  ;;  %v1917_v27 = vld [vmem:[#allocation10 + $0x6a8] sm:$0xff] }
 0x449   :  { %v1745_v29 = vld [vmem:[#allocation10 + $0x148] sm:$0xff]  ;;  %2251 = vmatpush.msrb.mxu0 %v1917_v27  ;;  %v2299_v27 = vld [vmem:[%s3916_s9 + $0x58] sm:$0xff] }
 0x44a   :  { %v1637_v31 = vmax.f32 %v1635_v30, 0.0  ;;  %v1809_v30 = vld [vmem:[#allocation10 + $0x348] sm:$0xff] }
 0x44c   :  { %1638 = vst [vmem:[#allocation4 + $0x2] sm:$0xf] %v1637_v31 }
 0x44d   :  { %1639 = vst [vmem:[#allocation4 + $0x6] sm:$0xf0] %v1637_v31  ;;  %v1841_v31 = vld [vmem:[#allocation10 + $0x448] sm:$0xff] }
 0x453   :  { %v1644_v34 = vld [vmem:[#allocation4 + $0x2] ss:$4 sm:$0x1]  ;;  %v1646_v38 = vld [vmem:[#allocation4 + $0x3] ss:$4 sm:$0x1] }
 0x454   :  { %v1660_v32 = vld [vmem:[#allocation4 + $0xa] ss:$4 sm:$0x1]  ;;  %v1662_v33 = vld [vmem:[#allocation4 + $0xb] ss:$4 sm:$0x1] }
 0x455   :  { %v1681_v35 = vrot.slane %v1660_v32, 7  ;;  %v1682_v36 = vrot.slane %v1662_v33, 7  ;;  %v1664_v39 = vld [vmem:[#allocation4 + $0xc] ss:$4 sm:$0x1] }
 0x456   :  { %v1683_v42 = vrot.slane %v1664_v39, 7  ;;  %v1648_v46 = vld [vmem:[#allocation4 + $0x4] ss:$4 sm:$0x1]  ;;  %v1915_v32 = vld [vmem:[#allocation10 + $0x698] sm:$0xff]  ;;  %v1837_v39 = vld [vmem:[#allocation10 + $0x428] sm:$0xff] }
 0x457   :  { %v1698_v40 = vsel %vm1695_vm11, %v1644_v34, %v1681_v35  ;;  %v3748_v41 = vsel %vm1695_vm11, %v1646_v38, %v1682_v36  ;;  %v1666_v47 = vld [vmem:[#allocation4 + $0xd] ss:$4 sm:$0x1]  ;;  %v1650_v58 = vld [vmem:[#allocation4 + $0x5] ss:$4 sm:$0x1]  ;;  %2252 = vmatpush.msrb.mxu0 %v1915_v32 }
 0x458   :  { %2022 = vmatmul.f32.vlgmr.msra.gmra.mxu3 %v1698_v40  ;;  %2042 = vmatmul.f32.vlgmr.msrb.gmra.mxu1 %v3748_v41  ;;  %v3752_v48 = vsel %vm1695_vm11, %v1648_v46, %v1683_v42  ;;  %v1684_v53 = vrot.slane %v1666_v47, 7  ;;  %v1743_v33 = vld [vmem:[#allocation10 + $0x138] sm:$0xff]  ;;  %v1913_v36 = vld [vmem:[#allocation10 + $0x688] sm:$0xff] }
 0x459   :  { %2146 = vmatpush.msra.mxu3 %v1767_v37  ;;  %2182 = vmatmul.f32.vlgmr.msra.gmra.mxu0 %v1698_v40  ;;  %v1807_v34 = vld [vmem:[#allocation10 + $0x338] sm:$0xff]  ;;  %v1741_v37 = vld [vmem:[#allocation10 + $0x128] sm:$0xff] }
 0x45a   :  { %2062 = vmatmul.f32.vlgmr.msrb.gmra.mxu2 %v3752_v48  ;;  %2186 = vmatpush.msrb.mxu1 %v1831_v43  ;;  %v3756_v60 = vsel %vm1695_vm11, %v1650_v58, %v1684_v53  ;;  %v1839_v35 = vld [vmem:[#allocation10 + $0x438] sm:$0xff]  ;;  %v1805_v38 = vld [vmem:[#allocation10 + $0x328] sm:$0xff] }
 0x45b   :  { %2206 = vmatpush.msrb.mxu2 %v1863_v44  ;;  %2147 = vmatpush.msra.mxu3 %v1765_v45  ;;  %v1911_v40 = vld [vmem:[#allocation10 + $0x678] sm:$0xff]  ;;  %v1909_v45 = vld [vmem:[#allocation10 + $0x668] sm:$0xff] }
 0x45c   :  { %2187 = vmatpush.msrb.mxu1 %v1829_v49  ;;  %v1739_v42 = vld [vmem:[#allocation10 + $0x118] sm:$0xff]  ;;  %2253 = vmatpush.msrb.mxu0 %v1913_v36  ;;  %v1737_v46 = vld [vmem:[#allocation10 + $0x108] sm:$0xff] }
 0x45d   :  { %2207 = vmatpush.msrb.mxu2 %v1861_v50  ;;  %2148 = vmatpush.msra.mxu3 %v1763_v51  ;;  %v1803_v43 = vld [vmem:[#allocation10 + $0x318] sm:$0xff]  ;;  %v1801_v47 = vld [vmem:[#allocation10 + $0x308] sm:$0xff] }
 0x45e   :  { %2188 = vmatpush.msrb.mxu1 %v1827_v52  ;;  %v1835_v44 = vld [vmem:[#allocation10 + $0x418] sm:$0xff]  ;;  %2254 = vmatpush.msrb.mxu0 %v1911_v40  ;;  %v1833_v49 = vld [vmem:[#allocation10 + $0x408] sm:$0xff]  ;;  %v1983_v40 = vpop.f32.mrf.mxu1 }
 0x45f   :  { %2208 = vmatpush.msrb.mxu2 %v1859_v54  ;;  %2149 = vmatpush.msra.mxu3 %v1761_v55  ;;  %v1895_v50 = vld [vmem:[#allocation10 + $0x5f8] sm:$0xff]  ;;  %v1893_v53 = vld [vmem:[#allocation10 + $0x5e8] sm:$0xff] }
 0x460   :  { %2189 = vmatpush.msrb.mxu1 %v1825_v56  ;;  %2082 = vmatmul.f32.vlgmr.msrb.gmra.mxu3 %v3756_v60  ;;  %v1959_v51 = vld [vmem:[#allocation10 + $0x7f8] sm:$0xff]  ;;  %v1957_v54 = vld [vmem:[#allocation10 + $0x7e8] sm:$0xff] }
 0x461   :  { %2209 = vmatpush.msrb.mxu2 %v1857_v57  ;;  %2150 = vmatpush.msra.mxu3 %v1759_v59  ;;  %v1907_v52 = vld [vmem:[#allocation10 + $0x658] sm:$0xff]  ;;  %v1905_v55 = vld [vmem:[#allocation10 + $0x648] sm:$0xff] }
 0x462   :  { %2190 = vmatpush.msrb.mxu1 %v1823_v61  ;;  %2142 = vmatmul.f32.vlgmr.msra.gmra.mxu2 %v3732_v15  ;;  %v1815_v15 = vld [vmem:[#allocation10 + $0x378] sm:$0xff]  ;;  %v1889_v59 = vld [vmem:[#allocation10 + $0x5c8] sm:$0xff] }
 0x463   :  { %2210 = vmatpush.msrb.mxu2 %v1855_v62  ;;  %2151 = vmatpush.msra.mxu3 %v1757_v63  ;;  %v1891_v56 = vld [vmem:[#allocation10 + $0x5d8] sm:$0xff]  ;;  %v1953_v61 = vld [vmem:[#allocation10 + $0x7c8] sm:$0xff] }
 0x464   :  { %2191 = vmatpush.msrb.mxu1 %v1821_v0  ;;  %2255 = vmatpush.msrb.mxu0 %v1909_v45  ;;  %v1955_v57 = vld [vmem:[#allocation10 + $0x7d8] sm:$0xff]  ;;  %v1885_v63 = vld [vmem:[#allocation10 + $0x5a8] sm:$0xff] }
 0x465   :  { %2211 = vmatpush.msrb.mxu2 %v1853_v2  ;;  %2152 = vmatpush.msra.mxu3 %v1755_v3  ;;  %v1903_v58 = vld [vmem:[#allocation10 + $0x638] sm:$0xff]  ;;  %v1949_v0 = vld [vmem:[#allocation10 + $0x7a8] sm:$0xff] }
 0x466   :  { %2192 = vmatpush.msrb.mxu1 %v1819_v6  ;;  %2256 = vmatpush.msrb.mxu0 %v1907_v52  ;;  %v1951_v62 = vld [vmem:[#allocation10 + $0x7b8] sm:$0xff]  ;;  %v1945_v6 = vld [vmem:[#allocation10 + $0x788] sm:$0xff] }
 0x467   :  { %2212 = vmatpush.msrb.mxu2 %v1851_v7  ;;  %2153 = vmatpush.msra.mxu3 %v1753_v28  ;;  %v1883_v2 = vld [vmem:[#allocation10 + $0x598] sm:$0xff]  ;;  %v2293_v32 = vld [vmem:[%s3916_s9 + $0x28] sm:$0xff] }
 0x468   :  { %2193 = vmatpush.msrb.mxu1 %v1817_v10  ;;  %2257 = vmatpush.msrb.mxu0 %v1905_v55  ;;  %v1947_v3 = vld [vmem:[#allocation10 + $0x798] sm:$0xff]  ;;  %v2289_v36 = vld [vmem:[%s3916_s9 + $0x8] sm:$0xff] }
 0x469   :  { %2213 = vmatpush.msrb.mxu2 %v1849_v12  ;;  %2154 = vmatpush.msra.mxu3 %v1751_v13  ;;  %v1879_v7 = vld [vmem:[#allocation10 + $0x578] sm:$0xff]  ;;  %v1873_v12 = vld [vmem:[#allocation10 + $0x548] sm:$0xff] }
 0x46a   :  { %2194 = vmatpush.msrb.mxu1 %v1815_v15  ;;  %2258 = vmatpush.msrb.mxu0 %v1903_v58  ;;  %v1943_v28 = vld [vmem:[#allocation10 + $0x778] sm:$0xff]  ;;  %v1937_v13 = vld [vmem:[#allocation10 + $0x748] sm:$0xff] }
 0x46b   :  { %2214 = vmatpush.msrb.mxu2 %v1847_v16  ;;  %2122 = vmatmul.f32.vlgmr.msra.gmra.mxu1 %v3761_v17  ;;  %v1875_v10 = vld [vmem:[#allocation10 + $0x558] sm:$0xff]  ;;  %v1869_v16 = vld [vmem:[#allocation10 + $0x528] sm:$0xff] }
 0x46c   :  { %2155 = vmatpush.msra.mxu3 %v1749_v20  ;;  %2195 = vmatpush.msrb.mxu1 %v1813_v21  ;;  %v1935_v15 = vld [vmem:[#allocation10 + $0x738] sm:$0xff]  ;;  %v2302_v20 = vld [vmem:[%s3916_s9 + $0x70] sm:$0xff] }
 0x46d   :  { %2215 = vmatpush.msrb.mxu2 %v1845_v22  ;;  %v1867_v21 = vld [vmem:[#allocation10 + $0x518] sm:$0xff] }
 0x46e   :  { %2156 = vmatpush.msra.mxu3 %v1747_v24  ;;  %2196 = vmatpush.msrb.mxu1 %v1811_v25  ;;  %v1931_v22 = vld [vmem:[#allocation10 + $0x718] sm:$0xff]  ;;  %v1865_v24 = vld [vmem:[#allocation10 + $0x508] sm:$0xff] }
 0x46f   :  { %2216 = vmatpush.msrb.mxu2 %v1843_v26  ;;  %v1929_v25 = vld [vmem:[#allocation10 + $0x708] sm:$0xff]  ;;  %v2300_v26 = vld [vmem:[%s3916_s9 + $0x60] sm:$0xff] }
 0x470   :  { %2157 = vmatpush.msra.mxu3 %v1745_v29  ;;  %2197 = vmatpush.msrb.mxu1 %v1809_v30  ;;  %v2298_v29 = vld [vmem:[%s3916_s9 + $0x50] sm:$0xff]  ;;  %v2297_v30 = vld [vmem:[%s3916_s9 + $0x48] sm:$0xff] }
 0x471   :  { %2217 = vmatpush.msrb.mxu2 %v1841_v31  ;;  %v2294_v31 = vld [vmem:[%s3916_s9 + $0x30] sm:$0xff] }
 0x472   :  { %2158 = vmatpush.msra.mxu3 %v1743_v33  ;;  %2198 = vmatpush.msrb.mxu1 %v1807_v34  ;;  %v2292_v33 = vld [vmem:[%s3916_s9 + $0x20] sm:$0xff]  ;;  %v2291_v34 = vld [vmem:[%s3916_s9 + $0x18] sm:$0xff] }
 0x473   :  { %2218 = vmatpush.msrb.mxu2 %v1839_v35  ;;  %v2290_v35 = vld [vmem:[%s3916_s9 + $0x10] sm:$0xff] }
 0x474   :  { %2159 = vmatpush.msra.mxu3 %v1741_v37  ;;  %2199 = vmatpush.msrb.mxu1 %v1805_v38  ;;  %v2288_v37 = vld [vmem:[%s3916_s9] sm:$0xff] }
 0x475   :  { %2219 = vmatpush.msrb.mxu2 %v1837_v39  ;;  %v1960_v38 = vld [vmem:[%s3915_s8] sm:$0x3] }
 0x476   :  { %2160 = vmatpush.msra.mxu3 %v1739_v42  ;;  %2200 = vmatpush.msrb.mxu1 %v1803_v43  ;;  %v1962_v39 = vperm.slane %v1960_v38, 0  ;;  %v2003_v43 = vpop.f32.mrf.mxu2 }
 0x477   :  { %2220 = vmatpush.msrb.mxu2 %v1835_v44 }
 0x478   :  { %2161 = vmatpush.msra.mxu3 %v1737_v46  ;;  %2201 = vmatpush.msrb.mxu1 %v1801_v47  ;;  %v1984_v42 = vadd.f32 %v1983_v40, %v1962_v39  ;;  %v2404_v39 = vld [vmem:[%s3920_s13 + $0x18] sm:$0xff]  ;;  %v2698_v40 = vld [vmem:[%s3917_s10] ss:$0 sm:$0xff] }
 0x479   :  { %2221 = vmatpush.msrb.mxu2 %v1833_v49  ;;  %2162 = vmatmul.f32.vlgmr.msra.gmra.mxu3 %v3736_v18  ;;  %v1901_v18 = vld [vmem:[#allocation10 + $0x628] sm:$0xff] }
 0x47a   :  { %2202 = vmatmul.f32.vlgmr.msrb.gmra.mxu1 %v3748_v41  ;;  %2222 = vmatmul.f32.vlgmr.msrb.gmra.mxu2 %v3752_v48  ;;  %v1887_v41 = vld [vmem:[#allocation10 + $0x5b8] sm:$0xff]  ;;  %v2004_v44 = vadd.f32 %v2003_v43, %v1984_v42 }
 0x47b   :  { %2226 = vmatpush.msrb.mxu3 %v1895_v50  ;;  %2266 = vmatpush.msra.mxu1 %v1959_v51  ;;  %v1899_v48 = vld [vmem:[#allocation10 + $0x618] sm:$0xff] }
 0x47c   :  { %2259 = vmatpush.msrb.mxu0 %v1901_v18  ;;  %2324 = vmatpush.msra.mxu2 %v2303_v19 }
 0x47d   :  { %2227 = vmatpush.msrb.mxu3 %v1893_v53  ;;  %2267 = vmatpush.msra.mxu1 %v1957_v54  ;;  %v2319_v53 = vld [vmem:[%s3916_s9 + $0xf8] sm:$0xff]  ;;  %v2318_v54 = vld [vmem:[%s3916_s9 + $0xf0] sm:$0xff] }
 0x47e   :  { %2260 = vmatpush.msrb.mxu0 %v1899_v48  ;;  %2325 = vmatpush.msra.mxu2 %v2302_v20  ;;  %v2314_v48 = vld [vmem:[%s3916_s9 + $0xd0] sm:$0xff] }
 0x47f   :  { %2228 = vmatpush.msrb.mxu3 %v1891_v56  ;;  %2268 = vmatpush.msra.mxu1 %v1955_v57  ;;  %v2103_v56 = vpop.f32.mrf.mxu0  ;;  %v2317_v57 = vld [vmem:[%s3916_s9 + $0xe8] sm:$0xff] }
 0x480   :  { %2261 = vmatpush.msrb.mxu0 %v1897_v1  ;;  %2326 = vmatpush.msra.mxu2 %v2301_v23  ;;  %v2311_v1 = vld [vmem:[%s3916_s9 + $0xb8] sm:$0xff] }
 0x481   :  { %2229 = vmatpush.msrb.mxu3 %v1889_v59  ;;  %2269 = vmatpush.msra.mxu1 %v1953_v61  ;;  %v2316_v59 = vld [vmem:[%s3916_s9 + $0xe0] sm:$0xff] }
 0x482   :  { %2262 = vmatmul.f32.vlgmr.msrb.gmra.mxu0 %v3740_v4  ;;  %v1933_v4 = vld [vmem:[#allocation10 + $0x728] sm:$0xff]  ;;  %2327 = vmatpush.msra.mxu2 %v2300_v26 }
 0x483   :  { %2230 = vmatpush.msrb.mxu3 %v1887_v41  ;;  %2270 = vmatpush.msra.mxu1 %v1951_v62  ;;  %v2315_v41 = vld [vmem:[%s3916_s9 + $0xd8] sm:$0xff] }
 0x484   :  { %2328 = vmatpush.msra.mxu2 %v2299_v27 }
 0x485   :  { %2231 = vmatpush.msrb.mxu3 %v1885_v63  ;;  %2271 = vmatpush.msra.mxu1 %v1949_v0  ;;  %v2313_v63 = vld [vmem:[%s3916_s9 + $0xc8] sm:$0xff]  ;;  %v2312_v0 = vld [vmem:[%s3916_s9 + $0xc0] sm:$0xff] }
 0x486   :  { %2329 = vmatpush.msra.mxu2 %v2298_v29  ;;  %v2372_v29 = vld [vmem:[#allocation11 + $0x38] sm:$0xff] }
 0x487   :  { %2232 = vmatpush.msrb.mxu3 %v1883_v2  ;;  %2272 = vmatpush.msra.mxu1 %v1947_v3  ;;  %v2310_v2 = vld [vmem:[%s3916_s9 + $0xb0] sm:$0xff]  ;;  %v2309_v3 = vld [vmem:[%s3916_s9 + $0xa8] sm:$0xff] }
 0x488   :  { %2330 = vmatpush.msra.mxu2 %v2297_v30  ;;  %v2371_v30 = vld [vmem:[#allocation11 + $0x30] sm:$0xff]  ;;  %2388 = vmatpush.msra.mxu0 %v2372_v29 }
 0x489   :  { %2233 = vmatpush.msrb.mxu3 %v1881_v5  ;;  %2273 = vmatpush.msra.mxu1 %v1945_v6  ;;  %v2308_v5 = vld [vmem:[%s3916_s9 + $0xa0] sm:$0xff]  ;;  %v2307_v6 = vld [vmem:[%s3916_s9 + $0x98] sm:$0xff] }
 0x48a   :  { %2389 = vmatpush.msra.mxu0 %v2371_v30 }
 0x48b   :  { %2234 = vmatpush.msrb.mxu3 %v1879_v7  ;;  %2274 = vmatpush.msra.mxu1 %v1943_v28  ;;  %v2306_v7 = vld [vmem:[%s3916_s9 + $0x90] sm:$0xff]  ;;  %v2305_v28 = vld [vmem:[%s3916_s9 + $0x88] sm:$0xff] }
 0x48d   :  { %2235 = vmatpush.msrb.mxu3 %v1877_v8  ;;  %2275 = vmatpush.msra.mxu1 %v1941_v9  ;;  %v2304_v8 = vld [vmem:[%s3916_s9 + $0x80] sm:$0xff]  ;;  %v1963_v9 = vperm.slane %v1960_v38, 1 }
 0x48e   :  { %v2405_v38 = vld [vmem:[%s3920_s13 + $0x20] sm:$0xff] }
 0x48f   :  { %2236 = vmatpush.msrb.mxu3 %v1875_v10  ;;  %2276 = vmatpush.msra.mxu1 %v1939_v11 }
 0x491   :  { %2237 = vmatpush.msrb.mxu3 %v1873_v12  ;;  %2277 = vmatpush.msra.mxu1 %v1937_v13 }
 0x493   :  { %2238 = vmatpush.msrb.mxu3 %v1871_v14  ;;  %2278 = vmatpush.msra.mxu1 %v1935_v15 }
 0x495   :  { %2239 = vmatpush.msrb.mxu3 %v1869_v16  ;;  %2279 = vmatpush.msra.mxu1 %v1933_v4 }
 0x497   :  { %2240 = vmatpush.msrb.mxu3 %v1867_v21  ;;  %2280 = vmatpush.msra.mxu1 %v1931_v22 }
 0x499   :  { %2241 = vmatpush.msrb.mxu3 %v1865_v24  ;;  %2281 = vmatpush.msra.mxu1 %v1929_v25 }
 0x49a   :  { %2242 = vmatmul.f32.vlgmr.msrb.gmra.mxu3 %v3756_v60  ;;  %2282 = vmatmul.f32.vlgmr.msra.gmra.mxu1 %v3761_v17  ;;  %v2296_v60 = vld [vmem:[%s3916_s9 + $0x40] sm:$0xff]  ;;  %v2295_v17 = vld [vmem:[%s3916_s9 + $0x38] sm:$0xff] }
 0x49b   :  { %2331 = vmatpush.msra.mxu2 %v2296_v60  ;;  %2344 = vmatpush.msra.mxu3 %v2319_v53  ;;  %v2370_v60 = vld [vmem:[#allocation11 + $0x28] sm:$0xff] }
 0x49c   :  { %2390 = vmatpush.msra.mxu0 %v2370_v60 }
 0x49d   :  { %2332 = vmatpush.msra.mxu2 %v2295_v17  ;;  %2345 = vmatpush.msra.mxu3 %v2318_v54  ;;  %v2369_v17 = vld [vmem:[#allocation11 + $0x20] sm:$0xff] }
 0x49e   :  { %2391 = vmatpush.msra.mxu0 %v2369_v17 }
 0x49f   :  { %2333 = vmatpush.msra.mxu2 %v2294_v31  ;;  %2346 = vmatpush.msra.mxu3 %v2317_v57  ;;  %v2368_v31 = vld [vmem:[#allocation11 + $0x18] sm:$0xff] }
 0x4a0   :  { %2392 = vmatpush.msra.mxu0 %v2368_v31 }
 0x4a1   :  { %2334 = vmatpush.msra.mxu2 %v2293_v32  ;;  %2347 = vmatpush.msra.mxu3 %v2316_v59  ;;  %v2367_v32 = vld [vmem:[#allocation11 + $0x10] sm:$0xff] }
 0x4a2   :  { %2393 = vmatpush.msra.mxu0 %v2367_v32 }
 0x4a3   :  { %2335 = vmatpush.msra.mxu2 %v2292_v33  ;;  %2348 = vmatpush.msra.mxu3 %v2315_v41  ;;  %v2366_v33 = vld [vmem:[#allocation11 + $0x8] sm:$0xff] }
 0x4a4   :  { %2394 = vmatpush.msra.mxu0 %v2366_v33 }
 0x4a5   :  { %2336 = vmatpush.msra.mxu2 %v2291_v34  ;;  %2349 = vmatpush.msra.mxu3 %v2314_v48  ;;  %v2365_v34 = vld [vmem:[#allocation11] sm:$0xff] }
 0x4a6   :  { %2395 = vmatpush.msra.mxu0 %v2365_v34 }
 0x4a7   :  { %2337 = vmatpush.msra.mxu2 %v2290_v35  ;;  %2350 = vmatpush.msra.mxu3 %v2313_v63  ;;  %v2408_v35 = vld [vmem:[%s3920_s13 + $0x38] sm:$0xff] }
 0x4a8   :  { %2424 = vmatpush.msrb.mxu0 %v2408_v35 }
 0x4a9   :  { %2338 = vmatpush.msra.mxu2 %v2289_v36  ;;  %2351 = vmatpush.msra.mxu3 %v2312_v0  ;;  %v2407_v36 = vld [vmem:[%s3920_s13 + $0x30] sm:$0xff] }
 0x4aa   :  { %2425 = vmatpush.msrb.mxu0 %v2407_v36 }
 0x4ab   :  { %2339 = vmatpush.msra.mxu2 %v2288_v37  ;;  %2352 = vmatpush.msra.mxu3 %v2311_v1  ;;  %v2406_v37 = vld [vmem:[%s3920_s13 + $0x28] sm:$0xff] }
 0x4ac   :  { %2426 = vmatpush.msrb.mxu0 %v2406_v37 }
 0x4ad   :  { %2353 = vmatpush.msra.mxu3 %v2310_v2 }
 0x4ae   :  { %2427 = vmatpush.msrb.mxu0 %v2405_v38 }
 0x4af   :  { %2354 = vmatpush.msra.mxu3 %v2309_v3 }
 0x4b0   :  { %2428 = vmatpush.msrb.mxu0 %v2404_v39 }
 0x4b1   :  { %2355 = vmatpush.msra.mxu3 %v2308_v5 }
 0x4b3   :  { %2356 = vmatpush.msra.mxu3 %v2307_v6 }
 0x4b5   :  { %2357 = vmatpush.msra.mxu3 %v2306_v7 }
 0x4b7   :  { %2358 = vmatpush.msra.mxu3 %v2305_v28 }
 0x4b9   :  { %2359 = vmatpush.msra.mxu3 %v2304_v8 }
 0x4d5   :  { %v2043_v47 = vpop.f32.mrf.mxu1 }
 0x4d6   :  { %v2183_v14 = vpop.f32.mrf.mxu0 }
 0x4db   :  { %v2023_v45 = vpop.f32.mrf.mxu3 }
 0x4dc   :  { %v2024_v46 = vadd.f32 %v2023_v45, %v2004_v44 }
 0x4dd   :  { %v2063_v50 = vpop.f32.mrf.mxu2 }
 0x4de   :  { %v2044_v49 = vadd.f32 %v2043_v47, %v2024_v46  ;;  %v2403_v47 = vld [vmem:[%s3920_s13 + $0x10] sm:$0xff] }
 0x4df   :  { %2429 = vmatpush.msrb.mxu0 %v2403_v47 }
 0x4e0   :  { %v2064_v51 = vadd.f32 %v2063_v50, %v2044_v49  ;;  %v2402_v49 = vld [vmem:[%s3920_s13 + $0x8] sm:$0xff]  ;;  %v2401_v50 = vld [vmem:[%s3920_s13] sm:$0xff]  ;;  %s2445_s13 = sshll.u32 %s3922_s15, 4  ;;  %s2446_s13 = int_to_ptr.hbm [resolvable:$true] %s2445_s13 }
 0x4e1   :  { %2430 = vmatpush.msrb.mxu0 %v2402_v49 }
 0x4e3   :  { %v2083_v52 = vpop.f32.mrf.mxu3  ;;  %2431 = vmatpush.msrb.mxu0 %v2401_v50 }
 0x4e4   :  { %v2084_v55 = vadd.f32 %v2083_v52, %v2064_v51  ;;  %v2699_v51 = vld [vmem:[%s3919_s12] ss:$0 sm:$0xff] }
 0x4e5   :  { %v2143_v10 = vpop.f32.mrf.mxu2 }
 0x4e6   :  { %v2104_v58 = vadd.f32 %v2103_v56, %v2084_v55  ;;  %v2144_v11 = vadd.f32 %v2143_v10, %v1963_v9  ;;  %v2700_v55 = vld [vmem:[%s3921_s14] ss:$0 sm:$0xff] }
 0x4e8   :  { %v2123_v61 = vpop.f32.mrf.mxu1 }
 0x4e9   :  { %v2124_v18 = vadd.f32 %v2123_v61, %v2104_v58 }
 0x4eb   :  { %v2286_v62 = vmax.f32 %v2124_v18, 0.0 }
 0x4ed   :  { %2340 = vmatmul.f32.vlgmr.msra.gmra.mxu2 %v2286_v62 }
 0x4f7   :  { %v2203_v16 = vpop.f32.mrf.mxu1 }
 0x4fc   :  { %v2163_v12 = vpop.f32.mrf.mxu3 }
 0x4fd   :  { %v2164_v13 = vadd.f32 %v2163_v12, %v2144_v11  ;;  %v2223_v19 = vpop.f32.mrf.mxu2 }
 0x4ff   :  { %v2184_v15 = vadd.f32 %v2183_v14, %v2164_v13  ;;  %v2263_v22 = vpop.f32.mrf.mxu0 }
 0x501   :  { %v2204_v4 = vadd.f32 %v2203_v16, %v2184_v15 }
 0x503   :  { %v2224_v20 = vadd.f32 %v2223_v19, %v2204_v4 }
 0x517   :  { %v2283_v24 = vpop.f32.mrf.mxu1 }
 0x51d   :  { %v2243_v21 = vpop.f32.mrf.mxu3 }
 0x51e   :  { %v2244_v23 = vadd.f32 %v2243_v21, %v2224_v20 }
 0x520   :  { %v2264_v25 = vadd.f32 %v2263_v22, %v2244_v23 }
 0x522   :  { %v2284_v26 = vadd.f32 %v2283_v24, %v2264_v25 }
 0x524   :  { %v2287_v27 = vmax.f32 %v2284_v26, 0.0 }
 0x526   :  { %2360 = vmatmul.f32.vlgmr.msra.gmra.mxu3 %v2287_v27 }
 0x570   :  { %v2341_v42 = vpop.f32.mrf.mxu2 }
 0x571   :  { %v2342_v43 = vadd.f32 %v2698_v40, %v2341_v42 }
 0x5a9   :  { %v2361_v44 = vpop.f32.mrf.mxu3 }
 0x5aa   :  { %v2362_v45 = vadd.f32 %v2361_v44, %v2342_v43 }
 0x5ac   :  { %v2364_v46 = vmax.f32 %v2362_v45, 0.0 }
 0x5ae   :  { %2600 = vmatmul.msk.f32.vlgmr.msra.gmra.mxu0 %vm132_vm8, %v2364_v46 }
 0x62b   :  { %v2397_v52 = vpop.f32.mrf.mxu0 }
 0x62c   :  { %v2398_v53 = vadd.f32 %v2699_v51, %v2397_v52 }
 0x62e   :  { %v2400_v54 = vmax.f32 %v2398_v53, 0.0 }
 0x630   :  { %2601 = vmatmul.msk.f32.vlgmr.msrb.gmra.mxu0 %vm132_vm8, %v2400_v54 }
 0x6ad   :  { %v2433_v56 = vpop.f32.mrf.mxu0 }
 0x6ae   :  { %v2434_v57 = vadd.f32 %v2700_v55, %v2433_v56 }
 0x6b0   :  { %2437 = vst.msk [vmem:[#allocation13] sm:$0x3] %vm2436_vm12, %v2434_v57 }
 0x6b1   :  { %2448 = dma.vmem_to_hbm [thread:$0]  %s2444_s23, 32, %s2446_s13, [#allocation7]  }
 0x6b2   :  { %2827 = dma.done.wait [#allocation7], 32  }
 0x6b3   :  { %2828 = vsyncadd [#allocation7], 4294967264 }
 0x6b4   :  { %2453 = vsyncpa [#allocation6], 1 }
 0x6b5   :  { %2454 = vsyncpa [#allocation9], 1 }
 0x6b6   :  { %2455 = vsyncpa [#allocation12], 1 }
 0x6b7   :  { %2456 = vsyncpa [#allocation7], 1 }

</bundles_post_ra>
